<compile_context>
chip_gen: v7x
topology: tpu7x:2x2x1
jax: 0.10.0
libtpu: 0.0.40
codegen_flags: <defaults>
</compile_context>

<pallas_src>
import functools
import math

import numpy as np

import jax
import jax.numpy as jnp
from jax.experimental import pallas as pl
from jax.experimental.pallas import tpu as pltpu

VIS_FLAT_IN = 63 * 50 * 2   # 6300
VIS_EMB = 1000
TAC_IN = 156
GRU_IN = VIS_EMB + TAC_IN   # 1156


# ---------------------------------------------------------------------------
# Fused kernel: (vis,tact) input projection for all T steps -> GRU recurrence
# (unrolled) -> final Linear on the last hidden state. Single invocation,
# every operand fully resident in VMEM (~2.5 MiB total, bf16 weights).
# ---------------------------------------------------------------------------
def _fused_forward_kernel(vis_ref, tact_ref, w_in_ref, b_in_ref, w_tac_ref,
                          w_hh_ref, b_hh_ref, w_fc_ref, b_fc_ref, y_ref,
                          *, B, T, H):
    G = 3 * H

    # Input projection for every (b, t) row at once; rows are batch-major
    # (row index = b*T + t, i.e. the free reshape of the input — no wrapper
    # transpose).  bf16 x bf16 on the MXU with f32 accumulation.
    xv = jnp.dot(vis_ref[...], w_in_ref[...], preferred_element_type=jnp.float32)
    xt = jnp.dot(tact_ref[...], w_tac_ref[...], preferred_element_type=jnp.float32)
    xp = xv + xt + b_in_ref[...]                      # (B*T, 3H) f32, bias added once

    # View xp as (B, T, 3H) (layout-trivial reshape).  Each GRU step then reads
    # a static in-tile slice xp3[:, t, :] of this tiny (~6 KB) VMEM array — the
    # big time-major transpose of vis in the wrapper is gone.
    xp3 = xp.reshape(B, T, G)

    # Hidden-state weights cast up once (f32 recurrence state for accuracy).
    w_hh = w_hh_ref[...].astype(jnp.float32)          # (H, 3H)
    b_hh = b_hh_ref[...]                              # (1, 3H) f32

    # GRU recurrence; static Python loop == fully unrolled at trace time
    # (T=8 tiny steps -> gives the scheduler full cross-step visibility).
    h = jnp.zeros((B, H), jnp.float32)
    for t in range(T):
        gx = xp3[:, t, :]                             # (B, 3H), static slice
        gh = jnp.dot(h, w_hh, preferred_element_type=jnp.float32) + b_hh
        r = jax.nn.sigmoid(gx[:, 0 * H:1 * H] + gh[:, 0 * H:1 * H])
        z = jax.nn.sigmoid(gx[:, 1 * H:2 * H] + gh[:, 1 * H:2 * H])
        n = jnp.tanh(gx[:, 2 * H:3 * H] + r * gh[:, 2 * H:3 * H])
        h = (1.0 - z) * n + z * h

    # fc(out[:, -1, :]) == fc(h_T)
    w_fc = w_fc_ref[...].astype(jnp.float32)
    y_ref[...] = (jnp.dot(h, w_fc, preferred_element_type=jnp.float32)
                  + b_fc_ref[...]).astype(y_ref.dtype)


# ---------------------------------------------------------------------------
# Parameters (deterministic, PyTorch-style uniform init; shapes from __init__)
# ---------------------------------------------------------------------------
def init_params(key, hidden_size, output_size):
    H = hidden_size
    ks = jax.random.split(key, 8)

    def unif(k, shape, bound):
        return jax.random.uniform(k, shape, jnp.float32, -bound, bound)

    b_vis = 1.0 / math.sqrt(VIS_FLAT_IN)
    b_gru = 1.0 / math.sqrt(H)
    b_lin = 1.0 / math.sqrt(H)
    return {
        # fc_vis: Linear(6300 -> 1000); stored transposed (in, out)
        "w_vis": unif(ks[0], (VIS_FLAT_IN, VIS_EMB), b_vis),
        "b_vis": unif(ks[1], (VIS_EMB,), b_vis),
        # GRU(1156 -> H), 1 layer; gates ordered [r, z, n]
        "w_ih": unif(ks[2], (GRU_IN, 3 * H), b_gru),
        "b_ih": unif(ks[3], (3 * H,), b_gru),
        "w_hh": unif(ks[4], (H, 3 * H), b_gru),
        "b_hh": unif(ks[5], (3 * H,), b_gru),
        # fc: Linear(H -> output_size)
        "w_fc": unif(ks[6], (H, output_size), b_lin),
        "b_fc": unif(ks[7], (output_size,), b_lin),
    }


def fold_params(params, weight_dtype=jnp.bfloat16):
    """Offline weight prep: fold fc_vis into the GRU input projection.

    fc_vis is linear and its output feeds only the GRU input matmul, so
        gx = (vis @ W_vis + b_vis) @ W_ih_vis + tact @ W_ih_tac + b_ih
           = vis @ (W_vis @ W_ih_vis) + tact @ W_ih_tac + (b_vis @ W_ih_vis + b_ih)
    The fold is done in float64 on host (exact to well below bf16 resolution),
    then the large matrices are stored bf16 to halve the HBM weight stream.
    Biases stay f32 (they are tiny and added once).
    NOTE: on v5e a further int8 (per-column scale) quantization of w_in, and on
    v7x fp8(e4m3), would halve the stream again — left out here for portability.
    """
    w_vis64 = np.asarray(params["w_vis"], np.float64)
    b_vis64 = np.asarray(params["b_vis"], np.float64)
    w_ih_vis64 = np.asarray(params["w_ih"][:VIS_EMB], np.float64)
    b_ih64 = np.asarray(params["b_ih"], np.float64)

    w_in64 = w_vis64 @ w_ih_vis64                       # (6300, 3H), float64
    b_in64 = b_vis64 @ w_ih_vis64 + b_ih64              # (3H,),     float64

    return {
        "w_in": jnp.asarray(w_in64, dtype=weight_dtype),           # (6300, 3H) bf16
        "b_in": jnp.asarray(b_in64, dtype=jnp.float32),            # (3H,)      f32
        "w_tac": params["w_ih"][VIS_EMB:].astype(weight_dtype),    # (156, 3H)  bf16
        "w_hh": params["w_hh"].astype(weight_dtype),               # (H, 3H)    bf16
        "b_hh": params["b_hh"].astype(jnp.float32),
        "w_fc": params["w_fc"].astype(weight_dtype),               # (H, O)     bf16
        "b_fc": params["b_fc"].astype(jnp.float32),
    }


# ---------------------------------------------------------------------------
# Forward pass: only free reshapes / tiny casts in plain JAX; all dense math
# + the recurrence in one pallas_call.
# ---------------------------------------------------------------------------
def multi_mlp_gru_forward(fused, in_tact, in_vis, hidden_size):
    B = in_vis.shape[0]
    T = in_vis.shape[-1]          # the module uses shape[-1] as the time axis
    H = hidden_size
    G = 3 * H
    O = fused["w_fc"].shape[1]
    act_dtype = fused["w_in"].dtype   # bf16 activations -> native MXU bf16 pass

    # torch: in_tact.squeeze().permute(2, 0, 1).  Squeeze only non-batch
    # singleton axes so B == 1 cannot silently drop the batch dim.
    squeeze_axes = tuple(i for i, s in enumerate(in_tact.shape) if s == 1 and i != 0)
    tact = jnp.squeeze(in_tact, axis=squeeze_axes) if squeeze_axes else in_tact
    # Batch-major rows (b*T + t) to match vis; per-step ordering handled in-kernel.
    tact2d = jnp.transpose(tact, (0, 2, 1)).reshape(B * T, TAC_IN).astype(act_dtype)

    # in_vis.reshape(B, T, 6300): replicated verbatim (row-major, like torch).
    # (B*T, 6300) is the same flat order — a FREE reshape, no wrapper transpose.
    # TODO(synk): this mixes middle dims with T exactly as the PyTorch module's
    # literal reshape does for a (B, ..., T) input; faithful to the spec.
    vis2d = in_vis.reshape(B * T, VIS_FLAT_IN).astype(act_dtype)

    kernel = functools.partial(_fused_forward_kernel, B=B, T=T, H=H)
    return pl.pallas_call(
        kernel,
        out_shape=jax.ShapeDtypeStruct((B, O), jnp.float32),
        # No grid: single invocation, whole arrays auto-DMA'd into VMEM
        # (footprint ~2.5 MiB with bf16 weights; 8 MiB leaves headroom for the
        # enclosing program on every generation incl. v7x's smaller VMEM).
        compiler_params=pltpu.CompilerParams(vmem_limit_bytes=8 << 20),
    )(vis2d, tact2d,
      fused["w_in"], fused["b_in"].reshape(1, G),
      fused["w_tac"],
      fused["w_hh"], fused["b_hh"].reshape(1, G),
      fused["w_fc"], fused["b_fc"].reshape(1, O))


# ---------------------------------------------------------------------------
# Pure-JAX references.
#   reference_forward_fused: same folded/bf16 weights as the kernel (tight check
#       of the kernel logic itself).
#   reference_forward: full-precision, unfused, mirrors the PyTorch module
#       op-for-op (bounds the bf16 quantization error of the fast path).
# ---------------------------------------------------------------------------
def reference_forward_fused(fused, in_tact, in_vis, hidden_size):
    B, T, H = in_vis.shape[0], in_vis.shape[-1], hidden_size
    G = 3 * H
    act = fused["w_in"].dtype
    vis = in_vis.reshape(B * T, VIS_FLAT_IN).astype(act)
    tact = jnp.transpose(in_tact, (0, 2, 1)).reshape(B * T, TAC_IN).astype(act)
    xp = (jnp.dot(vis, fused["w_in"], preferred_element_type=jnp.float32)
          + jnp.dot(tact, fused["w_tac"], preferred_element_type=jnp.float32)
          + fused["b_in"])
    xp3 = xp.reshape(B, T, G)
    w_hh = fused["w_hh"].astype(jnp.float32)
    h = jnp.zeros((B, H), jnp.float32)
    for t in range(T):
        gx = xp3[:, t, :]
        gh = h @ w_hh + fused["b_hh"]
        r = jax.nn.sigmoid(gx[:, :H] + gh[:, :H])
        z = jax.nn.sigmoid(gx[:, H:2 * H] + gh[:, H:2 * H])
        n = jnp.tanh(gx[:, 2 * H:] + r * gh[:, 2 * H:])
        h = (1.0 - z) * n + z * h
    return h @ fused["w_fc"].astype(jnp.float32) + fused["b_fc"]


def reference_forward(params, in_tact, in_vis, hidden_size):
    B, T, H = in_vis.shape[0], in_vis.shape[-1], hidden_size
    tact = jnp.transpose(in_tact, (2, 0, 1))          # (T, B, 156)
    vis = in_vis.reshape(B, T, VIS_FLAT_IN)
    viz = vis @ params["w_vis"] + params["b_vis"]
    viz = jnp.transpose(viz, (1, 0, 2))
    emb = jnp.concatenate([viz, tact], axis=2)
    h = jnp.zeros((B, H), jnp.float32)
    for t in range(T):
        gx = emb[t] @ params["w_ih"] + params["b_ih"]
        gh = h @ params["w_hh"] + params["b_hh"]
        r = jax.nn.sigmoid(gx[:, :H] + gh[:, :H])
        z = jax.nn.sigmoid(gx[:, H:2 * H] + gh[:, H:2 * H])
        n = jnp.tanh(gx[:, 2 * H:] + r * gh[:, 2 * H:])
        h = (1.0 - z) * n + z * h
    return h @ params["w_fc"] + params["b_fc"]


if __name__ == "__main__":
    hidden_size = 32
    output_size = 8
    B, T = 2, 8

    key = jax.random.PRNGKey(0)
    k_tact, k_vis, k_params = jax.random.split(key, 3)

    # in_tact: (B, 156, T); in_vis: (B, 2, 63, 50, T) (shape[0]=B, shape[-1]=T,
    # middle dims flatten to 50*63*2 = 6300, matching the module's reshape).
    in_tact = jax.random.normal(k_tact, (B, TAC_IN, T), dtype=jnp.float32)
    in_vis = jax.random.normal(k_vis, (B, 2, 63, 50, T), dtype=jnp.float32)

    params = init_params(k_params, hidden_size, output_size)
    fused = fold_params(params)   # one-time weight prep (offline in practice)

    fwd = jax.jit(functools.partial(multi_mlp_gru_forward, hidden_size=hidden_size))
    y = jax.block_until_ready(fwd(fused, in_tact, in_vis))
    assert y.shape == (B, output_size)

    # Tight check: kernel vs. pure-JAX path using the SAME folded bf16 weights
    # (validates the kernel itself; differences are only f32-accumulation order).
    y_ref_fused = reference_forward_fused(fused, in_tact, in_vis, hidden_size)
    assert bool(jnp.allclose(y, y_ref_fused, atol=5e-3, rtol=5e-3))

    # Sanity check: full-precision unfused reference mirroring the PyTorch module
    # (3e-2 bounds the intentional bf16 weight/activation quantization error).
    y_ref = reference_forward(params, in_tact, in_vis, hidden_size)
    assert bool(jnp.allclose(y, y_ref, atol=3e-2, rtol=3e-2))

    print("KERNEL_OK")
</pallas_src>

<mosaic_0001>
module attributes {stable_mosaic.version = 11 : i64} {
  func.func @_fused_forward_kernel(%arg0: memref<16x6300xbf16, #tpu.memory_space<vmem>>, %arg1: memref<16x156xbf16, #tpu.memory_space<vmem>>, %arg2: memref<6300x96xbf16, #tpu.memory_space<vmem>>, %arg3: memref<1x96xf32, #tpu.memory_space<vmem>>, %arg4: memref<156x96xbf16, #tpu.memory_space<vmem>>, %arg5: memref<32x96xbf16, #tpu.memory_space<vmem>>, %arg6: memref<1x96xf32, #tpu.memory_space<vmem>>, %arg7: memref<32x8xbf16, #tpu.memory_space<vmem>>, %arg8: memref<1x8xf32, #tpu.memory_space<vmem>>, %arg9: memref<2x8xf32, #tpu.memory_space<vmem>>) attributes {dimension_semantics = [], scalar_prefetch = 0 : i64, scratch_operands = 0 : i64, tpu.core_type = #tpu.core_type<tc>} {
    %c0 = arith.constant 0 : index
    %c0_0 = arith.constant 0 : index
    %0 = vector.load %arg0[%c0, %c0_0] : memref<16x6300xbf16, #tpu.memory_space<vmem>>, vector<16x6300xbf16>
    %c0_1 = arith.constant 0 : index
    %c0_2 = arith.constant 0 : index
    %1 = vector.load %arg2[%c0_1, %c0_2] : memref<6300x96xbf16, #tpu.memory_space<vmem>>, vector<6300x96xbf16>
    %cst = arith.constant dense<0.000000e+00> : vector<16x96xf32>
    %2 = tpu.matmul %0, %1, %cst {dimension_numbers = #tpu.dot_dimension_numbers<[1], [0], [0], [1], [0, 0, 1, 1], [], []>} : vector<16x6300xbf16>, vector<6300x96xbf16>, vector<16x96xf32> -> vector<16x96xf32>
    %c0_3 = arith.constant 0 : index
    %c0_4 = arith.constant 0 : index
    %3 = vector.load %arg1[%c0_3, %c0_4] : memref<16x156xbf16, #tpu.memory_space<vmem>>, vector<16x156xbf16>
    %c0_5 = arith.constant 0 : index
    %c0_6 = arith.constant 0 : index
    %4 = vector.load %arg4[%c0_5, %c0_6] : memref<156x96xbf16, #tpu.memory_space<vmem>>, vector<156x96xbf16>
    %cst_7 = arith.constant dense<0.000000e+00> : vector<16x96xf32>
    %5 = tpu.matmul %3, %4, %cst_7 {dimension_numbers = #tpu.dot_dimension_numbers<[1], [0], [0], [1], [0, 0, 1, 1], [], []>} : vector<16x156xbf16>, vector<156x96xbf16>, vector<16x96xf32> -> vector<16x96xf32>
    %6 = arith.addf %2, %5 : vector<16x96xf32>
    %c0_8 = arith.constant 0 : index
    %c0_9 = arith.constant 0 : index
    %7 = vector.load %arg3[%c0_8, %c0_9] : memref<1x96xf32, #tpu.memory_space<vmem>>, vector<1x96xf32>
    %8 = vector.broadcast %7 : vector<1x96xf32> to vector<16x96xf32>
    %9 = arith.addf %6, %8 : vector<16x96xf32>
    %10 = vector.shape_cast %9 : vector<16x96xf32> to vector<2x8x96xf32>
    %c0_10 = arith.constant 0 : index
    %c0_11 = arith.constant 0 : index
    %11 = vector.load %arg5[%c0_10, %c0_11] : memref<32x96xbf16, #tpu.memory_space<vmem>>, vector<32x96xbf16>
    %12 = arith.extf %11 : vector<32x96xbf16> to vector<32x96xf32>
    %c0_12 = arith.constant 0 : index
    %c0_13 = arith.constant 0 : index
    %13 = vector.load %arg6[%c0_12, %c0_13] : memref<1x96xf32, #tpu.memory_space<vmem>>, vector<1x96xf32>
    %cst_14 = arith.constant 0.000000e+00 : f32
    %14 = vector.broadcast %cst_14 : f32 to vector<2x32xf32>
    %15 = vector.extract_strided_slice %10 {offsets = [0, 0, 0], sizes = [2, 1, 96], strides = [1, 1, 1]} : vector<2x8x96xf32> to vector<2x1x96xf32>
    %16 = vector.shape_cast %15 : vector<2x1x96xf32> to vector<2x96xf32>
    %cst_15 = arith.constant dense<0.000000e+00> : vector<2x96xf32>
    %17 = tpu.matmul %14, %12, %cst_15 {dimension_numbers = #tpu.dot_dimension_numbers<[1], [0], [0], [1], [0, 0, 1, 1], [], []>} : vector<2x32xf32>, vector<32x96xf32>, vector<2x96xf32> -> vector<2x96xf32>
    %18 = vector.broadcast %13 : vector<1x96xf32> to vector<2x96xf32>
    %19 = arith.addf %17, %18 : vector<2x96xf32>
    %20 = vector.extract_strided_slice %16 {offsets = [0, 0], sizes = [2, 32], strides = [1, 1]} : vector<2x96xf32> to vector<2x32xf32>
    %21 = vector.extract_strided_slice %19 {offsets = [0, 0], sizes = [2, 32], strides = [1, 1]} : vector<2x96xf32> to vector<2x32xf32>
    %22 = arith.addf %20, %21 : vector<2x32xf32>
    %23 = arith.negf %22 : vector<2x32xf32>
    %24 = math.exp %23 : vector<2x32xf32>
    %cst_16 = arith.constant 1.000000e+00 : f32
    %25 = vector.broadcast %cst_16 : f32 to vector<2x32xf32>
    %26 = arith.addf %25, %24 : vector<2x32xf32>
    %27 = arith.divf %25, %26 : vector<2x32xf32>
    %28 = vector.extract_strided_slice %16 {offsets = [0, 32], sizes = [2, 32], strides = [1, 1]} : vector<2x96xf32> to vector<2x32xf32>
    %29 = vector.extract_strided_slice %19 {offsets = [0, 32], sizes = [2, 32], strides = [1, 1]} : vector<2x96xf32> to vector<2x32xf32>
    %30 = arith.addf %28, %29 : vector<2x32xf32>
    %31 = arith.negf %30 : vector<2x32xf32>
    %32 = math.exp %31 : vector<2x32xf32>
    %cst_17 = arith.constant 1.000000e+00 : f32
    %33 = vector.broadcast %cst_17 : f32 to vector<2x32xf32>
    %34 = arith.addf %33, %32 : vector<2x32xf32>
    %35 = arith.divf %33, %34 : vector<2x32xf32>
    %36 = vector.extract_strided_slice %16 {offsets = [0, 64], sizes = [2, 32], strides = [1, 1]} : vector<2x96xf32> to vector<2x32xf32>
    %37 = vector.extract_strided_slice %19 {offsets = [0, 64], sizes = [2, 32], strides = [1, 1]} : vector<2x96xf32> to vector<2x32xf32>
    %38 = arith.mulf %27, %37 : vector<2x32xf32>
    %39 = arith.addf %36, %38 : vector<2x32xf32>
    %40 = math.tanh %39 : vector<2x32xf32>
    %cst_18 = arith.constant 1.000000e+00 : f32
    %41 = vector.broadcast %cst_18 : f32 to vector<2x32xf32>
    %42 = arith.subf %41, %35 : vector<2x32xf32>
    %43 = arith.mulf %42, %40 : vector<2x32xf32>
    %44 = arith.mulf %35, %14 : vector<2x32xf32>
    %45 = arith.addf %43, %44 : vector<2x32xf32>
    %46 = vector.extract_strided_slice %10 {offsets = [0, 1, 0], sizes = [2, 1, 96], strides = [1, 1, 1]} : vector<2x8x96xf32> to vector<2x1x96xf32>
    %47 = vector.shape_cast %46 : vector<2x1x96xf32> to vector<2x96xf32>
    %cst_19 = arith.constant dense<0.000000e+00> : vector<2x96xf32>
    %48 = tpu.matmul %45, %12, %cst_19 {dimension_numbers = #tpu.dot_dimension_numbers<[1], [0], [0], [1], [0, 0, 1, 1], [], []>} : vector<2x32xf32>, vector<32x96xf32>, vector<2x96xf32> -> vector<2x96xf32>
    %49 = vector.broadcast %13 : vector<1x96xf32> to vector<2x96xf32>
    %50 = arith.addf %48, %49 : vector<2x96xf32>
    %51 = vector.extract_strided_slice %47 {offsets = [0, 0], sizes = [2, 32], strides = [1, 1]} : vector<2x96xf32> to vector<2x32xf32>
    %52 = vector.extract_strided_slice %50 {offsets = [0, 0], sizes = [2, 32], strides = [1, 1]} : vector<2x96xf32> to vector<2x32xf32>
    %53 = arith.addf %51, %52 : vector<2x32xf32>
    %54 = arith.negf %53 : vector<2x32xf32>
    %55 = math.exp %54 : vector<2x32xf32>
    %cst_20 = arith.constant 1.000000e+00 : f32
    %56 = vector.broadcast %cst_20 : f32 to vector<2x32xf32>
    %57 = arith.addf %56, %55 : vector<2x32xf32>
    %58 = arith.divf %56, %57 : vector<2x32xf32>
    %59 = vector.extract_strided_slice %47 {offsets = [0, 32], sizes = [2, 32], strides = [1, 1]} : vector<2x96xf32> to vector<2x32xf32>
    %60 = vector.extract_strided_slice %50 {offsets = [0, 32], sizes = [2, 32], strides = [1, 1]} : vector<2x96xf32> to vector<2x32xf32>
    %61 = arith.addf %59, %60 : vector<2x32xf32>
    %62 = arith.negf %61 : vector<2x32xf32>
    %63 = math.exp %62 : vector<2x32xf32>
    %cst_21 = arith.constant 1.000000e+00 : f32
    %64 = vector.broadcast %cst_21 : f32 to vector<2x32xf32>
    %65 = arith.addf %64, %63 : vector<2x32xf32>
    %66 = arith.divf %64, %65 : vector<2x32xf32>
    %67 = vector.extract_strided_slice %47 {offsets = [0, 64], sizes = [2, 32], strides = [1, 1]} : vector<2x96xf32> to vector<2x32xf32>
    %68 = vector.extract_strided_slice %50 {offsets = [0, 64], sizes = [2, 32], strides = [1, 1]} : vector<2x96xf32> to vector<2x32xf32>
    %69 = arith.mulf %58, %68 : vector<2x32xf32>
    %70 = arith.addf %67, %69 : vector<2x32xf32>
    %71 = math.tanh %70 : vector<2x32xf32>
    %cst_22 = arith.constant 1.000000e+00 : f32
    %72 = vector.broadcast %cst_22 : f32 to vector<2x32xf32>
    %73 = arith.subf %72, %66 : vector<2x32xf32>
    %74 = arith.mulf %73, %71 : vector<2x32xf32>
    %75 = arith.mulf %66, %45 : vector<2x32xf32>
    %76 = arith.addf %74, %75 : vector<2x32xf32>
    %77 = vector.extract_strided_slice %10 {offsets = [0, 2, 0], sizes = [2, 1, 96], strides = [1, 1, 1]} : vector<2x8x96xf32> to vector<2x1x96xf32>
    %78 = vector.shape_cast %77 : vector<2x1x96xf32> to vector<2x96xf32>
    %cst_23 = arith.constant dense<0.000000e+00> : vector<2x96xf32>
    %79 = tpu.matmul %76, %12, %cst_23 {dimension_numbers = #tpu.dot_dimension_numbers<[1], [0], [0], [1], [0, 0, 1, 1], [], []>} : vector<2x32xf32>, vector<32x96xf32>, vector<2x96xf32> -> vector<2x96xf32>
    %80 = vector.broadcast %13 : vector<1x96xf32> to vector<2x96xf32>
    %81 = arith.addf %79, %80 : vector<2x96xf32>
    %82 = vector.extract_strided_slice %78 {offsets = [0, 0], sizes = [2, 32], strides = [1, 1]} : vector<2x96xf32> to vector<2x32xf32>
    %83 = vector.extract_strided_slice %81 {offsets = [0, 0], sizes = [2, 32], strides = [1, 1]} : vector<2x96xf32> to vector<2x32xf32>
    %84 = arith.addf %82, %83 : vector<2x32xf32>
    %85 = arith.negf %84 : vector<2x32xf32>
    %86 = math.exp %85 : vector<2x32xf32>
    %cst_24 = arith.constant 1.000000e+00 : f32
    %87 = vector.broadcast %cst_24 : f32 to vector<2x32xf32>
    %88 = arith.addf %87, %86 : vector<2x32xf32>
    %89 = arith.divf %87, %88 : vector<2x32xf32>
    %90 = vector.extract_strided_slice %78 {offsets = [0, 32], sizes = [2, 32], strides = [1, 1]} : vector<2x96xf32> to vector<2x32xf32>
    %91 = vector.extract_strided_slice %81 {offsets = [0, 32], sizes = [2, 32], strides = [1, 1]} : vector<2x96xf32> to vector<2x32xf32>
    %92 = arith.addf %90, %91 : vector<2x32xf32>
    %93 = arith.negf %92 : vector<2x32xf32>
    %94 = math.exp %93 : vector<2x32xf32>
    %cst_25 = arith.constant 1.000000e+00 : f32
    %95 = vector.broadcast %cst_25 : f32 to vector<2x32xf32>
    %96 = arith.addf %95, %94 : vector<2x32xf32>
    %97 = arith.divf %95, %96 : vector<2x32xf32>
    %98 = vector.extract_strided_slice %78 {offsets = [0, 64], sizes = [2, 32], strides = [1, 1]} : vector<2x96xf32> to vector<2x32xf32>
    %99 = vector.extract_strided_slice %81 {offsets = [0, 64], sizes = [2, 32], strides = [1, 1]} : vector<2x96xf32> to vector<2x32xf32>
    %100 = arith.mulf %89, %99 : vector<2x32xf32>
    %101 = arith.addf %98, %100 : vector<2x32xf32>
    %102 = math.tanh %101 : vector<2x32xf32>
    %cst_26 = arith.constant 1.000000e+00 : f32
    %103 = vector.broadcast %cst_26 : f32 to vector<2x32xf32>
    %104 = arith.subf %103, %97 : vector<2x32xf32>
    %105 = arith.mulf %104, %102 : vector<2x32xf32>
    %106 = arith.mulf %97, %76 : vector<2x32xf32>
    %107 = arith.addf %105, %106 : vector<2x32xf32>
    %108 = vector.extract_strided_slice %10 {offsets = [0, 3, 0], sizes = [2, 1, 96], strides = [1, 1, 1]} : vector<2x8x96xf32> to vector<2x1x96xf32>
    %109 = vector.shape_cast %108 : vector<2x1x96xf32> to vector<2x96xf32>
    %cst_27 = arith.constant dense<0.000000e+00> : vector<2x96xf32>
    %110 = tpu.matmul %107, %12, %cst_27 {dimension_numbers = #tpu.dot_dimension_numbers<[1], [0], [0], [1], [0, 0, 1, 1], [], []>} : vector<2x32xf32>, vector<32x96xf32>, vector<2x96xf32> -> vector<2x96xf32>
    %111 = vector.broadcast %13 : vector<1x96xf32> to vector<2x96xf32>
    %112 = arith.addf %110, %111 : vector<2x96xf32>
    %113 = vector.extract_strided_slice %109 {offsets = [0, 0], sizes = [2, 32], strides = [1, 1]} : vector<2x96xf32> to vector<2x32xf32>
    %114 = vector.extract_strided_slice %112 {offsets = [0, 0], sizes = [2, 32], strides = [1, 1]} : vector<2x96xf32> to vector<2x32xf32>
    %115 = arith.addf %113, %114 : vector<2x32xf32>
    %116 = arith.negf %115 : vector<2x32xf32>
    %117 = math.exp %116 : vector<2x32xf32>
    %cst_28 = arith.constant 1.000000e+00 : f32
    %118 = vector.broadcast %cst_28 : f32 to vector<2x32xf32>
    %119 = arith.addf %118, %117 : vector<2x32xf32>
    %120 = arith.divf %118, %119 : vector<2x32xf32>
    %121 = vector.extract_strided_slice %109 {offsets = [0, 32], sizes = [2, 32], strides = [1, 1]} : vector<2x96xf32> to vector<2x32xf32>
    %122 = vector.extract_strided_slice %112 {offsets = [0, 32], sizes = [2, 32], strides = [1, 1]} : vector<2x96xf32> to vector<2x32xf32>
    %123 = arith.addf %121, %122 : vector<2x32xf32>
    %124 = arith.negf %123 : vector<2x32xf32>
    %125 = math.exp %124 : vector<2x32xf32>
    %cst_29 = arith.constant 1.000000e+00 : f32
    %126 = vector.broadcast %cst_29 : f32 to vector<2x32xf32>
    %127 = arith.addf %126, %125 : vector<2x32xf32>
    %128 = arith.divf %126, %127 : vector<2x32xf32>
    %129 = vector.extract_strided_slice %109 {offsets = [0, 64], sizes = [2, 32], strides = [1, 1]} : vector<2x96xf32> to vector<2x32xf32>
    %130 = vector.extract_strided_slice %112 {offsets = [0, 64], sizes = [2, 32], strides = [1, 1]} : vector<2x96xf32> to vector<2x32xf32>
    %131 = arith.mulf %120, %130 : vector<2x32xf32>
    %132 = arith.addf %129, %131 : vector<2x32xf32>
    %133 = math.tanh %132 : vector<2x32xf32>
    %cst_30 = arith.constant 1.000000e+00 : f32
    %134 = vector.broadcast %cst_30 : f32 to vector<2x32xf32>
    %135 = arith.subf %134, %128 : vector<2x32xf32>
    %136 = arith.mulf %135, %133 : vector<2x32xf32>
    %137 = arith.mulf %128, %107 : vector<2x32xf32>
    %138 = arith.addf %136, %137 : vector<2x32xf32>
    %139 = vector.extract_strided_slice %10 {offsets = [0, 4, 0], sizes = [2, 1, 96], strides = [1, 1, 1]} : vector<2x8x96xf32> to vector<2x1x96xf32>
    %140 = vector.shape_cast %139 : vector<2x1x96xf32> to vector<2x96xf32>
    %cst_31 = arith.constant dense<0.000000e+00> : vector<2x96xf32>
    %141 = tpu.matmul %138, %12, %cst_31 {dimension_numbers = #tpu.dot_dimension_numbers<[1], [0], [0], [1], [0, 0, 1, 1], [], []>} : vector<2x32xf32>, vector<32x96xf32>, vector<2x96xf32> -> vector<2x96xf32>
    %142 = vector.broadcast %13 : vector<1x96xf32> to vector<2x96xf32>
    %143 = arith.addf %141, %142 : vector<2x96xf32>
    %144 = vector.extract_strided_slice %140 {offsets = [0, 0], sizes = [2, 32], strides = [1, 1]} : vector<2x96xf32> to vector<2x32xf32>
    %145 = vector.extract_strided_slice %143 {offsets = [0, 0], sizes = [2, 32], strides = [1, 1]} : vector<2x96xf32> to vector<2x32xf32>
    %146 = arith.addf %144, %145 : vector<2x32xf32>
    %147 = arith.negf %146 : vector<2x32xf32>
    %148 = math.exp %147 : vector<2x32xf32>
    %cst_32 = arith.constant 1.000000e+00 : f32
    %149 = vector.broadcast %cst_32 : f32 to vector<2x32xf32>
    %150 = arith.addf %149, %148 : vector<2x32xf32>
    %151 = arith.divf %149, %150 : vector<2x32xf32>
    %152 = vector.extract_strided_slice %140 {offsets = [0, 32], sizes = [2, 32], strides = [1, 1]} : vector<2x96xf32> to vector<2x32xf32>
    %153 = vector.extract_strided_slice %143 {offsets = [0, 32], sizes = [2, 32], strides = [1, 1]} : vector<2x96xf32> to vector<2x32xf32>
    %154 = arith.addf %152, %153 : vector<2x32xf32>
    %155 = arith.negf %154 : vector<2x32xf32>
    %156 = math.exp %155 : vector<2x32xf32>
    %cst_33 = arith.constant 1.000000e+00 : f32
    %157 = vector.broadcast %cst_33 : f32 to vector<2x32xf32>
    %158 = arith.addf %157, %156 : vector<2x32xf32>
    %159 = arith.divf %157, %158 : vector<2x32xf32>
    %160 = vector.extract_strided_slice %140 {offsets = [0, 64], sizes = [2, 32], strides = [1, 1]} : vector<2x96xf32> to vector<2x32xf32>
    %161 = vector.extract_strided_slice %143 {offsets = [0, 64], sizes = [2, 32], strides = [1, 1]} : vector<2x96xf32> to vector<2x32xf32>
    %162 = arith.mulf %151, %161 : vector<2x32xf32>
    %163 = arith.addf %160, %162 : vector<2x32xf32>
    %164 = math.tanh %163 : vector<2x32xf32>
    %cst_34 = arith.constant 1.000000e+00 : f32
    %165 = vector.broadcast %cst_34 : f32 to vector<2x32xf32>
    %166 = arith.subf %165, %159 : vector<2x32xf32>
    %167 = arith.mulf %166, %164 : vector<2x32xf32>
    %168 = arith.mulf %159, %138 : vector<2x32xf32>
    %169 = arith.addf %167, %168 : vector<2x32xf32>
    %170 = vector.extract_strided_slice %10 {offsets = [0, 5, 0], sizes = [2, 1, 96], strides = [1, 1, 1]} : vector<2x8x96xf32> to vector<2x1x96xf32>
    %171 = vector.shape_cast %170 : vector<2x1x96xf32> to vector<2x96xf32>
    %cst_35 = arith.constant dense<0.000000e+00> : vector<2x96xf32>
    %172 = tpu.matmul %169, %12, %cst_35 {dimension_numbers = #tpu.dot_dimension_numbers<[1], [0], [0], [1], [0, 0, 1, 1], [], []>} : vector<2x32xf32>, vector<32x96xf32>, vector<2x96xf32> -> vector<2x96xf32>
    %173 = vector.broadcast %13 : vector<1x96xf32> to vector<2x96xf32>
    %174 = arith.addf %172, %173 : vector<2x96xf32>
    %175 = vector.extract_strided_slice %171 {offsets = [0, 0], sizes = [2, 32], strides = [1, 1]} : vector<2x96xf32> to vector<2x32xf32>
    %176 = vector.extract_strided_slice %174 {offsets = [0, 0], sizes = [2, 32], strides = [1, 1]} : vector<2x96xf32> to vector<2x32xf32>
    %177 = arith.addf %175, %176 : vector<2x32xf32>
    %178 = arith.negf %177 : vector<2x32xf32>
    %179 = math.exp %178 : vector<2x32xf32>
    %cst_36 = arith.constant 1.000000e+00 : f32
    %180 = vector.broadcast %cst_36 : f32 to vector<2x32xf32>
    %181 = arith.addf %180, %179 : vector<2x32xf32>
    %182 = arith.divf %180, %181 : vector<2x32xf32>
    %183 = vector.extract_strided_slice %171 {offsets = [0, 32], sizes = [2, 32], strides = [1, 1]} : vector<2x96xf32> to vector<2x32xf32>
    %184 = vector.extract_strided_slice %174 {offsets = [0, 32], sizes = [2, 32], strides = [1, 1]} : vector<2x96xf32> to vector<2x32xf32>
    %185 = arith.addf %183, %184 : vector<2x32xf32>
    %186 = arith.negf %185 : vector<2x32xf32>
    %187 = math.exp %186 : vector<2x32xf32>
    %cst_37 = arith.constant 1.000000e+00 : f32
    %188 = vector.broadcast %cst_37 : f32 to vector<2x32xf32>
    %189 = arith.addf %188, %187 : vector<2x32xf32>
    %190 = arith.divf %188, %189 : vector<2x32xf32>
    %191 = vector.extract_strided_slice %171 {offsets = [0, 64], sizes = [2, 32], strides = [1, 1]} : vector<2x96xf32> to vector<2x32xf32>
    %192 = vector.extract_strided_slice %174 {offsets = [0, 64], sizes = [2, 32], strides = [1, 1]} : vector<2x96xf32> to vector<2x32xf32>
    %193 = arith.mulf %182, %192 : vector<2x32xf32>
    %194 = arith.addf %191, %193 : vector<2x32xf32>
    %195 = math.tanh %194 : vector<2x32xf32>
    %cst_38 = arith.constant 1.000000e+00 : f32
    %196 = vector.broadcast %cst_38 : f32 to vector<2x32xf32>
    %197 = arith.subf %196, %190 : vector<2x32xf32>
    %198 = arith.mulf %197, %195 : vector<2x32xf32>
    %199 = arith.mulf %190, %169 : vector<2x32xf32>
    %200 = arith.addf %198, %199 : vector<2x32xf32>
    %201 = vector.extract_strided_slice %10 {offsets = [0, 6, 0], sizes = [2, 1, 96], strides = [1, 1, 1]} : vector<2x8x96xf32> to vector<2x1x96xf32>
    %202 = vector.shape_cast %201 : vector<2x1x96xf32> to vector<2x96xf32>
    %cst_39 = arith.constant dense<0.000000e+00> : vector<2x96xf32>
    %203 = tpu.matmul %200, %12, %cst_39 {dimension_numbers = #tpu.dot_dimension_numbers<[1], [0], [0], [1], [0, 0, 1, 1], [], []>} : vector<2x32xf32>, vector<32x96xf32>, vector<2x96xf32> -> vector<2x96xf32>
    %204 = vector.broadcast %13 : vector<1x96xf32> to vector<2x96xf32>
    %205 = arith.addf %203, %204 : vector<2x96xf32>
    %206 = vector.extract_strided_slice %202 {offsets = [0, 0], sizes = [2, 32], strides = [1, 1]} : vector<2x96xf32> to vector<2x32xf32>
    %207 = vector.extract_strided_slice %205 {offsets = [0, 0], sizes = [2, 32], strides = [1, 1]} : vector<2x96xf32> to vector<2x32xf32>
    %208 = arith.addf %206, %207 : vector<2x32xf32>
    %209 = arith.negf %208 : vector<2x32xf32>
    %210 = math.exp %209 : vector<2x32xf32>
    %cst_40 = arith.constant 1.000000e+00 : f32
    %211 = vector.broadcast %cst_40 : f32 to vector<2x32xf32>
    %212 = arith.addf %211, %210 : vector<2x32xf32>
    %213 = arith.divf %211, %212 : vector<2x32xf32>
    %214 = vector.extract_strided_slice %202 {offsets = [0, 32], sizes = [2, 32], strides = [1, 1]} : vector<2x96xf32> to vector<2x32xf32>
    %215 = vector.extract_strided_slice %205 {offsets = [0, 32], sizes = [2, 32], strides = [1, 1]} : vector<2x96xf32> to vector<2x32xf32>
    %216 = arith.addf %214, %215 : vector<2x32xf32>
    %217 = arith.negf %216 : vector<2x32xf32>
    %218 = math.exp %217 : vector<2x32xf32>
    %cst_41 = arith.constant 1.000000e+00 : f32
    %219 = vector.broadcast %cst_41 : f32 to vector<2x32xf32>
    %220 = arith.addf %219, %218 : vector<2x32xf32>
    %221 = arith.divf %219, %220 : vector<2x32xf32>
    %222 = vector.extract_strided_slice %202 {offsets = [0, 64], sizes = [2, 32], strides = [1, 1]} : vector<2x96xf32> to vector<2x32xf32>
    %223 = vector.extract_strided_slice %205 {offsets = [0, 64], sizes = [2, 32], strides = [1, 1]} : vector<2x96xf32> to vector<2x32xf32>
    %224 = arith.mulf %213, %223 : vector<2x32xf32>
    %225 = arith.addf %222, %224 : vector<2x32xf32>
    %226 = math.tanh %225 : vector<2x32xf32>
    %cst_42 = arith.constant 1.000000e+00 : f32
    %227 = vector.broadcast %cst_42 : f32 to vector<2x32xf32>
    %228 = arith.subf %227, %221 : vector<2x32xf32>
    %229 = arith.mulf %228, %226 : vector<2x32xf32>
    %230 = arith.mulf %221, %200 : vector<2x32xf32>
    %231 = arith.addf %229, %230 : vector<2x32xf32>
    %232 = vector.extract_strided_slice %10 {offsets = [0, 7, 0], sizes = [2, 1, 96], strides = [1, 1, 1]} : vector<2x8x96xf32> to vector<2x1x96xf32>
    %233 = vector.shape_cast %232 : vector<2x1x96xf32> to vector<2x96xf32>
    %cst_43 = arith.constant dense<0.000000e+00> : vector<2x96xf32>
    %234 = tpu.matmul %231, %12, %cst_43 {dimension_numbers = #tpu.dot_dimension_numbers<[1], [0], [0], [1], [0, 0, 1, 1], [], []>} : vector<2x32xf32>, vector<32x96xf32>, vector<2x96xf32> -> vector<2x96xf32>
    %235 = vector.broadcast %13 : vector<1x96xf32> to vector<2x96xf32>
    %236 = arith.addf %234, %235 : vector<2x96xf32>
    %237 = vector.extract_strided_slice %233 {offsets = [0, 0], sizes = [2, 32], strides = [1, 1]} : vector<2x96xf32> to vector<2x32xf32>
    %238 = vector.extract_strided_slice %236 {offsets = [0, 0], sizes = [2, 32], strides = [1, 1]} : vector<2x96xf32> to vector<2x32xf32>
    %239 = arith.addf %237, %238 : vector<2x32xf32>
    %240 = arith.negf %239 : vector<2x32xf32>
    %241 = math.exp %240 : vector<2x32xf32>
    %cst_44 = arith.constant 1.000000e+00 : f32
    %242 = vector.broadcast %cst_44 : f32 to vector<2x32xf32>
    %243 = arith.addf %242, %241 : vector<2x32xf32>
    %244 = arith.divf %242, %243 : vector<2x32xf32>
    %245 = vector.extract_strided_slice %233 {offsets = [0, 32], sizes = [2, 32], strides = [1, 1]} : vector<2x96xf32> to vector<2x32xf32>
    %246 = vector.extract_strided_slice %236 {offsets = [0, 32], sizes = [2, 32], strides = [1, 1]} : vector<2x96xf32> to vector<2x32xf32>
    %247 = arith.addf %245, %246 : vector<2x32xf32>
    %248 = arith.negf %247 : vector<2x32xf32>
    %249 = math.exp %248 : vector<2x32xf32>
    %cst_45 = arith.constant 1.000000e+00 : f32
    %250 = vector.broadcast %cst_45 : f32 to vector<2x32xf32>
    %251 = arith.addf %250, %249 : vector<2x32xf32>
    %252 = arith.divf %250, %251 : vector<2x32xf32>
    %253 = vector.extract_strided_slice %233 {offsets = [0, 64], sizes = [2, 32], strides = [1, 1]} : vector<2x96xf32> to vector<2x32xf32>
    %254 = vector.extract_strided_slice %236 {offsets = [0, 64], sizes = [2, 32], strides = [1, 1]} : vector<2x96xf32> to vector<2x32xf32>
    %255 = arith.mulf %244, %254 : vector<2x32xf32>
    %256 = arith.addf %253, %255 : vector<2x32xf32>
    %257 = math.tanh %256 : vector<2x32xf32>
    %cst_46 = arith.constant 1.000000e+00 : f32
    %258 = vector.broadcast %cst_46 : f32 to vector<2x32xf32>
    %259 = arith.subf %258, %252 : vector<2x32xf32>
    %260 = arith.mulf %259, %257 : vector<2x32xf32>
    %261 = arith.mulf %252, %231 : vector<2x32xf32>
    %262 = arith.addf %260, %261 : vector<2x32xf32>
    %c0_47 = arith.constant 0 : index
    %c0_48 = arith.constant 0 : index
    %263 = vector.load %arg7[%c0_47, %c0_48] : memref<32x8xbf16, #tpu.memory_space<vmem>>, vector<32x8xbf16>
    %264 = arith.extf %263 : vector<32x8xbf16> to vector<32x8xf32>
    %cst_49 = arith.constant dense<0.000000e+00> : vector<2x8xf32>
    %265 = tpu.matmul %262, %264, %cst_49 {dimension_numbers = #tpu.dot_dimension_numbers<[1], [0], [0], [1], [0, 0, 1, 1], [], []>} : vector<2x32xf32>, vector<32x8xf32>, vector<2x8xf32> -> vector<2x8xf32>
    %c0_50 = arith.constant 0 : index
    %c0_51 = arith.constant 0 : index
    %266 = vector.load %arg8[%c0_50, %c0_51] : memref<1x8xf32, #tpu.memory_space<vmem>>, vector<1x8xf32>
    %267 = vector.broadcast %266 : vector<1x8xf32> to vector<2x8xf32>
    %268 = arith.addf %265, %267 : vector<2x8xf32>
    %c0_52 = arith.constant 0 : index
    %c0_53 = arith.constant 0 : index
    %269 = vector.load %arg9[%c0_52, %c0_53] : memref<2x8xf32, #tpu.memory_space<vmem>>, vector<2x8xf32>
    tpu.vector_store %arg9[%c0_52, %c0_53], %268 {strides = array<i32>} : memref<2x8xf32, #tpu.memory_space<vmem>>, vector<2x8xf32>,
    return
  }
}

</mosaic_0001>

<bundles_post_ra>
// kernel: multi_mlp_gru_forward.1
= control target key start
LH: loop header
LB: loop body
LE: loop exit
PB: predicated region body
PF: predicated region fallthrough
CT: control target
= control target key end

     0   :  { %v7717_v1 = vmov 0   ;;  %vm962_vm0 = vcmask 228352   ;;  %vm966_vm1 = vcmask 1045504   ;;  %s9401_s0 = inlined_call_operand.vmem [shape: bf16[16,6300], index: 0, kind: input, shape index: {}]   ;;  %s9402_s1 = inlined_call_operand.vmem [shape: bf16[16,156], index: 1, kind: input, shape index: {}]   ;;  %s9403_s2 = inlined_call_operand.vmem [shape: bf16[6300,96], index: 2, kind: input, shape index: {}]   ;;  %s9404_s3 = inlined_call_operand.vmem [shape: f32[1,96], index: 3, kind: input, shape index: {}]   ;;  %s9405_s4 = inlined_call_operand.vmem [shape: bf16[156,96], index: 4, kind: input, shape index: {}]   ;;  %s9406_s5 = inlined_call_operand.vmem [shape: bf16[32,96], index: 5, kind: input, shape index: {}]   ;;  %s9407_s6 = inlined_call_operand.vmem [shape: f32[1,96], index: 6, kind: input, shape index: {}]   ;;  %s9408_s7 = inlined_call_operand.vmem [shape: bf16[32,8], index: 7, kind: input, shape index: {}]   ;;  %s9409_s8 = inlined_call_operand.vmem [shape: f32[1,8], index: 8, kind: input, shape index: {}]   ;;  %s9410_s9 = inlined_call_operand.hbm [shape: f32[2,8], index: 9, kind: output, shape index: {}]  }
   0x1   :  { %v7115_v0 = vld [vmem:[%s9405_s4] sm:$0xff]   ;;  %970 = vmatprep.subr.bf16.mxu0 %v7717_v1  ;;  %v7118_v4 = vld [vmem:[%s9405_s4 + $0x8] sm:$0xff]   ;;  %v7121_v7 = vld [vmem:[%s9405_s4 + $0x10] sm:$0xff]  }
   0x2   :  { %v7116_v2 = vld [vmem:[%s9403_s2 + $0x40] sm:$0xff]   ;;  %971 = vmatpush1.bf16.msra.mxu0 %v7115_v0  ;;  %v7119_v5 = vld [vmem:[%s9403_s2 + $0x48] sm:$0xff]   ;;  %v7122_v8 = vld [vmem:[%s9403_s2 + $0x50] sm:$0xff]  }
   0x3   :  { %v7117_v3 = vld [vmem:[%s9403_s2] sm:$0xff]   ;;  %6382 = vmatprep.subr.bf16.mxu1 %v7116_v2  ;;  %972 = vmatprep.subr.bf16.mxu0 %v7717_v1  ;;  %v7120_v6 = vld [vmem:[%s9403_s2 + $0x8] sm:$0xff]   ;;  %v7123_v9 = vld [vmem:[%s9403_s2 + $0x10] sm:$0xff]  }
   0x4   :  { %6383 = vmatpush3.bf16.msra.mxu1 %v7117_v3  ;;  %v7124_v10 = vld [vmem:[%s9405_s4 + $0x18] sm:$0xff]   ;;  %v7128_v13 = vld [vmem:[%s9403_s2 + $0x60] sm:$0xff]   ;;  %v7131_v16 = vld [vmem:[%s9403_s2 + $0x68] sm:$0xff]  }
   0x5   :  { %6384 = vmatprep.subr.bf16.mxu1 %v7119_v5  ;;  %v7125_v11 = vld [vmem:[%s9403_s2 + $0x58] sm:$0xff]   ;;  %v7127_v14 = vld [vmem:[%s9405_s4 + $0x20] sm:$0xff]   ;;  %v7130_v17 = vld [vmem:[%s9405_s4 + $0x28] sm:$0xff]  }
   0x6   :  { %973 = vmatpush1.bf16.msra.mxu0 %v7118_v4  ;;  %v7126_v12 = vld [vmem:[%s9403_s2 + $0x18] sm:$0xff]   ;;  %v7129_v15 = vld [vmem:[%s9403_s2 + $0x20] sm:$0xff]   ;;  %v7132_v18 = vld [vmem:[%s9403_s2 + $0x28] sm:$0xff]  }
   0x7   :  { %974 = vmatprep.subr.bf16.mxu0 %v7717_v1  ;;  %v7134_v19 = vld [vmem:[%s9403_s2 + $0x70] sm:$0xff]   ;;  %v7137_v22 = vld [vmem:[%s9403_s2 + $0x78] sm:$0xff]   ;;  %v7141_v23 = vld [vmem:[%s9401_s0 + $0x4] ss:$200 sps:$4 sm:$0xff]  }
   0x8   :  { %6385 = vmatpush3.bf16.msra.mxu1 %v7120_v6  ;;  %v7133_v20 = vld [vmem:[%s9405_s4 + $0x30] sm:$0xff]   ;;  %v7136_v24 = vld [vmem:[%s9405_s4 + $0x38] sm:$0xff]   ;;  %3661 = vmatprep.mubr.bf16.mxu1 %v7141_v23  ;;  %v7139_v26 = vld [vmem:[%s9401_s0] ss:$200 sps:$4 sm:$0xff]  }
   0x9   :  { %6386 = vmatprep.subr.bf16.mxu1 %v7122_v8  ;;  %v7135_v21 = vld [vmem:[%s9403_s2 + $0x30] sm:$0xff]   ;;  %v7138_v25 = vld [vmem:[%s9403_s2 + $0x38] sm:$0xff]   ;;  %v7143_v27 = vld [vmem:[%s9403_s2 + $0xc0] sm:$0xff]  }
   0xa   :  { %975 = vmatpush1.bf16.msra.mxu0 %v7121_v7  ;;  %v7142_v28 = vld [vmem:[%s9405_s4 + $0x40] sm:$0xff]   ;;  %v7145_v29 = vld [vmem:[%s9405_s4 + $0x48] sm:$0x3f]   ;;  %v7152_v37 = vld [vmem:[%s9403_s2 + $0xd0] sm:$0xff]  }
   0xb   :  { %976 = vmatprep.subr.bf16.mxu0 %v7717_v1  ;;  %v7144_v30 = vld [vmem:[%s9403_s2 + $0x80] sm:$0xff]   ;;  %v7146_v32 = vld [vmem:[%s9403_s2 + $0xc8] sm:$0xff]   ;;  %v968_v34 = vsel %vm966_vm1, %v7145_v29, 0  ;;  %v7154_v39 = vld [vmem:[%s9403_s2 + $0x90] sm:$0xff]  }
   0xc   :  { %6387 = vmatpush3.bf16.msra.mxu1 %v7123_v9  ;;  %v7150_v31 = vld [vmem:[%s9402_s1 + $0x4] ss:$8 sps:$4 sm:$0xff]   ;;  %v7148_v35 = vld [vmem:[%s9402_s1] ss:$8 sps:$4 sm:$0xff]   ;;  %v7156_v41 = vld [vmem:[%s9403_s2 + $0xd8] sm:$0xff]  }
   0xd   :  { %6388 = vmatprep.subr.bf16.mxu1 %v7125_v11  ;;  %v7147_v33 = vld [vmem:[%s9403_s2 + $0x88] sm:$0xff]   ;;  %5891 = vmatprep.mubr.msk.bf16.mxu0 %vm962_vm0, %v7150_v31  ;;  %v7151_v36 = vld [vmem:[%s9403_s2 + $0x140] sm:$0xff]   ;;  %v7158_v43 = vld [vmem:[%s9403_s2 + $0x98] sm:$0xff]  }
   0xe   :  { %977 = vmatpush1.bf16.msra.mxu0 %v7124_v10  ;;  %v7153_v38 = vld [vmem:[%s9403_s2 + $0x100] sm:$0xff]   ;;  %v7155_v40 = vld [vmem:[%s9403_s2 + $0x148] sm:$0xff]   ;;  %v7159_v44 = vld [vmem:[%s9403_s2 + $0x150] sm:$0xff]  }
   0xf   :  { %978 = vmatprep.subr.bf16.mxu0 %v7717_v1  ;;  %v7157_v42 = vld [vmem:[%s9403_s2 + $0x108] sm:$0xff]   ;;  %v7160_v45 = vld [vmem:[%s9403_s2 + $0xe0] sm:$0xff]   ;;  %v7161_v46 = vld [vmem:[%s9403_s2 + $0x110] sm:$0xff]  }
  0x10   :  { %6389 = vmatpush3.bf16.msra.mxu1 %v7126_v12  ;;  %v7162_v47 = vld [vmem:[%s9403_s2 + $0xa0] sm:$0xff]   ;;  %v7163_v48 = vld [vmem:[%s9403_s2 + $0x158] sm:$0xff]   ;;  %v7164_v49 = vld [vmem:[%s9403_s2 + $0xe8] sm:$0xff]  }
  0x11   :  { %6390 = vmatprep.subr.bf16.mxu1 %v7128_v13  ;;  %v7165_v50 = vld [vmem:[%s9403_s2 + $0x118] sm:$0xff]   ;;  %v7166_v51 = vld [vmem:[%s9403_s2 + $0xa8] sm:$0xff]   ;;  %v7167_v52 = vld [vmem:[%s9403_s2 + $0x160] sm:$0xff]  }
  0x12   :  { %979 = vmatpush1.bf16.msra.mxu0 %v7127_v14  ;;  %v7168_v53 = vld [vmem:[%s9403_s2 + $0xf0] sm:$0xff]   ;;  %v7169_v54 = vld [vmem:[%s9403_s2 + $0x120] sm:$0xff]   ;;  %v7171_v56 = vld [vmem:[%s9403_s2 + $0x168] sm:$0xff]  }
  0x13   :  { %980 = vmatprep.subr.bf16.mxu0 %v7717_v1  ;;  %v7170_v55 = vld [vmem:[%s9403_s2 + $0xb0] sm:$0xff]   ;;  %v7172_v57 = vld [vmem:[%s9403_s2 + $0xf8] sm:$0xff]   ;;  %v7173_v58 = vld [vmem:[%s9403_s2 + $0x128] sm:$0xff]  }
  0x14   :  { %6391 = vmatpush3.bf16.msra.mxu1 %v7129_v15  ;;  %v7177_v59 = vld [vmem:[%s9401_s0 + $0xc] ss:$200 sps:$4 sm:$0xff]   ;;  %v7174_v60 = vld [vmem:[%s9403_s2 + $0xb8] sm:$0xff]   ;;  %v7175_v63 = vld [vmem:[%s9401_s0 + $0x8] ss:$200 sps:$4 sm:$0xff]  }
  0x15   :  { %6392 = vmatprep.subr.bf16.mxu1 %v7131_v16  ;;  %v7178_v61 = vld [vmem:[%s9403_s2 + $0x170] sm:$0xff]   ;;  %v7180_v0 = vld [vmem:[%s9403_s2 + $0x1c0] sm:$0xff]   ;;  %v7182_v3 = vld [vmem:[%s9403_s2 + $0x178] sm:$0xff]  }
  0x16   :  { %981 = vmatpush1.bf16.msra.mxu0 %v7130_v17  ;;  %v7179_v62 = vld [vmem:[%s9403_s2 + $0x130] sm:$0xff]   ;;  %v7181_v2 = vld [vmem:[%s9403_s2 + $0x180] sm:$0xff]   ;;  %v7183_v4 = vld [vmem:[%s9403_s2 + $0x138] sm:$0xff]  }
  0x17   :  { %982 = vmatprep.subr.bf16.mxu0 %v7717_v1  ;;  %v7184_v5 = vld [vmem:[%s9403_s2 + $0x1c8] sm:$0xff]   ;;  %v7186_v7 = vld [vmem:[%s9401_s0 + $0x10] ss:$200 sps:$4 sm:$0xff]   ;;  %v7188_v8 = vld [vmem:[%s9401_s0 + $0x14] ss:$200 sps:$4 sm:$0xff]  }
  0x18   :  { %6393 = vmatpush3.bf16.msra.mxu1 %v7132_v18  ;;  %v7185_v6 = vld [vmem:[%s9403_s2 + $0x188] sm:$0xff]   ;;  %v7189_v9 = vld [vmem:[%s9403_s2 + $0x240] sm:$0xff]   ;;  %v7190_v10 = vld [vmem:[%s9403_s2 + $0x1d0] sm:$0xff]  }
  0x19   :  { %6394 = vmatprep.subr.bf16.mxu1 %v7134_v19  ;;  %v7191_v11 = vld [vmem:[%s9403_s2 + $0x200] sm:$0xff]   ;;  %v7192_v12 = vld [vmem:[%s9403_s2 + $0x190] sm:$0xff]   ;;  %v7193_v13 = vld [vmem:[%s9403_s2 + $0x248] sm:$0xff]  }
  0x1a   :  { %983 = vmatpush1.bf16.msra.mxu0 %v7133_v20  ;;  %v7194_v14 = vld [vmem:[%s9403_s2 + $0x1d8] sm:$0xff]   ;;  %v7195_v15 = vld [vmem:[%s9403_s2 + $0x208] sm:$0xff]   ;;  %v7197_v17 = vld [vmem:[%s9403_s2 + $0x250] sm:$0xff]  }
  0x1b   :  { %984 = vmatprep.subr.bf16.mxu0 %v7717_v1  ;;  %v7196_v16 = vld [vmem:[%s9403_s2 + $0x198] sm:$0xff]   ;;  %v7198_v18 = vld [vmem:[%s9403_s2 + $0x1e0] sm:$0xff]   ;;  %v7199_v19 = vld [vmem:[%s9403_s2 + $0x210] sm:$0xff]  }
  0x1c   :  { %6395 = vmatpush3.bf16.msra.mxu1 %v7135_v21  ;;  %v7200_v20 = vld [vmem:[%s9403_s2 + $0x1a0] sm:$0xff]   ;;  %v7201_v21 = vld [vmem:[%s9403_s2 + $0x258] sm:$0xff]   ;;  %v7209_v29 = vld [vmem:[%s9403_s2 + $0x268] sm:$0xff]  }
  0x1d   :  { %6396 = vmatprep.subr.bf16.mxu1 %v7137_v22  ;;  %v7202_v22 = vld [vmem:[%s9403_s2 + $0x1e8] sm:$0xff]   ;;  %v7203_v23 = vld [vmem:[%s9403_s2 + $0x218] sm:$0xff]  }
  0x1e   :  { %985 = vmatpush1.bf16.msra.mxu0 %v7136_v24  ;;  %v7204_v24 = vld [vmem:[%s9403_s2 + $0x1a8] sm:$0xff]  }
  0x1f   :  { %986 = vmatprep.subr.bf16.mxu0 %v7717_v1  ;;  %v7211_v31 = vld [vmem:[%s9403_s2 + $0x228] sm:$0xff]  }
  0x20   :  { %6397 = vmatpush3.bf16.msra.mxu1 %v7138_v25  ;;  %v7205_v25 = vld [vmem:[%s9403_s2 + $0x260] sm:$0xff]  }
  0x21   :  { %6404 = vmatprep.subr.bf16.mxu1 %v7143_v27  ;;  %v7207_v27 = vld [vmem:[%s9403_s2 + $0x220] sm:$0xff]  }
  0x22   :  { %987 = vmatpush1.bf16.msra.mxu0 %v7142_v28  ;;  %v7208_v28 = vld [vmem:[%s9403_s2 + $0x1b0] sm:$0xff]  }
  0x23   :  { %3662 = vmatmul.mubr.bf16.vlgmr.msra.gmra.mrb[0].mxu1 %v7139_v26  ;;  %988 = vmatprep.subr.bf16.mxu0 %v7717_v1  ;;  %v7206_v26 = vld [vmem:[%s9403_s2 + $0x1f0] sm:$0xff]  }
  0x24   :  { %6405 = vmatpush3.bf16.msra.mxu1 %v7144_v30  ;;  %3702 = vmatprep.mubr.bf16.mxu1 %v7177_v59  ;;  %v7210_v30 = vld [vmem:[%s9403_s2 + $0x1f8] sm:$0xff]  }
  0x25   :  { %6406 = vmatprep.subr.bf16.mxu1 %v7146_v32  ;;  %v7212_v32 = vld [vmem:[%s9403_s2 + $0x1b8] sm:$0xff]  }
  0x26   :  { %989 = vmatpush1.bf16.msra.mxu0 %v968_v34  ;;  %v7213_v34 = vld [vmem:[%s9401_s0 + $0x18] ss:$200 sps:$4 sm:$0xff]  }
  0x27   :  { %6426 = vmatprep.subr.bf16.mxu0 %v7151_v36  ;;  %v7217_v36 = vld [vmem:[%s9403_s2 + $0x230] sm:$0xff]   ;;  %v7241_v59 = vld [vmem:[%s9403_s2 + $0x318] sm:$0xff]  }
  0x28   :  { %6407 = vmatpush3.bf16.msra.mxu1 %v7147_v33  ;;  %v7215_v33 = vld [vmem:[%s9401_s0 + $0x1c] ss:$200 sps:$4 sm:$0xff]  }
  0x29   :  { %1003 = vmatmul.mubr.bf16.vlgmr.msra.gmra.mrb[0].mxu0 %v7148_v35  ;;  %6408 = vmatprep.subr.bf16.mxu1 %v7152_v37  ;;  %v7216_v35 = vld [vmem:[%s9403_s2 + $0x270] sm:$0xff]   ;;  %v7218_v37 = vld [vmem:[%s9403_s2 + $0x2c0] sm:$0xff]  }
  0x2a   :  { %6427 = vmatpush3.bf16.msra.mxu0 %v7153_v38  ;;  %3743 = vmatprep.mubr.bf16.mxu0 %v7188_v8  ;;  %v7219_v38 = vld [vmem:[%s9403_s2 + $0x280] sm:$0xff]   ;;  %v7254_v8 = vld [vmem:[%s9403_s2 + $0x370] sm:$0xff]  }
  0x2b   :  { %6428 = vmatprep.subr.bf16.mxu0 %v7155_v40  ;;  %v7221_v40 = vld [vmem:[%s9403_s2 + $0x238] sm:$0xff]  }
  0x2c   :  { %6409 = vmatpush3.bf16.msra.mxu1 %v7154_v39  ;;  %v7220_v39 = vld [vmem:[%s9403_s2 + $0x278] sm:$0xff]  }
  0x2d   :  { %6410 = vmatprep.subr.bf16.mxu1 %v7156_v41  ;;  %v7222_v41 = vld [vmem:[%s9403_s2 + $0x2c8] sm:$0xff]  }
  0x2e   :  { %6429 = vmatpush3.bf16.msra.mxu0 %v7157_v42  ;;  %v7223_v42 = vld [vmem:[%s9403_s2 + $0x288] sm:$0xff]  }
  0x2f   :  { %6430 = vmatprep.subr.bf16.mxu0 %v7159_v44  ;;  %v7226_v44 = vld [vmem:[%s9401_s0 + $0x24] ss:$200 sps:$4 sm:$0xff]  }
  0x30   :  { %6411 = vmatpush3.bf16.msra.mxu1 %v7158_v43  ;;  %v7224_v43 = vld [vmem:[%s9401_s0 + $0x20] ss:$200 sps:$4 sm:$0xff]  }
  0x31   :  { %6412 = vmatprep.subr.bf16.mxu1 %v7160_v45  ;;  %v7227_v45 = vld [vmem:[%s9403_s2 + $0x340] sm:$0xff]  }
  0x32   :  { %6431 = vmatpush3.bf16.msra.mxu0 %v7161_v46  ;;  %v7228_v46 = vld [vmem:[%s9403_s2 + $0x2d0] sm:$0xff]  }
  0x33   :  { %6432 = vmatprep.subr.bf16.mxu0 %v7163_v48  ;;  %v7230_v48 = vld [vmem:[%s9403_s2 + $0x290] sm:$0xff]  }
  0x34   :  { %6413 = vmatpush3.bf16.msra.mxu1 %v7162_v47  ;;  %v7229_v47 = vld [vmem:[%s9403_s2 + $0x300] sm:$0xff]  }
  0x35   :  { %6414 = vmatprep.subr.bf16.mxu1 %v7164_v49  ;;  %v7231_v49 = vld [vmem:[%s9403_s2 + $0x348] sm:$0xff]  }
  0x36   :  { %6433 = vmatpush3.bf16.msra.mxu0 %v7165_v50  ;;  %v7232_v50 = vld [vmem:[%s9403_s2 + $0x2d8] sm:$0xff]  }
  0x37   :  { %6434 = vmatprep.subr.bf16.mxu0 %v7167_v52  ;;  %v7234_v52 = vld [vmem:[%s9403_s2 + $0x298] sm:$0xff]  }
  0x38   :  { %6415 = vmatpush3.bf16.msra.mxu1 %v7166_v51  ;;  %v7233_v51 = vld [vmem:[%s9403_s2 + $0x308] sm:$0xff]  }
  0x39   :  { %6416 = vmatprep.subr.bf16.mxu1 %v7168_v53  ;;  %v7235_v53 = vld [vmem:[%s9403_s2 + $0x350] sm:$0xff]  }
  0x3a   :  { %6435 = vmatpush3.bf16.msra.mxu0 %v7169_v54  ;;  %v7236_v54 = vld [vmem:[%s9403_s2 + $0x2e0] sm:$0xff]  }
  0x3b   :  { %6436 = vmatprep.subr.bf16.mxu0 %v7171_v56  ;;  %v7238_v56 = vld [vmem:[%s9403_s2 + $0x2a0] sm:$0xff]  }
  0x3c   :  { %6417 = vmatpush3.bf16.msra.mxu1 %v7170_v55  ;;  %v7237_v55 = vld [vmem:[%s9403_s2 + $0x310] sm:$0xff]  }
  0x3d   :  { %6418 = vmatprep.subr.bf16.mxu1 %v7172_v57  ;;  %v7239_v57 = vld [vmem:[%s9403_s2 + $0x358] sm:$0xff]  }
  0x3e   :  { %6437 = vmatpush3.bf16.msra.mxu0 %v7173_v58  ;;  %v7240_v58 = vld [vmem:[%s9403_s2 + $0x2e8] sm:$0xff]  }
  0x3f   :  { %6438 = vmatprep.subr.bf16.mxu0 %v7178_v61  ;;  %v7243_v61 = vld [vmem:[%s9403_s2 + $0x360] sm:$0xff]  }
  0x40   :  { %6419 = vmatpush3.bf16.msra.mxu1 %v7174_v60  ;;  %v7242_v60 = vld [vmem:[%s9403_s2 + $0x2a8] sm:$0xff]  }
  0x41   :  { %6448 = vmatprep.subr.bf16.mxu1 %v7180_v0  ;;  %v7246_v0 = vld [vmem:[%s9403_s2 + $0x2b0] sm:$0xff]  }
  0x42   :  { %6439 = vmatpush3.bf16.msra.mxu0 %v7179_v62  ;;  %v7244_v62 = vld [vmem:[%s9403_s2 + $0x2f0] sm:$0xff]  }
  0x43   :  { %3703 = vmatmul.mubr.bf16.vlgmr.msra.gmra.mrb[4].mxu1 %v7175_v63  ;;  %6440 = vmatprep.subr.bf16.mxu0 %v7182_v3  ;;  %v7245_v63 = vld [vmem:[%s9403_s2 + $0x320] sm:$0xff]   ;;  %v7248_v3 = vld [vmem:[%s9403_s2 + $0x2f8] sm:$0xff]  }
  0x44   :  { %6449 = vmatpush3.bf16.msra.mxu1 %v7181_v2  ;;  %3784 = vmatprep.mubr.bf16.mxu1 %v7215_v33  ;;  %v7247_v2 = vld [vmem:[%s9403_s2 + $0x368] sm:$0xff]  }
  0x45   :  { %6450 = vmatprep.subr.bf16.mxu1 %v7184_v5  ;;  %v7250_v5 = vld [vmem:[%s9403_s2 + $0x2b8] sm:$0xff]   ;;  %v7280_v33 = vld [vmem:[%s9403_s2 + $0x3a8] sm:$0xff]  }
  0x46   :  { %6441 = vmatpush3.bf16.msra.mxu0 %v7183_v4  ;;  %v7249_v4 = vld [vmem:[%s9403_s2 + $0x328] sm:$0xff]  }
  0x47   :  { %6470 = vmatprep.subr.bf16.mxu0 %v7189_v9  ;;  %v7255_v9 = vld [vmem:[%s9403_s2 + $0x330] sm:$0xff]  }
  0x48   :  { %6451 = vmatpush3.bf16.msra.mxu1 %v7185_v6  ;;  %v7251_v6 = vld [vmem:[%s9401_s0 + $0x28] ss:$200 sps:$4 sm:$0xff]  }
  0x49   :  { %3744 = vmatmul.mubr.bf16.vlgmr.msra.gmra.mrb[4].mxu0 %v7186_v7  ;;  %6452 = vmatprep.subr.bf16.mxu1 %v7190_v10  ;;  %v7253_v7 = vld [vmem:[%s9401_s0 + $0x2c] ss:$200 sps:$4 sm:$0xff]   ;;  %v7256_v10 = vld [vmem:[%s9403_s2 + $0x3c0] sm:$0xff]  }
  0x4a   :  { %6471 = vmatpush3.bf16.msra.mxu0 %v7191_v11  ;;  %3825 = vmatprep.mubr.bf16.mxu0 %v7226_v44  ;;  %v7257_v11 = vld [vmem:[%s9403_s2 + $0x380] sm:$0xff]   ;;  %v7292_v44 = vld [vmem:[%s9403_s2 + $0x470] sm:$0xff]  }
  0x4b   :  { %6472 = vmatprep.subr.bf16.mxu0 %v7193_v13  ;;  %v7259_v13 = vld [vmem:[%s9403_s2 + $0x338] sm:$0xff]  }
  0x4c   :  { %6453 = vmatpush3.bf16.msra.mxu1 %v7192_v12  ;;  %v7258_v12 = vld [vmem:[%s9403_s2 + $0x378] sm:$0xff]  }
  0x4d   :  { %6454 = vmatprep.subr.bf16.mxu1 %v7194_v14  ;;  %v7260_v14 = vld [vmem:[%s9403_s2 + $0x3c8] sm:$0xff]  }
  0x4e   :  { %6473 = vmatpush3.bf16.msra.mxu0 %v7195_v15  ;;  %v7261_v15 = vld [vmem:[%s9403_s2 + $0x388] sm:$0xff]  }
  0x4f   :  { %6474 = vmatprep.subr.bf16.mxu0 %v7197_v17  ;;  %v7264_v17 = vld [vmem:[%s9401_s0 + $0x34] ss:$200 sps:$4 sm:$0xff]  }
  0x50   :  { %6455 = vmatpush3.bf16.msra.mxu1 %v7196_v16  ;;  %v7262_v16 = vld [vmem:[%s9401_s0 + $0x30] ss:$200 sps:$4 sm:$0xff]  }
  0x51   :  { %6456 = vmatprep.subr.bf16.mxu1 %v7198_v18  ;;  %v7265_v18 = vld [vmem:[%s9403_s2 + $0x440] sm:$0xff]  }
  0x52   :  { %6475 = vmatpush3.bf16.msra.mxu0 %v7199_v19  ;;  %v7266_v19 = vld [vmem:[%s9403_s2 + $0x3d0] sm:$0xff]  }
  0x53   :  { %6476 = vmatprep.subr.bf16.mxu0 %v7201_v21  ;;  %v7268_v21 = vld [vmem:[%s9403_s2 + $0x390] sm:$0xff]  }
  0x54   :  { %6457 = vmatpush3.bf16.msra.mxu1 %v7200_v20  ;;  %v7267_v20 = vld [vmem:[%s9403_s2 + $0x400] sm:$0xff]  }
  0x55   :  { %6458 = vmatprep.subr.bf16.mxu1 %v7202_v22  ;;  %v7269_v22 = vld [vmem:[%s9403_s2 + $0x448] sm:$0xff]  }
  0x56   :  { %6477 = vmatpush3.bf16.msra.mxu0 %v7203_v23  ;;  %v7270_v23 = vld [vmem:[%s9403_s2 + $0x3d8] sm:$0xff]  }
  0x57   :  { %6478 = vmatprep.subr.bf16.mxu0 %v7205_v25  ;;  %v7272_v25 = vld [vmem:[%s9403_s2 + $0x398] sm:$0xff]  }
  0x58   :  { %6459 = vmatpush3.bf16.msra.mxu1 %v7204_v24  ;;  %v7271_v24 = vld [vmem:[%s9403_s2 + $0x408] sm:$0xff]  }
  0x59   :  { %6460 = vmatprep.subr.bf16.mxu1 %v7206_v26  ;;  %v7273_v26 = vld [vmem:[%s9403_s2 + $0x450] sm:$0xff]  }
  0x5a   :  { %6479 = vmatpush3.bf16.msra.mxu0 %v7207_v27  ;;  %v7274_v27 = vld [vmem:[%s9403_s2 + $0x3e0] sm:$0xff]  }
  0x5b   :  { %6480 = vmatprep.subr.bf16.mxu0 %v7209_v29  ;;  %v7276_v29 = vld [vmem:[%s9403_s2 + $0x3a0] sm:$0xff]  }
  0x5c   :  { %6461 = vmatpush3.bf16.msra.mxu1 %v7208_v28  ;;  %v7275_v28 = vld [vmem:[%s9403_s2 + $0x410] sm:$0xff]  }
  0x5d   :  { %6462 = vmatprep.subr.bf16.mxu1 %v7210_v30  ;;  %v7277_v30 = vld [vmem:[%s9403_s2 + $0x458] sm:$0xff]  }
  0x5e   :  { %6481 = vmatpush3.bf16.msra.mxu0 %v7211_v31  ;;  %v7278_v31 = vld [vmem:[%s9403_s2 + $0x3e8] sm:$0xff]  }
  0x5f   :  { %6482 = vmatprep.subr.bf16.mxu0 %v7216_v35  ;;  %v7282_v35 = vld [vmem:[%s9403_s2 + $0x3f0] sm:$0xff]  }
  0x60   :  { %6463 = vmatpush3.bf16.msra.mxu1 %v7212_v32  ;;  %v7279_v32 = vld [vmem:[%s9403_s2 + $0x418] sm:$0xff]  }
  0x61   :  { %6492 = vmatprep.subr.bf16.mxu1 %v7218_v37  ;;  %v7284_v37 = vld [vmem:[%s9403_s2 + $0x3b0] sm:$0xff]  }
  0x62   :  { %6483 = vmatpush3.bf16.msra.mxu0 %v7217_v36  ;;  %v7283_v36 = vld [vmem:[%s9403_s2 + $0x420] sm:$0xff]  }
  0x63   :  { %3785 = vmatmul.mubr.bf16.vlgmr.msra.gmra.mrb[8].mxu1 %v7213_v34  ;;  %6484 = vmatprep.subr.bf16.mxu0 %v7220_v39  ;;  %v7281_v34 = vld [vmem:[%s9403_s2 + $0x460] sm:$0xff]   ;;  %v7286_v39 = vld [vmem:[%s9403_s2 + $0x3f8] sm:$0xff]  }
  0x64   :  { %6493 = vmatpush3.bf16.msra.mxu1 %v7219_v38  ;;  %3866 = vmatprep.mubr.bf16.mxu1 %v7253_v7  ;;  %v7285_v38 = vld [vmem:[%s9403_s2 + $0x468] sm:$0xff]   ;;  %v7319_v7 = vld [vmem:[%s9403_s2 + $0x560] sm:$0xff]  }
  0x65   :  { %6494 = vmatprep.subr.bf16.mxu1 %v7222_v41  ;;  %v7288_v41 = vld [vmem:[%s9403_s2 + $0x3b8] sm:$0xff]  }
  0x66   :  { %6485 = vmatpush3.bf16.msra.mxu0 %v7221_v40  ;;  %v7287_v40 = vld [vmem:[%s9403_s2 + $0x428] sm:$0xff]  }
  0x67   :  { %6514 = vmatprep.subr.bf16.mxu0 %v7227_v45  ;;  %v7293_v45 = vld [vmem:[%s9403_s2 + $0x430] sm:$0xff]  }
  0x68   :  { %6495 = vmatpush3.bf16.msra.mxu1 %v7223_v42  ;;  %v7289_v42 = vld [vmem:[%s9401_s0 + $0x38] ss:$200 sps:$4 sm:$0xff]  }
  0x69   :  { %3826 = vmatmul.mubr.bf16.vlgmr.msra.gmra.mrb[8].mxu0 %v7224_v43  ;;  %6496 = vmatprep.subr.bf16.mxu1 %v7228_v46  ;;  %v7291_v43 = vld [vmem:[%s9401_s0 + $0x3c] ss:$200 sps:$4 sm:$0xff]  }
  0x6a   :  { %6515 = vmatpush3.bf16.msra.mxu0 %v7229_v47  ;;  %3907 = vmatprep.mubr.bf16.mxu0 %v7264_v17  ;;  %v7294_v46 = vld [vmem:[%s9403_s2 + $0x4c0] sm:$0xff]   ;;  %v7330_v17 = vld [vmem:[%s9403_s2 + $0x570] sm:$0xff]  }
  0x6b   :  { %6516 = vmatprep.subr.bf16.mxu0 %v7231_v49  ;;  %v7295_v47 = vld [vmem:[%s9403_s2 + $0x480] sm:$0xff]   ;;  %v7297_v49 = vld [vmem:[%s9403_s2 + $0x438] sm:$0xff]  }
  0x6c   :  { %6497 = vmatpush3.bf16.msra.mxu1 %v7230_v48  ;;  %v7296_v48 = vld [vmem:[%s9403_s2 + $0x478] sm:$0xff]  }
  0x6d   :  { %6498 = vmatprep.subr.bf16.mxu1 %v7232_v50  ;;  %v7298_v50 = vld [vmem:[%s9403_s2 + $0x4c8] sm:$0xff]  }
  0x6e   :  { %6517 = vmatpush3.bf16.msra.mxu0 %v7233_v51  ;;  %v7299_v51 = vld [vmem:[%s9403_s2 + $0x488] sm:$0xff]  }
  0x6f   :  { %6518 = vmatprep.subr.bf16.mxu0 %v7235_v53  ;;  %v7302_v53 = vld [vmem:[%s9401_s0 + $0x44] ss:$200 sps:$4 sm:$0xff]  }
  0x70   :  { %6499 = vmatpush3.bf16.msra.mxu1 %v7234_v52  ;;  %v7300_v52 = vld [vmem:[%s9401_s0 + $0x40] ss:$200 sps:$4 sm:$0xff]  }
  0x71   :  { %6500 = vmatprep.subr.bf16.mxu1 %v7236_v54  ;;  %v7303_v54 = vld [vmem:[%s9403_s2 + $0x540] sm:$0xff]  }
  0x72   :  { %6519 = vmatpush3.bf16.msra.mxu0 %v7237_v55  ;;  %v7304_v55 = vld [vmem:[%s9403_s2 + $0x4d0] sm:$0xff]  }
  0x73   :  { %6520 = vmatprep.subr.bf16.mxu0 %v7239_v57  ;;  %v7306_v57 = vld [vmem:[%s9403_s2 + $0x490] sm:$0xff]  }
  0x74   :  { %6501 = vmatpush3.bf16.msra.mxu1 %v7238_v56  ;;  %v7305_v56 = vld [vmem:[%s9403_s2 + $0x500] sm:$0xff]  }
  0x75   :  { %6502 = vmatprep.subr.bf16.mxu1 %v7240_v58  ;;  %v7307_v58 = vld [vmem:[%s9403_s2 + $0x548] sm:$0xff]  }
  0x76   :  { %6521 = vmatpush3.bf16.msra.mxu0 %v7241_v59  ;;  %v7308_v59 = vld [vmem:[%s9403_s2 + $0x4d8] sm:$0xff]  }
  0x77   :  { %6522 = vmatprep.subr.bf16.mxu0 %v7243_v61  ;;  %v7310_v61 = vld [vmem:[%s9403_s2 + $0x498] sm:$0xff]  }
  0x78   :  { %6503 = vmatpush3.bf16.msra.mxu1 %v7242_v60  ;;  %v7309_v60 = vld [vmem:[%s9403_s2 + $0x508] sm:$0xff]  }
  0x79   :  { %6504 = vmatprep.subr.bf16.mxu1 %v7244_v62  ;;  %v7311_v62 = vld [vmem:[%s9403_s2 + $0x550] sm:$0xff]  }
  0x7a   :  { %6523 = vmatpush3.bf16.msra.mxu0 %v7245_v63  ;;  %v7312_v63 = vld [vmem:[%s9403_s2 + $0x4e0] sm:$0xff]  }
  0x7b   :  { %6524 = vmatprep.subr.bf16.mxu0 %v7247_v2  ;;  %v7314_v2 = vld [vmem:[%s9403_s2 + $0x4a0] sm:$0xff]  }
  0x7c   :  { %6505 = vmatpush3.bf16.msra.mxu1 %v7246_v0  ;;  %v7313_v0 = vld [vmem:[%s9403_s2 + $0x510] sm:$0xff]  }
  0x7d   :  { %6506 = vmatprep.subr.bf16.mxu1 %v7248_v3  ;;  %v7315_v3 = vld [vmem:[%s9403_s2 + $0x558] sm:$0xff]  }
  0x7e   :  { %6525 = vmatpush3.bf16.msra.mxu0 %v7249_v4  ;;  %v7316_v4 = vld [vmem:[%s9403_s2 + $0x4e8] sm:$0xff]  }
  0x7f   :  { %6526 = vmatprep.subr.bf16.mxu0 %v7254_v8  ;;  %v7320_v8 = vld [vmem:[%s9403_s2 + $0x4f0] sm:$0xff]  }
  0x80   :  { %6507 = vmatpush3.bf16.msra.mxu1 %v7250_v5  ;;  %v7317_v5 = vld [vmem:[%s9403_s2 + $0x518] sm:$0xff]  }
  0x81   :  { %6536 = vmatprep.subr.bf16.mxu1 %v7256_v10  ;;  %v7322_v10 = vld [vmem:[%s9403_s2 + $0x4b0] sm:$0xff]  }
  0x82   :  { %6527 = vmatpush3.bf16.msra.mxu0 %v7255_v9  ;;  %v7321_v9 = vld [vmem:[%s9403_s2 + $0x520] sm:$0xff]  }
  0x83   :  { %3867 = vmatmul.mubr.bf16.vlgmr.msra.gmra.mrb[12].mxu1 %v7251_v6  ;;  %6528 = vmatprep.subr.bf16.mxu0 %v7258_v12  ;;  %v7318_v6 = vld [vmem:[%s9403_s2 + $0x4a8] sm:$0xff]   ;;  %v7324_v12 = vld [vmem:[%s9403_s2 + $0x4f8] sm:$0xff]  }
  0x84   :  { %6537 = vmatpush3.bf16.msra.mxu1 %v7257_v11  ;;  %3948 = vmatprep.mubr.bf16.mxu1 %v7291_v43  ;;  %v7323_v11 = vld [vmem:[%s9403_s2 + $0x568] sm:$0xff]   ;;  %v7357_v43 = vld [vmem:[%s9403_s2 + $0x660] sm:$0xff]  }
  0x85   :  { %6538 = vmatprep.subr.bf16.mxu1 %v7260_v14  ;;  %v7326_v14 = vld [vmem:[%s9403_s2 + $0x4b8] sm:$0xff]  }
  0x86   :  { %6529 = vmatpush3.bf16.msra.mxu0 %v7259_v13  ;;  %v7325_v13 = vld [vmem:[%s9403_s2 + $0x528] sm:$0xff]  }
  0x87   :  { %6558 = vmatprep.subr.bf16.mxu0 %v7265_v18  ;;  %v7331_v18 = vld [vmem:[%s9403_s2 + $0x530] sm:$0xff]  }
  0x88   :  { %6539 = vmatpush3.bf16.msra.mxu1 %v7261_v15  ;;  %v7327_v15 = vld [vmem:[%s9401_s0 + $0x48] ss:$200 sps:$4 sm:$0xff]  }
  0x89   :  { %3908 = vmatmul.mubr.bf16.vlgmr.msra.gmra.mrb[12].mxu0 %v7262_v16  ;;  %6540 = vmatprep.subr.bf16.mxu1 %v7266_v19  ;;  %v7329_v16 = vld [vmem:[%s9401_s0 + $0x4c] ss:$200 sps:$4 sm:$0xff]   ;;  %v7332_v19 = vld [vmem:[%s9403_s2 + $0x5c0] sm:$0xff]  }
  0x8a   :  { %6559 = vmatpush3.bf16.msra.mxu0 %v7267_v20  ;;  %3989 = vmatprep.mubr.bf16.mxu0 %v7302_v53  ;;  %v7333_v20 = vld [vmem:[%s9403_s2 + $0x580] sm:$0xff]   ;;  %v7368_v53 = vld [vmem:[%s9403_s2 + $0x670] sm:$0xff]  }
  0x8b   :  { %6560 = vmatprep.subr.bf16.mxu0 %v7269_v22  ;;  %v7335_v22 = vld [vmem:[%s9403_s2 + $0x538] sm:$0xff]  }
  0x8c   :  { %6541 = vmatpush3.bf16.msra.mxu1 %v7268_v21  ;;  %v7334_v21 = vld [vmem:[%s9403_s2 + $0x578] sm:$0xff]  }
  0x8d   :  { %6542 = vmatprep.subr.bf16.mxu1 %v7270_v23  ;;  %v7336_v23 = vld [vmem:[%s9403_s2 + $0x5c8] sm:$0xff]  }
  0x8e   :  { %6561 = vmatpush3.bf16.msra.mxu0 %v7271_v24  ;;  %v7337_v24 = vld [vmem:[%s9403_s2 + $0x588] sm:$0xff]  }
  0x8f   :  { %6562 = vmatprep.subr.bf16.mxu0 %v7273_v26  ;;  %v7340_v26 = vld [vmem:[%s9401_s0 + $0x54] ss:$200 sps:$4 sm:$0xff]  }
  0x90   :  { %6543 = vmatpush3.bf16.msra.mxu1 %v7272_v25  ;;  %v7338_v25 = vld [vmem:[%s9401_s0 + $0x50] ss:$200 sps:$4 sm:$0xff]  }
  0x91   :  { %6544 = vmatprep.subr.bf16.mxu1 %v7274_v27  ;;  %v7341_v27 = vld [vmem:[%s9403_s2 + $0x640] sm:$0xff]  }
  0x92   :  { %6563 = vmatpush3.bf16.msra.mxu0 %v7275_v28  ;;  %v7342_v28 = vld [vmem:[%s9403_s2 + $0x5d0] sm:$0xff]  }
  0x93   :  { %6564 = vmatprep.subr.bf16.mxu0 %v7277_v30  ;;  %v7344_v30 = vld [vmem:[%s9403_s2 + $0x590] sm:$0xff]  }
  0x94   :  { %6545 = vmatpush3.bf16.msra.mxu1 %v7276_v29  ;;  %v7343_v29 = vld [vmem:[%s9403_s2 + $0x600] sm:$0xff]  }
  0x95   :  { %6546 = vmatprep.subr.bf16.mxu1 %v7278_v31  ;;  %v7345_v31 = vld [vmem:[%s9403_s2 + $0x648] sm:$0xff]  }
  0x96   :  { %6565 = vmatpush3.bf16.msra.mxu0 %v7279_v32  ;;  %v7346_v32 = vld [vmem:[%s9403_s2 + $0x5d8] sm:$0xff]  }
  0x97   :  { %6566 = vmatprep.subr.bf16.mxu0 %v7281_v34  ;;  %v7348_v34 = vld [vmem:[%s9403_s2 + $0x598] sm:$0xff]  }
  0x98   :  { %6547 = vmatpush3.bf16.msra.mxu1 %v7280_v33  ;;  %v7347_v33 = vld [vmem:[%s9403_s2 + $0x608] sm:$0xff]  }
  0x99   :  { %6548 = vmatprep.subr.bf16.mxu1 %v7282_v35  ;;  %v7349_v35 = vld [vmem:[%s9403_s2 + $0x650] sm:$0xff]  }
  0x9a   :  { %6567 = vmatpush3.bf16.msra.mxu0 %v7283_v36  ;;  %v7350_v36 = vld [vmem:[%s9403_s2 + $0x5e0] sm:$0xff]  }
  0x9b   :  { %6568 = vmatprep.subr.bf16.mxu0 %v7285_v38  ;;  %v7352_v38 = vld [vmem:[%s9403_s2 + $0x5a0] sm:$0xff]  }
  0x9c   :  { %6549 = vmatpush3.bf16.msra.mxu1 %v7284_v37  ;;  %v7351_v37 = vld [vmem:[%s9403_s2 + $0x610] sm:$0xff]  }
  0x9d   :  { %6550 = vmatprep.subr.bf16.mxu1 %v7286_v39  ;;  %v7353_v39 = vld [vmem:[%s9403_s2 + $0x658] sm:$0xff]  }
  0x9e   :  { %6569 = vmatpush3.bf16.msra.mxu0 %v7287_v40  ;;  %v7354_v40 = vld [vmem:[%s9403_s2 + $0x5e8] sm:$0xff]  }
  0x9f   :  { %6570 = vmatprep.subr.bf16.mxu0 %v7292_v44  ;;  %v7358_v44 = vld [vmem:[%s9403_s2 + $0x5f0] sm:$0xff]  }
  0xa0   :  { %6551 = vmatpush3.bf16.msra.mxu1 %v7288_v41  ;;  %v7355_v41 = vld [vmem:[%s9403_s2 + $0x618] sm:$0xff]  }
  0xa1   :  { %6580 = vmatprep.subr.bf16.mxu1 %v7294_v46  ;;  %v7360_v46 = vld [vmem:[%s9403_s2 + $0x5b0] sm:$0xff]  }
  0xa2   :  { %6571 = vmatpush3.bf16.msra.mxu0 %v7293_v45  ;;  %v7359_v45 = vld [vmem:[%s9403_s2 + $0x620] sm:$0xff]  }
  0xa3   :  { %3949 = vmatmul.mubr.bf16.vlgmr.msra.gmra.mrb[16].mxu1 %v7289_v42  ;;  %6572 = vmatprep.subr.bf16.mxu0 %v7296_v48  ;;  %v7356_v42 = vld [vmem:[%s9403_s2 + $0x5a8] sm:$0xff]   ;;  %v7362_v48 = vld [vmem:[%s9403_s2 + $0x5f8] sm:$0xff]  }
  0xa4   :  { %6581 = vmatpush3.bf16.msra.mxu1 %v7295_v47  ;;  %4030 = vmatprep.mubr.bf16.mxu1 %v7329_v16  ;;  %v7361_v47 = vld [vmem:[%s9403_s2 + $0x668] sm:$0xff]   ;;  %v7389_v16 = vld [vmem:[%s9403_s2 + $0x710] sm:$0xff]  }
  0xa5   :  { %6582 = vmatprep.subr.bf16.mxu1 %v7298_v50  ;;  %v7364_v50 = vld [vmem:[%s9403_s2 + $0x5b8] sm:$0xff]  }
  0xa6   :  { %6573 = vmatpush3.bf16.msra.mxu0 %v7297_v49  ;;  %v7363_v49 = vld [vmem:[%s9403_s2 + $0x628] sm:$0xff]  }
  0xa7   :  { %6602 = vmatprep.subr.bf16.mxu0 %v7303_v54  ;;  %v7369_v54 = vld [vmem:[%s9403_s2 + $0x630] sm:$0xff]  }
  0xa8   :  { %6583 = vmatpush3.bf16.msra.mxu1 %v7299_v51  ;;  %v7365_v51 = vld [vmem:[%s9401_s0 + $0x58] ss:$200 sps:$4 sm:$0xff]  }
  0xa9   :  { %3990 = vmatmul.mubr.bf16.vlgmr.msra.gmra.mrb[16].mxu0 %v7300_v52  ;;  %6584 = vmatprep.subr.bf16.mxu1 %v7304_v55  ;;  %v7367_v52 = vld [vmem:[%s9401_s0 + $0x5c] ss:$200 sps:$4 sm:$0xff]  }
  0xaa   :  { %6603 = vmatpush3.bf16.msra.mxu0 %v7305_v56  ;;  %4071 = vmatprep.mubr.bf16.mxu0 %v7340_v26  ;;  %v7370_v55 = vld [vmem:[%s9403_s2 + $0x6c0] sm:$0xff]  }
  0xab   :  { %6604 = vmatprep.subr.bf16.mxu0 %v7307_v58  ;;  %v7371_v56 = vld [vmem:[%s9403_s2 + $0x680] sm:$0xff]   ;;  %v7373_v58 = vld [vmem:[%s9403_s2 + $0x638] sm:$0xff]  }
  0xac   :  { %6585 = vmatpush3.bf16.msra.mxu1 %v7306_v57  ;;  %v7372_v57 = vld [vmem:[%s9403_s2 + $0x678] sm:$0xff]  }
  0xad   :  { %6586 = vmatprep.subr.bf16.mxu1 %v7308_v59  ;;  %v7374_v59 = vld [vmem:[%s9403_s2 + $0x6c8] sm:$0xff]  }
  0xae   :  { %6605 = vmatpush3.bf16.msra.mxu0 %v7309_v60  ;;  %v7375_v60 = vld [vmem:[%s9403_s2 + $0x688] sm:$0xff]  }
  0xaf   :  { %6606 = vmatprep.subr.bf16.mxu0 %v7311_v62  ;;  %v7378_v62 = vld [vmem:[%s9401_s0 + $0x64] ss:$200 sps:$4 sm:$0xff]  }
  0xb0   :  { %6587 = vmatpush3.bf16.msra.mxu1 %v7310_v61  ;;  %v7376_v61 = vld [vmem:[%s9401_s0 + $0x60] ss:$200 sps:$4 sm:$0xff]  }
  0xb1   :  { %6588 = vmatprep.subr.bf16.mxu1 %v7312_v63  ;;  %v7379_v63 = vld [vmem:[%s9403_s2 + $0x740] sm:$0xff]  }
  0xb2   :  { %6607 = vmatpush3.bf16.msra.mxu0 %v7313_v0  ;;  %v7380_v0 = vld [vmem:[%s9403_s2 + $0x6d0] sm:$0xff]  }
  0xb3   :  { %6608 = vmatprep.subr.bf16.mxu0 %v7315_v3  ;;  %v7382_v3 = vld [vmem:[%s9403_s2 + $0x690] sm:$0xff]  }
  0xb4   :  { %6589 = vmatpush3.bf16.msra.mxu1 %v7314_v2  ;;  %v7381_v2 = vld [vmem:[%s9403_s2 + $0x700] sm:$0xff]  }
  0xb5   :  { %6590 = vmatprep.subr.bf16.mxu1 %v7316_v4  ;;  %v7383_v4 = vld [vmem:[%s9403_s2 + $0x748] sm:$0xff]  }
  0xb6   :  { %6609 = vmatpush3.bf16.msra.mxu0 %v7317_v5  ;;  %v7384_v5 = vld [vmem:[%s9403_s2 + $0x6d8] sm:$0xff]  }
  0xb7   :  { %6610 = vmatprep.subr.bf16.mxu0 %v7319_v7  ;;  %v7385_v7 = vld [vmem:[%s9403_s2 + $0x708] sm:$0xff]  }
  0xb8   :  { %6591 = vmatpush3.bf16.msra.mxu1 %v7318_v6 }
  0xb9   :  { %6592 = vmatprep.subr.bf16.mxu1 %v7320_v8 }
  0xba   :  { %6611 = vmatpush3.bf16.msra.mxu0 %v7321_v9  ;;  %v7386_v9 = vld [vmem:[%s9403_s2 + $0x698] sm:$0xff]  }
  0xbb   :  { %6612 = vmatprep.subr.bf16.mxu0 %v7323_v11 }
  0xbc   :  { %6593 = vmatpush3.bf16.msra.mxu1 %v7322_v10 }
  0xbd   :  { %6594 = vmatprep.subr.bf16.mxu1 %v7324_v12  ;;  %v7387_v12 = vld [vmem:[%s9403_s2 + $0x750] sm:$0xff]  }
  0xbe   :  { %6613 = vmatpush3.bf16.msra.mxu0 %v7325_v13 }
  0xbf   :  { %6614 = vmatprep.subr.bf16.mxu0 %v7330_v17  ;;  %v7390_v17 = vld [vmem:[%s9403_s2 + $0x6a0] sm:$0xff]  }
  0xc0   :  { %6595 = vmatpush3.bf16.msra.mxu1 %v7326_v14  ;;  %v7388_v14 = vld [vmem:[%s9403_s2 + $0x6e0] sm:$0xff]  }
  0xc1   :  { %6624 = vmatprep.subr.bf16.mxu1 %v7332_v19  ;;  %v7391_v19 = vld [vmem:[%s9403_s2 + $0x758] sm:$0xff]  }
  0xc2   :  { %6615 = vmatpush3.bf16.msra.mxu0 %v7331_v18 }
  0xc3   :  { %4031 = vmatmul.mubr.bf16.vlgmr.msra.gmra.mrb[20].mxu1 %v7327_v15  ;;  %6616 = vmatprep.subr.bf16.mxu0 %v7334_v21 }
  0xc4   :  { %6625 = vmatpush3.bf16.msra.mxu1 %v7333_v20  ;;  %4112 = vmatprep.mubr.bf16.mxu1 %v7367_v52  ;;  %v7420_v52 = vld [vmem:[%s9403_s2 + $0x790] sm:$0xff]  }
  0xc5   :  { %6626 = vmatprep.subr.bf16.mxu1 %v7336_v23 }
  0xc6   :  { %6617 = vmatpush3.bf16.msra.mxu0 %v7335_v22  ;;  %v7392_v22 = vld [vmem:[%s9403_s2 + $0x6e8] sm:$0xff]  }
  0xc7   :  { %6646 = vmatprep.subr.bf16.mxu0 %v7341_v27  ;;  %v7394_v27 = vld [vmem:[%s9403_s2 + $0x6a8] sm:$0xff]  }
  0xc8   :  { %6627 = vmatpush3.bf16.msra.mxu1 %v7337_v24  ;;  %v7393_v24 = vld [vmem:[%s9403_s2 + $0x718] sm:$0xff]  }
  0xc9   :  { %4072 = vmatmul.mubr.bf16.vlgmr.msra.gmra.mrb[20].mxu0 %v7338_v25  ;;  %6628 = vmatprep.subr.bf16.mxu1 %v7342_v28  ;;  %v7395_v28 = vld [vmem:[%s9403_s2 + $0x760] sm:$0xff]  }
  0xca   :  { %6647 = vmatpush3.bf16.msra.mxu0 %v7343_v29  ;;  %4153 = vmatprep.mubr.bf16.mxu0 %v7378_v62  ;;  %v7396_v29 = vld [vmem:[%s9403_s2 + $0x6f0] sm:$0xff]   ;;  %v7424_v62 = vld [vmem:[%s9403_s2 + $0x798] sm:$0xff]  }
  0xcb   :  { %6648 = vmatprep.subr.bf16.mxu0 %v7345_v31  ;;  %v7398_v31 = vld [vmem:[%s9403_s2 + $0x6b0] sm:$0xff]  }
  0xcc   :  { %6629 = vmatpush3.bf16.msra.mxu1 %v7344_v30  ;;  %v7397_v30 = vld [vmem:[%s9403_s2 + $0x720] sm:$0xff]  }
  0xcd   :  { %6630 = vmatprep.subr.bf16.mxu1 %v7346_v32  ;;  %v7399_v32 = vld [vmem:[%s9403_s2 + $0x768] sm:$0xff]  }
  0xce   :  { %6649 = vmatpush3.bf16.msra.mxu0 %v7347_v33  ;;  %v7400_v33 = vld [vmem:[%s9403_s2 + $0x6f8] sm:$0xff]  }
  0xcf   :  { %6650 = vmatprep.subr.bf16.mxu0 %v7349_v35  ;;  %v7402_v35 = vld [vmem:[%s9403_s2 + $0x6b8] sm:$0xff]  }
  0xd0   :  { %6631 = vmatpush3.bf16.msra.mxu1 %v7348_v34  ;;  %v7401_v34 = vld [vmem:[%s9403_s2 + $0x728] sm:$0xff]  }
  0xd1   :  { %6632 = vmatprep.subr.bf16.mxu1 %v7350_v36  ;;  %v7403_v36 = vld [vmem:[%s9401_s0 + $0x68] ss:$200 sps:$4 sm:$0xff]  }
  0xd2   :  { %6651 = vmatpush3.bf16.msra.mxu0 %v7351_v37  ;;  %v7405_v37 = vld [vmem:[%s9401_s0 + $0x6c] ss:$200 sps:$4 sm:$0xff]  }
  0xd3   :  { %6652 = vmatprep.subr.bf16.mxu0 %v7353_v39  ;;  %v7407_v39 = vld [vmem:[%s9403_s2 + $0x730] sm:$0xff]  }
  0xd4   :  { %6633 = vmatpush3.bf16.msra.mxu1 %v7352_v38  ;;  %v7406_v38 = vld [vmem:[%s9403_s2 + $0x770] sm:$0xff]  }
  0xd5   :  { %6634 = vmatprep.subr.bf16.mxu1 %v7354_v40  ;;  %v7408_v40 = vld [vmem:[%s9403_s2 + $0x7c0] sm:$0xff]  }
  0xd6   :  { %6653 = vmatpush3.bf16.msra.mxu0 %v7355_v41  ;;  %v7409_v41 = vld [vmem:[%s9403_s2 + $0x780] sm:$0xff]  }
  0xd7   :  { %6654 = vmatprep.subr.bf16.mxu0 %v7357_v43  ;;  %v7411_v43 = vld [vmem:[%s9403_s2 + $0x738] sm:$0xff]  }
  0xd8   :  { %6635 = vmatpush3.bf16.msra.mxu1 %v7356_v42  ;;  %v7410_v42 = vld [vmem:[%s9403_s2 + $0x778] sm:$0xff]  }
  0xd9   :  { %6636 = vmatprep.subr.bf16.mxu1 %v7358_v44  ;;  %v7412_v44 = vld [vmem:[%s9403_s2 + $0x7c8] sm:$0xff]  }
  0xda   :  { %6655 = vmatpush3.bf16.msra.mxu0 %v7359_v45  ;;  %v7413_v45 = vld [vmem:[%s9403_s2 + $0x788] sm:$0xff]  }
  0xdb   :  { %6656 = vmatprep.subr.bf16.mxu0 %v7361_v47  ;;  %v7416_v47 = vld [vmem:[%s9401_s0 + $0x74] ss:$200 sps:$4 sm:$0xff]  }
  0xdc   :  { %6637 = vmatpush3.bf16.msra.mxu1 %v7360_v46  ;;  %v7414_v46 = vld [vmem:[%s9401_s0 + $0x70] ss:$200 sps:$4 sm:$0xff]  }
  0xdd   :  { %6638 = vmatprep.subr.bf16.mxu1 %v7362_v48  ;;  %v7417_v48 = vld [vmem:[%s9403_s2 + $0x840] sm:$0xff]  }
  0xde   :  { %6657 = vmatpush3.bf16.msra.mxu0 %v7363_v49  ;;  %v7418_v49 = vld [vmem:[%s9403_s2 + $0x7d0] sm:$0xff]  }
  0xdf   :  { %6658 = vmatprep.subr.bf16.mxu0 %v7368_v53 }
  0xe0   :  { %6639 = vmatpush3.bf16.msra.mxu1 %v7364_v50  ;;  %v7419_v50 = vld [vmem:[%s9403_s2 + $0x800] sm:$0xff]  }
  0xe1   :  { %6668 = vmatprep.subr.bf16.mxu1 %v7370_v55 }
  0xe2   :  { %6659 = vmatpush3.bf16.msra.mxu0 %v7369_v54  ;;  %v7421_v54 = vld [vmem:[%s9403_s2 + $0x848] sm:$0xff]  }
  0xe3   :  { %4113 = vmatmul.mubr.bf16.vlgmr.msra.gmra.mrb[24].mxu1 %v7365_v51  ;;  %6660 = vmatprep.subr.bf16.mxu0 %v7372_v57  ;;  %v7422_v57 = vld [vmem:[%s9403_s2 + $0x7d8] sm:$0xff]  }
  0xe4   :  { %6669 = vmatpush3.bf16.msra.mxu1 %v7371_v56  ;;  %4194 = vmatprep.mubr.bf16.mxu1 %v7405_v37  ;;  %v7455_v37 = vld [vmem:[%s9403_s2 + $0x940] sm:$0xff]  }
  0xe5   :  { %6670 = vmatprep.subr.bf16.mxu1 %v7374_v59  ;;  %v7423_v59 = vld [vmem:[%s9403_s2 + $0x808] sm:$0xff]  }
  0xe6   :  { %6661 = vmatpush3.bf16.msra.mxu0 %v7373_v58 }
  0xe7   :  { %6690 = vmatprep.subr.bf16.mxu0 %v7379_v63  ;;  %v7425_v63 = vld [vmem:[%s9403_s2 + $0x850] sm:$0xff]  }
  0xe8   :  { %6671 = vmatpush3.bf16.msra.mxu1 %v7375_v60 }
  0xe9   :  { %4154 = vmatmul.mubr.bf16.vlgmr.msra.gmra.mrb[24].mxu0 %v7376_v61  ;;  %6672 = vmatprep.subr.bf16.mxu1 %v7380_v0 }
  0xea   :  { %6691 = vmatpush3.bf16.msra.mxu0 %v7381_v2  ;;  %4235 = vmatprep.mubr.bf16.mxu0 %v7416_v47 }
  0xeb   :  { %6692 = vmatprep.subr.bf16.mxu0 %v7383_v4 }
  0xec   :  { %6673 = vmatpush3.bf16.msra.mxu1 %v7382_v3  ;;  %v7426_v3 = vld [vmem:[%s9403_s2 + $0x7e0] sm:$0xff]  }
  0xed   :  { %6674 = vmatprep.subr.bf16.mxu1 %v7384_v5  ;;  %v7427_v5 = vld [vmem:[%s9403_s2 + $0x810] sm:$0xff]  }
  0xee   :  { %6693 = vmatpush3.bf16.msra.mxu0 %v7385_v7 }
  0xef   :  { %6694 = vmatprep.subr.bf16.mxu0 %v7387_v12 }
  0xf0   :  { %6675 = vmatpush3.bf16.msra.mxu1 %v7386_v9 }
  0xf1   :  { %6676 = vmatprep.subr.bf16.mxu1 %v7388_v14  ;;  %v7431_v14 = vld [vmem:[%s9403_s2 + $0x818] sm:$0xff]  }
  0xf2   :  { %6695 = vmatpush3.bf16.msra.mxu0 %v7389_v16  ;;  %v7432_v16 = vld [vmem:[%s9403_s2 + $0x7a8] sm:$0xff]  }
  0xf3   :  { %6696 = vmatprep.subr.bf16.mxu0 %v7391_v19  ;;  %v7435_v19 = vld [vmem:[%s9403_s2 + $0x820] sm:$0xff]  }
  0xf4   :  { %6677 = vmatpush3.bf16.msra.mxu1 %v7390_v17  ;;  %v7433_v17 = vld [vmem:[%s9403_s2 + $0x860] sm:$0xff]  }
  0xf5   :  { %6678 = vmatprep.subr.bf16.mxu1 %v7392_v22  ;;  %v7438_v22 = vld [vmem:[%s9403_s2 + $0x7f8] sm:$0xff]  }
  0xf6   :  { %v6398_v6 = vpop.f32.mrb[0].mxu1  ;;  %6697 = vmatpush3.bf16.msra.mxu0 %v7393_v24  ;;  %v7440_v24 = vld [vmem:[%s9403_s2 + $0x7b8] sm:$0xff]  }
  0xf7   :  { %v6399_v8 = vpop.f32.mrb[1].mxu1  ;;  %6698 = vmatprep.subr.bf16.mxu0 %v7395_v28  ;;  %v7445_v28 = vld [vmem:[%s9403_s2 + $0x830] sm:$0xff]  }
  0xf8   :  { %v6400_v10 = vadd.f32 %v6399_v8, %v6398_v6  ;;  %v6401_v11 = vpop.f32.mrb[2].mxu1  ;;  %6679 = vmatpush3.bf16.msra.mxu1 %v7394_v27  ;;  %v7428_v8 = vld [vmem:[%s9403_s2 + $0x7a0] sm:$0xff]   ;;  %v7444_v27 = vld [vmem:[%s9403_s2 + $0x870] sm:$0xff]  }
  0xf9   :  { %v6402_v13 = vpop.f32.mrb[3].mxu1  ;;  %6680 = vmatprep.subr.bf16.mxu1 %v7396_v29  ;;  %v7446_v29 = vld [vmem:[%s9403_s2 + $0x8c0] sm:$0xff]  }
  0xfa   :  { %v6403_v15 = vadd.f32 %v6402_v13, %v6401_v11  ;;  %6699 = vmatpush3.bf16.msra.mxu0 %v7397_v30  ;;  %v7430_v13 = vld [vmem:[%s9403_s2 + $0x7e8] sm:$0xff]   ;;  %v7447_v30 = vld [vmem:[%s9403_s2 + $0x880] sm:$0xff]  }
  0xfb   :  { %6700 = vmatprep.subr.bf16.mxu0 %v7399_v32  ;;  %v7449_v32 = vld [vmem:[%s9403_s2 + $0x838] sm:$0xff]  }
  0xfc   :  { %v1004_v18 = vpop.f32.mrb[0].mxu0  ;;  %6681 = vmatpush3.bf16.msra.mxu1 %v7398_v31  ;;  %v7448_v31 = vld [vmem:[%s9403_s2 + $0x878] sm:$0xff]  }
  0xfd   :  { %v8575_v20 = vadd.f32 %v6400_v10, %v1004_v18  ;;  %v1006_v21 = vpop.f32.mrb[1].mxu0  ;;  %6682 = vmatprep.subr.bf16.mxu1 %v7400_v33  ;;  %v7429_v10 = vld [vmem:[%s9403_s2 + $0x858] sm:$0xff]   ;;  %v7434_v18 = vld [vmem:[%s9403_s2 + $0x7f0] sm:$0xff]   ;;  %v7450_v33 = vld [vmem:[%s9403_s2 + $0x8c8] sm:$0xff]  }
  0xfe   :  { %v1007_v23 = vpop.f32.mrb[2].mxu0  ;;  %6701 = vmatpush3.bf16.msra.mxu0 %v7401_v34  ;;  %v7437_v21 = vld [vmem:[%s9403_s2 + $0x868] sm:$0xff]  }
  0xff   :  { %v8583_v25 = vadd.f32 %v6403_v15, %v1007_v23  ;;  %v1009_v26 = vpop.f32.mrb[3].mxu0  ;;  %6702 = vmatprep.subr.bf16.mxu0 %v7406_v38  ;;  %v7439_v23 = vld [vmem:[%s9403_s2 + $0x828] sm:$0xff]  }
 0x100   :  { %6683 = vmatpush3.bf16.msra.mxu1 %v7402_v35  ;;  %v7443_v26 = vld [vmem:[%s9401_s0 + $0x7c] ss:$200 sps:$4 sm:$0xff]   ;;  %v7451_v34 = vld [vmem:[%s9403_s2 + $0x888] sm:$0xff]  }
 0x101   :  { %6712 = vmatprep.subr.bf16.mxu1 %v7408_v40  ;;  %v7452_v35 = vld [vmem:[%s9401_s0 + $0x80] ss:$200 sps:$4 sm:$0xff]  }
 0x102   :  { %6703 = vmatpush3.bf16.msra.mxu0 %v7407_v39  ;;  %v7456_v39 = vld [vmem:[%s9403_s2 + $0x8d0] sm:$0xff]  }
 0x103   :  { %4195 = vmatmul.mubr.bf16.vlgmr.msra.gmra.mrb[28].mxu1 %v7403_v36  ;;  %6704 = vmatprep.subr.bf16.mxu0 %v7410_v42  ;;  %v7454_v36 = vld [vmem:[%s9401_s0 + $0x84] ss:$200 sps:$4 sm:$0xff]  }
 0x104   :  { %6713 = vmatpush3.bf16.msra.mxu1 %v7409_v41  ;;  %4276 = vmatprep.mubr.bf16.mxu1 %v7443_v26  ;;  %v7457_v41 = vld [vmem:[%s9403_s2 + $0x900] sm:$0xff]   ;;  %v7490_v26 = vld [vmem:[%s9401_s0 + $0x90] ss:$200 sps:$4 sm:$0xff]  }
 0x105   :  { %6714 = vmatprep.subr.bf16.mxu1 %v7412_v44  ;;  %v7458_v44 = vld [vmem:[%s9403_s2 + $0x890] sm:$0xff]  }
 0x106   :  { %6705 = vmatpush3.bf16.msra.mxu0 %v7411_v43 }
 0x107   :  { %6734 = vmatprep.subr.bf16.mxu0 %v7417_v48 }
 0x108   :  { %6715 = vmatpush3.bf16.msra.mxu1 %v7413_v45 }
 0x109   :  { %4236 = vmatmul.mubr.bf16.vlgmr.msra.gmra.mrb[28].mxu0 %v7414_v46  ;;  %6716 = vmatprep.subr.bf16.mxu1 %v7418_v49  ;;  %v7459_v46 = vld [vmem:[%s9403_s2 + $0x948] sm:$0xff]   ;;  %v7460_v49 = vld [vmem:[%s9403_s2 + $0x8d8] sm:$0xff]  }
 0x10a   :  { %6735 = vmatpush3.bf16.msra.mxu0 %v7419_v50  ;;  %4317 = vmatprep.mubr.bf16.mxu0 %v7454_v36  ;;  %v7461_v50 = vld [vmem:[%s9403_s2 + $0x908] sm:$0xff]   ;;  %v7496_v36 = vld [vmem:[%s9403_s2 + $0x990] sm:$0xff]  }
 0x10b   :  { %6736 = vmatprep.subr.bf16.mxu0 %v7421_v54 }
 0x10c   :  { %6717 = vmatpush3.bf16.msra.mxu1 %v7420_v52 }
 0x10d   :  { %6718 = vmatprep.subr.bf16.mxu1 %v7422_v57 }
 0x10e   :  { %6737 = vmatpush3.bf16.msra.mxu0 %v7423_v59 }
 0x10f   :  { %6738 = vmatprep.subr.bf16.mxu0 %v7425_v63  ;;  %v7466_v63 = vld [vmem:[%s9403_s2 + $0x8a0] sm:$0xff]  }
 0x110   :  { %6719 = vmatpush3.bf16.msra.mxu1 %v7424_v62 }
 0x111   :  { %6720 = vmatprep.subr.bf16.mxu1 %v7426_v3  ;;  %v7468_v3 = vld [vmem:[%s9403_s2 + $0x8e8] sm:$0xff]  }
 0x112   :  { %6739 = vmatpush3.bf16.msra.mxu0 %v7427_v5  ;;  %v7470_v5 = vld [vmem:[%s9403_s2 + $0x8a8] sm:$0xff]  }
 0x113   :  { %6740 = vmatprep.subr.bf16.mxu0 %v7429_v10  ;;  %v7475_v10 = vld [vmem:[%s9403_s2 + $0x968] sm:$0xff]  }
 0x114   :  { %6721 = vmatpush3.bf16.msra.mxu1 %v7428_v8  ;;  %v7473_v8 = vld [vmem:[%s9403_s2 + $0x920] sm:$0xff]  }
 0x115   :  { %6722 = vmatprep.subr.bf16.mxu1 %v7430_v13  ;;  %v7478_v13 = vld [vmem:[%s9403_s2 + $0x8b8] sm:$0xff]  }
 0x116   :  { %v6420_v51 = vpop.f32.mrb[4].mxu1  ;;  %6741 = vmatpush3.bf16.msra.mxu0 %v7431_v14  ;;  %v7479_v14 = vld [vmem:[%s9401_s0 + $0x88] ss:$200 sps:$4 sm:$0xff]  }
 0x117   :  { %v6421_v53 = vpop.f32.mrb[5].mxu1  ;;  %6742 = vmatprep.subr.bf16.mxu0 %v7433_v17  ;;  %v7483_v17 = vld [vmem:[%s9403_s2 + $0x930] sm:$0xff]  }
 0x118   :  { %v6422_v55 = vadd.f32 %v6421_v53, %v6420_v51  ;;  %v6423_v56 = vpop.f32.mrb[6].mxu1  ;;  %6723 = vmatpush3.bf16.msra.mxu1 %v7432_v16  ;;  %v7462_v53 = vld [vmem:[%s9403_s2 + $0x898] sm:$0xff]   ;;  %v7482_v16 = vld [vmem:[%s9403_s2 + $0x970] sm:$0xff]  }
 0x119   :  { %v6424_v58 = vpop.f32.mrb[7].mxu1  ;;  %6724 = vmatprep.subr.bf16.mxu1 %v7434_v18  ;;  %v7484_v18 = vld [vmem:[%s9403_s2 + $0x9c0] sm:$0xff]  }
 0x11a   :  { %v3705_v60 = vadd.f32 %v6422_v55, %v8575_v20  ;;  %v6425_v61 = vadd.f32 %v6424_v58, %v6423_v56  ;;  %v7436_v20 = vld [vmem:[%s9403_s2 + $0x7b0] sm:$0xff]   ;;  %6743 = vmatpush3.bf16.msra.mxu0 %v7435_v19  ;;  %v7464_v58 = vld [vmem:[%s9403_s2 + $0x8e0] sm:$0xff]  }
 0x11b   :  { %6744 = vmatprep.subr.bf16.mxu0 %v7437_v21  ;;  %v7463_v55 = vld [vmem:[%s9403_s2 + $0x950] sm:$0xff]   ;;  %v7485_v19 = vld [vmem:[%s9403_s2 + $0x980] sm:$0xff]   ;;  %v7487_v21 = vld [vmem:[%s9403_s2 + $0x938] sm:$0xff]  }
 0x11c   :  { %v3708_v0 = vadd.f32 %v6425_v61, %v8583_v25  ;;  %v6442_v2 = vpop.f32.mrb[4].mxu0  ;;  %6725 = vmatpush3.bf16.msra.mxu1 %v7436_v20  ;;  %v7441_v25 = vld [vmem:[%s9401_s0 + $0x78] ss:$200 sps:$4 sm:$0xff]  }
 0x11d   :  { %v6443_v4 = vpop.f32.mrb[5].mxu0  ;;  %6726 = vmatprep.subr.bf16.mxu1 %v7438_v22  ;;  %v7486_v20 = vld [vmem:[%s9403_s2 + $0x978] sm:$0xff]   ;;  %v7488_v22 = vld [vmem:[%s9403_s2 + $0x9c8] sm:$0xff]  }
 0x11e   :  { %v6444_v6 = vadd.f32 %v6443_v4, %v6442_v2  ;;  %v6445_v7 = vpop.f32.mrb[6].mxu0  ;;  %6745 = vmatpush3.bf16.msra.mxu0 %v7439_v23  ;;  %v7469_v4 = vld [vmem:[%s9403_s2 + $0x918] sm:$0xff]  }
 0x11f   :  { %v6446_v9 = vpop.f32.mrb[7].mxu0  ;;  %6746 = vmatprep.subr.bf16.mxu0 %v7444_v27  ;;  %v7492_v27 = vld [vmem:[%s9401_s0 + $0x94] ss:$200 sps:$4 sm:$0xff]  }
 0x120   :  { %v8689_v11 = vadd.f32 %v6444_v6, %v3705_v60  ;;  %v6447_v12 = vadd.f32 %v6446_v9, %v6445_v7  ;;  %6727 = vmatpush3.bf16.msra.mxu1 %v7440_v24  ;;  %v7465_v60 = vld [vmem:[%s9403_s2 + $0x910] sm:$0xff]   ;;  %v7471_v6 = vld [vmem:[%s9403_s2 + $0x960] sm:$0xff]   ;;  %v7489_v24 = vld [vmem:[%s9403_s2 + $0x988] sm:$0xff]  }
 0x121   :  { %6756 = vmatprep.subr.bf16.mxu1 %v7446_v29  ;;  %v7472_v7 = vld [vmem:[%s9403_s2 + $0x8f0] sm:$0xff]   ;;  %v7493_v29 = vld [vmem:[%s9403_s2 + $0xa40] sm:$0xff]  }
 0x122   :  { %v8697_v15 = vadd.f32 %v6447_v12, %v3708_v0  ;;  %6747 = vmatpush3.bf16.msra.mxu0 %v7445_v28  ;;  %v7467_v0 = vld [vmem:[%s9403_s2 + $0x958] sm:$0xff]   ;;  %v7474_v9 = vld [vmem:[%s9403_s2 + $0x8b0] sm:$0xff]   ;;  %v7477_v12 = vld [vmem:[%s9403_s2 + $0x928] sm:$0xff]  }
 0x123   :  { %4277 = vmatmul.mubr.bf16.vlgmr.msra.gmra.mrb[32].mxu1 %v7441_v25  ;;  %6748 = vmatprep.subr.bf16.mxu0 %v7448_v31  ;;  %v7494_v31 = vld [vmem:[%s9403_s2 + $0x9d0] sm:$0xff]  }
 0x124   :  { %6757 = vmatpush3.bf16.msra.mxu1 %v7447_v30 }
 0x125   :  { %6758 = vmatprep.subr.bf16.mxu1 %v7450_v33 }
 0x126   :  { %6749 = vmatpush3.bf16.msra.mxu0 %v7449_v32 }
 0x127   :  { %6778 = vmatprep.subr.bf16.mxu0 %v7455_v37  ;;  %v7497_v37 = vld [vmem:[%s9403_s2 + $0xa48] sm:$0xff]  }
 0x128   :  { %6759 = vmatpush3.bf16.msra.mxu1 %v7451_v34  ;;  %v7495_v34 = vld [vmem:[%s9403_s2 + $0xa00] sm:$0xff]  }
 0x129   :  { %4318 = vmatmul.mubr.bf16.vlgmr.msra.gmra.mrb[32].mxu0 %v7452_v35  ;;  %6760 = vmatprep.subr.bf16.mxu1 %v7456_v39  ;;  %v7498_v39 = vld [vmem:[%s9403_s2 + $0x9d8] sm:$0xff]  }
 0x12a   :  { %6779 = vmatpush3.bf16.msra.mxu0 %v7457_v41  ;;  %4399 = vmatprep.mubr.bf16.mxu0 %v7492_v27  ;;  %v7499_v41 = vld [vmem:[%s9403_s2 + $0xa08] sm:$0xff]  }
 0x12b   :  { %6780 = vmatprep.subr.bf16.mxu0 %v7459_v46  ;;  %v7501_v46 = vld [vmem:[%s9403_s2 + $0xa50] sm:$0xff]   ;;  %v7535_v27 = vld [vmem:[%s9403_s2 + $0xb48] sm:$0xff]  }
 0x12c   :  { %6761 = vmatpush3.bf16.msra.mxu1 %v7458_v44 }
 0x12d   :  { %6762 = vmatprep.subr.bf16.mxu1 %v7460_v49 }
 0x12e   :  { %6781 = vmatpush3.bf16.msra.mxu0 %v7461_v50 }
 0x12f   :  { %6782 = vmatprep.subr.bf16.mxu0 %v7463_v55  ;;  %v7506_v55 = vld [vmem:[%s9403_s2 + $0x9e8] sm:$0xff]  }
 0x130   :  { %6763 = vmatpush3.bf16.msra.mxu1 %v7462_v53 }
 0x131   :  { %6764 = vmatprep.subr.bf16.mxu1 %v7464_v58  ;;  %v7509_v58 = vld [vmem:[%s9403_s2 + $0xa60] sm:$0xff]  }
 0x132   :  { %6783 = vmatpush3.bf16.msra.mxu0 %v7465_v60  ;;  %v7511_v60 = vld [vmem:[%s9403_s2 + $0xa20] sm:$0xff]  }
 0x133   :  { %6784 = vmatprep.subr.bf16.mxu0 %v7467_v0  ;;  %v7515_v0 = vld [vmem:[%s9403_s2 + $0xa28] sm:$0xff]  }
 0x134   :  { %6765 = vmatpush3.bf16.msra.mxu1 %v7466_v63  ;;  %v7514_v63 = vld [vmem:[%s9403_s2 + $0x9f8] sm:$0xff]  }
 0x135   :  { %6766 = vmatprep.subr.bf16.mxu1 %v7468_v3  ;;  %v7517_v3 = vld [vmem:[%s9401_s0 + $0x98] ss:$200 sps:$4 sm:$0xff]  }
 0x136   :  { %v6464_v38 = vpop.f32.mrb[8].mxu1  ;;  %6785 = vmatpush3.bf16.msra.mxu0 %v7469_v4  ;;  %v7519_v4 = vld [vmem:[%s9401_s0 + $0x9c] ss:$200 sps:$4 sm:$0xff]  }
 0x137   :  { %v6465_v40 = vpop.f32.mrb[9].mxu1  ;;  %6786 = vmatprep.subr.bf16.mxu0 %v7471_v6  ;;  %v7521_v6 = vld [vmem:[%s9403_s2 + $0xa30] sm:$0xff]  }
 0x138   :  { %v6466_v42 = vadd.f32 %v6465_v40, %v6464_v38  ;;  %v6467_v43 = vpop.f32.mrb[10].mxu1  ;;  %6767 = vmatpush3.bf16.msra.mxu1 %v7470_v5  ;;  %v7520_v5 = vld [vmem:[%s9403_s2 + $0xa70] sm:$0xff]  }
 0x139   :  { %v6468_v45 = vpop.f32.mrb[11].mxu1  ;;  %6768 = vmatprep.subr.bf16.mxu1 %v7472_v7  ;;  %v7522_v7 = vld [vmem:[%s9403_s2 + $0xac0] sm:$0xff]  }
 0x13a   :  { %v3787_v47 = vadd.f32 %v6466_v42, %v8689_v11  ;;  %v6469_v48 = vadd.f32 %v6468_v45, %v6467_v43  ;;  %6787 = vmatpush3.bf16.msra.mxu0 %v7473_v8  ;;  %v7476_v11 = vld [vmem:[%s9403_s2 + $0x8f8] sm:$0xff]   ;;  %v7523_v8 = vld [vmem:[%s9403_s2 + $0xa80] sm:$0xff]  }
 0x13b   :  { %6788 = vmatprep.subr.bf16.mxu0 %v7475_v10  ;;  %v7500_v43 = vld [vmem:[%s9403_s2 + $0x998] sm:$0xff]  }
 0x13c   :  { %v3790_v51 = vadd.f32 %v6469_v48, %v8697_v15  ;;  %v6486_v52 = vpop.f32.mrb[8].mxu0  ;;  %6769 = vmatpush3.bf16.msra.mxu1 %v7474_v9  ;;  %v7481_v15 = vld [vmem:[%s9401_s0 + $0x8c] ss:$200 sps:$4 sm:$0xff]   ;;  %v7502_v48 = vld [vmem:[%s9403_s2 + $0x9e0] sm:$0xff]   ;;  %v7524_v9 = vld [vmem:[%s9403_s2 + $0xa78] sm:$0xff]  }
 0x13d   :  { %v6487_v54 = vpop.f32.mrb[9].mxu0  ;;  %6770 = vmatprep.subr.bf16.mxu1 %v7476_v11  ;;  %4358 = vmatprep.mubr.bf16.mxu1 %v7481_v15  ;;  %v7525_v10 = vld [vmem:[%s9403_s2 + $0xa38] sm:$0xff]   ;;  %v7526_v11 = vld [vmem:[%s9403_s2 + $0xac8] sm:$0xff]  }
 0x13e   :  { %v6488_v56 = vadd.f32 %v6487_v54, %v6486_v52  ;;  %v6489_v57 = vpop.f32.mrb[10].mxu0  ;;  %6789 = vmatpush3.bf16.msra.mxu0 %v7477_v12  ;;  %v7504_v52 = vld [vmem:[%s9403_s2 + $0x9a0] sm:$0xff]   ;;  %v7505_v54 = vld [vmem:[%s9403_s2 + $0xa58] sm:$0xff]  }
 0x13f   :  { %v6490_v59 = vpop.f32.mrb[11].mxu0  ;;  %6790 = vmatprep.subr.bf16.mxu0 %v7482_v16  ;;  %v7528_v15 = vld [vmem:[%s9401_s0 + $0xa0] ss:$200 sps:$4 sm:$0xff]  }
 0x140   :  { %v3828_v61 = vadd.f32 %v6488_v56, %v3787_v47  ;;  %v6491_v62 = vadd.f32 %v6490_v59, %v6489_v57  ;;  %6771 = vmatpush3.bf16.msra.mxu1 %v7478_v13  ;;  %v7507_v56 = vld [vmem:[%s9403_s2 + $0xa18] sm:$0xff]   ;;  %v7508_v57 = vld [vmem:[%s9403_s2 + $0x9a8] sm:$0xff]   ;;  %v7510_v59 = vld [vmem:[%s9403_s2 + $0x9f0] sm:$0xff]  }
 0x141   :  { %6800 = vmatprep.subr.bf16.mxu1 %v7484_v18  ;;  %v7527_v13 = vld [vmem:[%s9403_s2 + $0xa88] sm:$0xff]  }
 0x142   :  { %v8803_v2 = vadd.f32 %v6491_v62, %v3790_v51  ;;  %6791 = vmatpush3.bf16.msra.mxu0 %v7483_v17  ;;  %v7503_v51 = vld [vmem:[%s9403_s2 + $0xa10] sm:$0xff]   ;;  %v7513_v62 = vld [vmem:[%s9403_s2 + $0xa68] sm:$0xff]  }
 0x143   :  { %4359 = vmatmul.mubr.bf16.vlgmr.msra.gmra.mrb[36].mxu1 %v7479_v14  ;;  %6792 = vmatprep.subr.bf16.mxu0 %v7486_v20  ;;  %v7530_v18 = vld [vmem:[%s9401_s0 + $0xa4] ss:$200 sps:$4 sm:$0xff]  }
 0x144   :  { %6801 = vmatpush3.bf16.msra.mxu1 %v7485_v19  ;;  %4440 = vmatprep.mubr.bf16.mxu1 %v7519_v4  ;;  %v7531_v19 = vld [vmem:[%s9403_s2 + $0xb40] sm:$0xff]   ;;  %v7566_v4 = vld [vmem:[%s9401_s0 + $0xb0] ss:$200 sps:$4 sm:$0xff]  }
 0x145   :  { %6802 = vmatprep.subr.bf16.mxu1 %v7488_v22  ;;  %v7532_v22 = vld [vmem:[%s9403_s2 + $0xad0] sm:$0xff]  }
 0x146   :  { %6793 = vmatpush3.bf16.msra.mxu0 %v7487_v21 }
 0x147   :  { %6822 = vmatprep.subr.bf16.mxu0 %v7493_v29 }
 0x148   :  { %6803 = vmatpush3.bf16.msra.mxu1 %v7489_v24  ;;  %v7533_v24 = vld [vmem:[%s9403_s2 + $0xb00] sm:$0xff]  }
 0x149   :  { %4400 = vmatmul.mubr.bf16.vlgmr.msra.gmra.mrb[36].mxu0 %v7490_v26  ;;  %6804 = vmatprep.subr.bf16.mxu1 %v7494_v31 }
 0x14a   :  { %6823 = vmatpush3.bf16.msra.mxu0 %v7495_v34  ;;  %4481 = vmatprep.mubr.bf16.mxu0 %v7530_v18 }
 0x14b   :  { %6824 = vmatprep.subr.bf16.mxu0 %v7497_v37  ;;  %v7540_v37 = vld [vmem:[%s9403_s2 + $0xae0] sm:$0xff]  }
 0x14c   :  { %6805 = vmatpush3.bf16.msra.mxu1 %v7496_v36 }
 0x14d   :  { %6806 = vmatprep.subr.bf16.mxu1 %v7498_v39 }
 0x14e   :  { %6825 = vmatpush3.bf16.msra.mxu0 %v7499_v41  ;;  %v7542_v41 = vld [vmem:[%s9403_s2 + $0xaa0] sm:$0xff]  }
 0x14f   :  { %6826 = vmatprep.subr.bf16.mxu0 %v7501_v46  ;;  %v7546_v46 = vld [vmem:[%s9403_s2 + $0xaa8] sm:$0xff]  }
 0x150   :  { %6807 = vmatpush3.bf16.msra.mxu1 %v7500_v43  ;;  %v7543_v43 = vld [vmem:[%s9403_s2 + $0xb58] sm:$0xff]  }
 0x151   :  { %6808 = vmatprep.subr.bf16.mxu1 %v7502_v48  ;;  %v7548_v48 = vld [vmem:[%s9403_s2 + $0xaf0] sm:$0xff]  }
 0x152   :  { %6827 = vmatpush3.bf16.msra.mxu0 %v7503_v51  ;;  %v7551_v51 = vld [vmem:[%s9403_s2 + $0xb68] sm:$0xff]  }
 0x153   :  { %6828 = vmatprep.subr.bf16.mxu0 %v7505_v54  ;;  %v7554_v54 = vld [vmem:[%s9403_s2 + $0xab8] sm:$0xff]  }
 0x154   :  { %6809 = vmatpush3.bf16.msra.mxu1 %v7504_v52  ;;  %v7552_v52 = vld [vmem:[%s9403_s2 + $0xaf8] sm:$0xff]  }
 0x155   :  { %6810 = vmatprep.subr.bf16.mxu1 %v7506_v55  ;;  %v7555_v55 = vld [vmem:[%s9401_s0 + $0xa8] ss:$200 sps:$4 sm:$0xff]  }
 0x156   :  { %v6508_v23 = vpop.f32.mrb[12].mxu1  ;;  %6829 = vmatpush3.bf16.msra.mxu0 %v7507_v56  ;;  %v7557_v56 = vld [vmem:[%s9401_s0 + $0xac] ss:$200 sps:$4 sm:$0xff]  }
 0x157   :  { %v6509_v25 = vpop.f32.mrb[13].mxu1  ;;  %6830 = vmatprep.subr.bf16.mxu0 %v7509_v58  ;;  %v7559_v58 = vld [vmem:[%s9403_s2 + $0xb30] sm:$0xff]  }
 0x158   :  { %v6510_v28 = vadd.f32 %v6509_v25, %v6508_v23  ;;  %v6511_v30 = vpop.f32.mrb[14].mxu1  ;;  %6811 = vmatpush3.bf16.msra.mxu1 %v7508_v57  ;;  %v7534_v25 = vld [vmem:[%s9403_s2 + $0xa90] sm:$0xff]  }
 0x159   :  { %v6512_v33 = vpop.f32.mrb[15].mxu1  ;;  %6812 = vmatprep.subr.bf16.mxu1 %v7510_v59  ;;  %v7558_v57 = vld [vmem:[%s9403_s2 + $0xb70] sm:$0xff]   ;;  %v7560_v59 = vld [vmem:[%s9403_s2 + $0xbc0] sm:$0xff]  }
 0x15a   :  { %v3869_v32 = vadd.f32 %v6510_v28, %v3828_v61  ;;  %v6513_v35 = vadd.f32 %v6512_v33, %v6511_v30  ;;  %v7512_v61 = vld [vmem:[%s9403_s2 + $0x9b0] sm:$0xff]   ;;  %6831 = vmatpush3.bf16.msra.mxu0 %v7511_v60  ;;  %v7536_v28 = vld [vmem:[%s9403_s2 + $0xad8] sm:$0xff]   ;;  %v7537_v30 = vld [vmem:[%s9403_s2 + $0xb08] sm:$0xff]  }
 0x15b   :  { %6832 = vmatprep.subr.bf16.mxu0 %v7513_v62  ;;  %v7561_v60 = vld [vmem:[%s9403_s2 + $0xb80] sm:$0xff]   ;;  %v7563_v62 = vld [vmem:[%s9403_s2 + $0xb38] sm:$0xff]  }
 0x15c   :  { %v3872_v38 = vadd.f32 %v6513_v35, %v8803_v2  ;;  %v6530_v40 = vpop.f32.mrb[12].mxu0  ;;  %6813 = vmatpush3.bf16.msra.mxu1 %v7512_v61  ;;  %v7516_v2 = vld [vmem:[%s9403_s2 + $0x9b8] sm:$0xff]   ;;  %v7539_v35 = vld [vmem:[%s9403_s2 + $0xb50] sm:$0xff]  }
 0x15d   :  { %v6531_v42 = vpop.f32.mrb[13].mxu0  ;;  %6814 = vmatprep.subr.bf16.mxu1 %v7514_v63  ;;  %v7562_v61 = vld [vmem:[%s9403_s2 + $0xb78] sm:$0xff]   ;;  %v7564_v63 = vld [vmem:[%s9403_s2 + $0xbc8] sm:$0xff]  }
 0x15e   :  { %v6532_v44 = vadd.f32 %v6531_v42, %v6530_v40  ;;  %v6533_v45 = vpop.f32.mrb[14].mxu0  ;;  %6833 = vmatpush3.bf16.msra.mxu0 %v7515_v0  ;;  %v7541_v40 = vld [vmem:[%s9403_s2 + $0xb10] sm:$0xff]  }
 0x15f   :  { %v6534_v47 = vpop.f32.mrb[15].mxu0  ;;  %6834 = vmatprep.subr.bf16.mxu0 %v7520_v5  ;;  %v7568_v5 = vld [vmem:[%s9401_s0 + $0xb4] ss:$200 sps:$4 sm:$0xff]  }
 0x160   :  { %v3910_v49 = vadd.f32 %v6532_v44, %v3869_v32  ;;  %v6535_v50 = vadd.f32 %v6534_v47, %v6533_v45  ;;  %6815 = vmatpush3.bf16.msra.mxu1 %v7516_v2  ;;  %v7538_v32 = vld [vmem:[%s9403_s2 + $0xa98] sm:$0xff]   ;;  %v7544_v44 = vld [vmem:[%s9403_s2 + $0xae8] sm:$0xff]   ;;  %v7547_v47 = vld [vmem:[%s9403_s2 + $0xb60] sm:$0xff]  }
 0x161   :  { %6844 = vmatprep.subr.bf16.mxu1 %v7522_v7  ;;  %v7545_v45 = vld [vmem:[%s9403_s2 + $0xb18] sm:$0xff]   ;;  %v7565_v2 = vld [vmem:[%s9403_s2 + $0xb88] sm:$0xff]  }
 0x162   :  { %v8911_v53 = vadd.f32 %v6535_v50, %v3872_v38  ;;  %6835 = vmatpush3.bf16.msra.mxu0 %v7521_v6  ;;  %v7550_v50 = vld [vmem:[%s9403_s2 + $0xab0] sm:$0xff]  }
 0x163   :  { %4441 = vmatmul.mubr.bf16.vlgmr.msra.gmra.mrb[40].mxu1 %v7517_v3  ;;  %6836 = vmatprep.subr.bf16.mxu0 %v7524_v9 }
 0x164   :  { %6845 = vmatpush3.bf16.msra.mxu1 %v7523_v8  ;;  %4522 = vmatprep.mubr.bf16.mxu1 %v7557_v56  ;;  %v7569_v8 = vld [vmem:[%s9403_s2 + $0xbd0] sm:$0xff]  }
 0x165   :  { %6846 = vmatprep.subr.bf16.mxu1 %v7526_v11 }
 0x166   :  { %6837 = vmatpush3.bf16.msra.mxu0 %v7525_v10  ;;  %v7570_v10 = vld [vmem:[%s9403_s2 + $0xc00] sm:$0xff]  }
 0x167   :  { %6866 = vmatprep.subr.bf16.mxu0 %v7531_v19  ;;  %v7575_v19 = vld [vmem:[%s9403_s2 + $0xbe0] sm:$0xff]  }
 0x168   :  { %6847 = vmatpush3.bf16.msra.mxu1 %v7527_v13  ;;  %v7571_v13 = vld [vmem:[%s9403_s2 + $0xb90] sm:$0xff]  }
 0x169   :  { %4482 = vmatmul.mubr.bf16.vlgmr.msra.gmra.mrb[40].mxu0 %v7528_v15  ;;  %6848 = vmatprep.subr.bf16.mxu1 %v7532_v22 }
 0x16a   :  { %6867 = vmatpush3.bf16.msra.mxu0 %v7533_v24  ;;  %4563 = vmatprep.mubr.bf16.mxu0 %v7568_v5  ;;  %v7577_v24 = vld [vmem:[%s9403_s2 + $0xba0] sm:$0xff]  }
 0x16b   :  { %6868 = vmatprep.subr.bf16.mxu0 %v7535_v27 }
 0x16c   :  { %6849 = vmatpush3.bf16.msra.mxu1 %v7534_v25 }
 0x16d   :  { %6850 = vmatprep.subr.bf16.mxu1 %v7536_v28 }
 0x16e   :  { %6869 = vmatpush3.bf16.msra.mxu0 %v7537_v30 }
 0x16f   :  { %6870 = vmatprep.subr.bf16.mxu0 %v7539_v35  ;;  %v7584_v35 = vld [vmem:[%s9403_s2 + $0xbf8] sm:$0xff]  }
 0x170   :  { %6851 = vmatpush3.bf16.msra.mxu1 %v7538_v32  ;;  %v7581_v32 = vld [vmem:[%s9403_s2 + $0xbf0] sm:$0xff]  }
 0x171   :  { %6852 = vmatprep.subr.bf16.mxu1 %v7540_v37  ;;  %v7589_v37 = vld [vmem:[%s9401_s0 + $0xbc] ss:$200 sps:$4 sm:$0xff]  }
 0x172   :  { %6871 = vmatpush3.bf16.msra.mxu0 %v7541_v40  ;;  %v7590_v40 = vld [vmem:[%s9403_s2 + $0xc30] sm:$0xff]  }
 0x173   :  { %6872 = vmatprep.subr.bf16.mxu0 %v7543_v43  ;;  %v9177_v43 = vld [vmem:[%s9406_s5] sm:$0xff]  }
 0x174   :  { %6853 = vmatpush3.bf16.msra.mxu1 %v7542_v41  ;;  %v7594_v41 = vld [vmem:[%s9401_s0 + $0xc4] ss:$200 sps:$4 sm:$0xff]  }
 0x175   :  { %6854 = vmatprep.subr.bf16.mxu1 %v7544_v44 }
 0x176   :  { %v6552_v12 = vpop.f32.mrb[16].mxu1  ;;  %6873 = vmatpush3.bf16.msra.mxu0 %v7545_v45 }
 0x177   :  { %v6553_v14 = vpop.f32.mrb[17].mxu1  ;;  %6874 = vmatprep.subr.bf16.mxu0 %v7547_v47 }
 0x178   :  { %v6554_v16 = vadd.f32 %v6553_v14, %v6552_v12  ;;  %v6555_v17 = vpop.f32.mrb[18].mxu1  ;;  %6855 = vmatpush3.bf16.msra.mxu1 %v7546_v46  ;;  %v7572_v14 = vld [vmem:[%s9403_s2 + $0xbd8] sm:$0xff]  }
 0x179   :  { %v6556_v21 = vpop.f32.mrb[19].mxu1  ;;  %6856 = vmatprep.subr.bf16.mxu1 %v7548_v48 }
 0x17a   :  { %v3951_v20 = vadd.f32 %v6554_v16, %v3910_v49  ;;  %v6557_v23 = vadd.f32 %v6556_v21, %v6555_v17  ;;  %v7549_v49 = vld [vmem:[%s9403_s2 + $0xb20] sm:$0xff]   ;;  %v7573_v16 = vld [vmem:[%s9403_s2 + $0xc08] sm:$0xff]   ;;  %v7574_v17 = vld [vmem:[%s9403_s2 + $0xb98] sm:$0xff]  }
 0x17b   :  { %6875 = vmatpush3.bf16.msra.mxu0 %v7549_v49  ;;  %v7576_v21 = vld [vmem:[%s9403_s2 + $0xc10] sm:$0xff]  }
 0x17c   :  { %v3954_v26 = vadd.f32 %v6557_v23, %v8911_v53  ;;  %v6574_v29 = vpop.f32.mrb[16].mxu0  ;;  %6857 = vmatpush3.bf16.msra.mxu1 %v7550_v50  ;;  %6876 = vmatprep.subr.bf16.mxu0 %v7551_v51  ;;  %v7553_v53 = vld [vmem:[%s9403_s2 + $0xb28] sm:$0xff]  }
 0x17d   :  { %v6575_v31 = vpop.f32.mrb[17].mxu0  ;;  %6858 = vmatprep.subr.bf16.mxu1 %v7552_v52 }
 0x17e   :  { %v6576_v33 = vadd.f32 %v6575_v31, %v6574_v29  ;;  %v6577_v34 = vpop.f32.mrb[18].mxu0  ;;  %v7579_v29 = vld [vmem:[%s9403_s2 + $0xc18] sm:$0xff]   ;;  %v7580_v31 = vld [vmem:[%s9403_s2 + $0xba8] sm:$0xff]  }
 0x17f   :  { %v6578_v36 = vpop.f32.mrb[19].mxu0  ;;  %6877 = vmatpush3.bf16.msra.mxu0 %v7553_v53 }
 0x180   :  { %v9016_v38 = vadd.f32 %v6576_v33, %v3951_v20  ;;  %v6579_v39 = vadd.f32 %v6578_v36, %v6577_v34  ;;  %6859 = vmatpush3.bf16.msra.mxu1 %v7554_v54  ;;  %6878 = vmatprep.subr.bf16.mxu0 %v7558_v57  ;;  %v7582_v33 = vld [vmem:[%s9403_s2 + $0xc20] sm:$0xff]   ;;  %v7583_v34 = vld [vmem:[%s9403_s2 + $0xbb0] sm:$0xff]   ;;  %v7585_v36 = vld [vmem:[%s9403_s2 + $0xc28] sm:$0xff]  }
 0x181   :  { %6888 = vmatprep.subr.bf16.mxu1 %v7560_v59 }
 0x182   :  { %v9024_v42 = vadd.f32 %v6579_v39, %v3954_v26  ;;  %v7578_v26 = vld [vmem:[%s9403_s2 + $0xbe8] sm:$0xff]   ;;  %v7587_v39 = vld [vmem:[%s9401_s0 + $0xb8] ss:$200 sps:$4 sm:$0xff]  }
 0x183   :  { %4523 = vmatmul.mubr.bf16.vlgmr.msra.gmra.mrb[44].mxu1 %v7555_v55  ;;  %6879 = vmatpush3.bf16.msra.mxu0 %v7559_v58 }
 0x184   :  { %6889 = vmatpush3.bf16.msra.mxu1 %v7561_v60  ;;  %6880 = vmatprep.subr.bf16.mxu0 %v7562_v61 }
 0x185   :  { %6890 = vmatprep.subr.bf16.mxu1 %v7564_v63  ;;  %4604 = vmatprep.mubr.bf16.mxu1 %v7589_v37 }
 0x187   :  { %6881 = vmatpush3.bf16.msra.mxu0 %v7563_v62 }
 0x188   :  { %4613 = vmatprep.subr.bf16.mxu0 %v7717_v1  ;;  %6891 = vmatpush3.bf16.msra.mxu1 %v7565_v2 }
 0x189   :  { %6892 = vmatprep.subr.bf16.mxu1 %v7569_v8 }
 0x18a   :  { %4564 = vmatmul.mubr.bf16.vlgmr.msra.gmra.mrb[44].mxu0 %v7566_v4 }
 0x18b   :  { %4614 = vmatpush1.bf16.msra.mxu0 %v7570_v10 }
 0x18c   :  { %6893 = vmatpush3.bf16.msra.mxu1 %v7571_v13  ;;  %4615 = vmatprep.subr.bf16.mxu0 %v7717_v1 }
 0x18d   :  { %6894 = vmatprep.subr.bf16.mxu1 %v7572_v14 }
 0x18f   :  { %4616 = vmatpush1.bf16.msra.mxu0 %v7573_v16 }
 0x190   :  { %6895 = vmatpush3.bf16.msra.mxu1 %v7574_v17  ;;  %4617 = vmatprep.subr.bf16.mxu0 %v7717_v1 }
 0x191   :  { %6896 = vmatprep.subr.bf16.mxu1 %v7575_v19 }
 0x193   :  { %4618 = vmatpush1.bf16.msra.mxu0 %v7576_v21 }
 0x194   :  { %6897 = vmatpush3.bf16.msra.mxu1 %v7577_v24  ;;  %4619 = vmatprep.subr.bf16.mxu0 %v7717_v1 }
 0x195   :  { %6898 = vmatprep.subr.bf16.mxu1 %v7578_v26 }
 0x196   :  { %v6596_v0 = vpop.f32.mrb[20].mxu1 }
 0x197   :  { %v6597_v3 = vpop.f32.mrb[21].mxu1  ;;  %4620 = vmatpush1.bf16.msra.mxu0 %v7579_v29 }
 0x198   :  { %v6598_v6 = vadd.f32 %v6597_v3, %v6596_v0  ;;  %v6599_v7 = vpop.f32.mrb[22].mxu1  ;;  %6899 = vmatpush3.bf16.msra.mxu1 %v7580_v31  ;;  %4621 = vmatprep.subr.bf16.mxu0 %v7717_v1 }
 0x199   :  { %v6600_v9 = vpop.f32.mrb[23].mxu1  ;;  %6900 = vmatprep.subr.bf16.mxu1 %v7581_v32 }
 0x19a   :  { %v4033_v11 = vadd.f32 %v6598_v6, %v9016_v38  ;;  %v6601_v12 = vadd.f32 %v6600_v9, %v6599_v7  ;;  %v7586_v38 = vld [vmem:[%s9403_s2 + $0xbb8] sm:$0xff]  }
 0x19b   :  { %4622 = vmatpush1.bf16.msra.mxu0 %v7582_v33 }
 0x19c   :  { %v4036_v15 = vadd.f32 %v6601_v12, %v9024_v42  ;;  %v6618_v18 = vpop.f32.mrb[20].mxu0  ;;  %6901 = vmatpush3.bf16.msra.mxu1 %v7583_v34  ;;  %4623 = vmatprep.subr.bf16.mxu0 %v7717_v1  ;;  %v7718_v42 = vmov 0.0|0.0  }
 0x19d   :  { %v6619_v20 = vpop.f32.mrb[21].mxu0  ;;  %6902 = vmatprep.subr.bf16.mxu1 %v7584_v35 }
 0x19e   :  { %v6620_v22 = vadd.f32 %v6619_v20, %v6618_v18  ;;  %v6621_v23 = vpop.f32.mrb[22].mxu0 }
 0x19f   :  { %v6622_v25 = vpop.f32.mrb[23].mxu0  ;;  %4624 = vmatpush1.bf16.msra.mxu0 %v7585_v36 }
 0x1a0   :  { %v4074_v27 = vadd.f32 %v6620_v22, %v4033_v11  ;;  %v6623_v28 = vadd.f32 %v6622_v25, %v6621_v23  ;;  %6903 = vmatpush3.bf16.msra.mxu1 %v7586_v38  ;;  %4625 = vmatprep.subr.bf16.mxu0 %v7717_v1 }
 0x1a1   :  { %7054 = vmatprep.subr.bf16.mxu1 %v7718_v42 }
 0x1a2   :  { %v4077_v30 = vadd.f32 %v6623_v28, %v4036_v15 }
 0x1a3   :  { %14 = vsyncpa [#allocation3], 0  ;;  %6336 = vmatprep.mubr.msk.bf16.mxu0 %vm962_vm0, %v7594_v41  ;;  %4605 = vmatmul.mubr.bf16.vlgmr.msra.gmra.mrb[48].mxu1 %v7587_v39  ;;  %v7591_v44 = vld [vmem:[%s9403_s2 + $0xc38] sm:$0xff]   ;;  %v9189_v45 = vld [vmem:[%s9406_s5 + $0x8] sm:$0xff]   ;;  %vm7719_vm2 = vmmov 0   ;;  %v7720_v46 = vmov 0.0  }
 0x1a4   :  { %4626 = vmatpush1.bf16.msra.mxu0 %v7590_v40  ;;  %7056 = vmatpush3.bf16.msra.mxu1 %v9177_v43  ;;  %v7592_v47 = vld [vmem:[%s9403_s2 + $0xc40] sm:$0xff]   ;;  %v7593_v49 = vld [vmem:[%s9403_s2 + $0xc48] sm:$0x3f]   ;;  %s7721_s10 = smov 64   ;;  %vm4809_vm3 = vcmask 1041409   ;;  %vm4678_vm4 = vcmask 261120  }
 0x1a5   :  { %4627 = vmatprep.subr.bf16.mxu0 %v7717_v1  ;;  %7057 = vmatprep.subr.bf16.mxu1 %v7718_v42  ;;  %v3627_v56 = vsel %vm966_vm1, %v7593_v49, 0  ;;  %v7596_v58 = vld [vmem:[%s9401_s0 + $0xc0] ss:$200 sps:$4 sm:$0xff]   ;;  %s7723_s16 = smov [#allocation2]   ;;  %vm5863_vm5 = vcmask 58368  }
 0x1a6   :  { %6963 = vmatprep.mubr.msk.f32.mxu1 %vm7719_vm2, %v7720_v46  ;;  %s5871_s17 = sshll.u32 %s7723_s16, 4  ;;  %s5872_s17 = int_to_ptr.vmem [resolvable:$true] %s5871_s17 }
 0x1a7   :  { %s7693_s18 = scalar_lea.vmem %s5872_s17, 32  ;;  %p7698_p1 = scmp.lt.s32.totalorder %s5872_s17, %s5872_s17 }
 0x1a8   :  { %4628 = vmatpush1.bf16.msra.mxu0 %v7591_v44  ;;  %7059 = vmatpush3.bf16.msra.mxu1 %v9189_v45  ;;  %p7694_p0 = scmp.ne.s32.totalorder %s5872_s17, %s7693_s18  ;;  %p7699_p2 = scmp.lt.s32.totalorder %s7693_s18, %s7693_s18 }
 0x1a9   :  { %4629 = vmatprep.subr.bf16.mxu0 %v7717_v1  ;;  %7060 = vmatprep.subr.bf16.mxu1 %v7718_v42 }
 0x1aa   :  { %p7700_p3 = por %p7699_p2, %p7698_p1 }
 0x1ab   :  { %6964 = vmatmul.mubr.f32.vlgmr.msra.gmra.mrb[52].mxu1 %v7720_v46 }
 0x1ac   :  { %4630 = vmatpush1.bf16.msra.mxu0 %v7592_v47  ;;  %7062 = vmatpush3.bf16.msra.mxu1 %v9177_v43  ;;  %p7701_p4 = pnand %p7700_p3, %p7694_p0 }
 0x1ad   :  { %4631 = vmatprep.subr.bf16.mxu0 %v7717_v1  ;;  %7063 = vmatprep.subr.bf16.mxu1 %v7718_v42 }
 0x1ae   :  { %6974 = vmatprep.mubr.msk.f32.mxu1 %vm7719_vm2, %v7720_v46 }
 0x1b0   :  { %4632 = vmatpush1.bf16.msra.mxu0 %v3627_v56  ;;  %7065 = vmatpush3.bf16.msra.mxu1 %v9189_v45 }
 0x1b1   :  { %7066 = vmatprep.subr.bf16.mxu0 %v7718_v42  ;;  %7072 = vmatprep.subr.bf16.mxu1 %v7718_v42 }
 0x1b3   :  { %4646 = vmatmul.mubr.bf16.vlgmr.msra.gmra.mrb[48].mxu0 %v7596_v58 }
 0x1b4   :  { %7068 = vmatpush3.bf16.msra.mxu0 %v9177_v43  ;;  %6985 = vmatprep.mubr.msk.f32.mxu0 %vm7719_vm2, %v7720_v46 }
 0x1b5   :  { %7069 = vmatprep.subr.bf16.mxu0 %v7718_v42 }
 0x1b6   :  { %v6640_v48 = vpop.f32.mrb[24].mxu1 }
 0x1b7   :  { %v6641_v50 = vpop.f32.mrb[25].mxu1 }
 0x1b8   :  { %v6642_v51 = vadd.f32 %v6641_v50, %v6640_v48  ;;  %v6643_v52 = vpop.f32.mrb[26].mxu1  ;;  %7071 = vmatpush3.bf16.msra.mxu0 %v9189_v45 }
 0x1b9   :  { %v6644_v53 = vpop.f32.mrb[27].mxu1  ;;  %7078 = vmatprep.subr.bf16.mxu0 %v7718_v42 }
 0x1ba   :  { %v4115_v54 = vadd.f32 %v6642_v51, %v4074_v27  ;;  %v6645_v55 = vadd.f32 %v6644_v53, %v6643_v52 }
 0x1bc   :  { %v4118_v57 = vadd.f32 %v6645_v55, %v4077_v30  ;;  %v6662_v59 = vpop.f32.mrb[24].mxu0 }
 0x1bd   :  { %v6663_v1 = vpop.f32.mrb[25].mxu0 }
 0x1be   :  { %v6664_v60 = vadd.f32 %v6663_v1, %v6662_v59  ;;  %v6665_v61 = vpop.f32.mrb[26].mxu0 }
 0x1bf   :  { %v6666_v62 = vpop.f32.mrb[27].mxu0 }
 0x1c0   :  { %v4156_v63 = vadd.f32 %v6664_v60, %v4115_v54  ;;  %v6667_v0 = vadd.f32 %v6666_v62, %v6665_v61 }
 0x1c2   :  { %v4159_v2 = vadd.f32 %v6667_v0, %v4118_v57 }
 0x1d6   :  { %v6684_v3 = vpop.f32.mrb[28].mxu1 }
 0x1d7   :  { %v6685_v4 = vpop.f32.mrb[29].mxu1 }
 0x1d8   :  { %v6686_v5 = vadd.f32 %v6685_v4, %v6684_v3  ;;  %v6687_v6 = vpop.f32.mrb[30].mxu1 }
 0x1d9   :  { %v6688_v7 = vpop.f32.mrb[31].mxu1 }
 0x1da   :  { %v4197_v8 = vadd.f32 %v6686_v5, %v4156_v63  ;;  %v6689_v9 = vadd.f32 %v6688_v7, %v6687_v6 }
 0x1dc   :  { %v4200_v10 = vadd.f32 %v6689_v9, %v4159_v2  ;;  %v6706_v11 = vpop.f32.mrb[28].mxu0 }
 0x1dd   :  { %v6707_v12 = vpop.f32.mrb[29].mxu0 }
 0x1de   :  { %v6708_v13 = vadd.f32 %v6707_v12, %v6706_v11  ;;  %v6709_v14 = vpop.f32.mrb[30].mxu0 }
 0x1df   :  { %v6710_v15 = vpop.f32.mrb[31].mxu0 }
 0x1e0   :  { %v4238_v16 = vadd.f32 %v6708_v13, %v4197_v8  ;;  %v6711_v17 = vadd.f32 %v6710_v15, %v6709_v14 }
 0x1e2   :  { %v4241_v18 = vadd.f32 %v6711_v17, %v4200_v10 }
 0x1f6   :  { %v6728_v19 = vpop.f32.mrb[32].mxu1 }
 0x1f7   :  { %v6729_v20 = vpop.f32.mrb[33].mxu1 }
 0x1f8   :  { %v6730_v21 = vadd.f32 %v6729_v20, %v6728_v19  ;;  %v6731_v22 = vpop.f32.mrb[34].mxu1 }
 0x1f9   :  { %v6732_v23 = vpop.f32.mrb[35].mxu1 }
 0x1fa   :  { %v4279_v24 = vadd.f32 %v6730_v21, %v4238_v16  ;;  %v6733_v25 = vadd.f32 %v6732_v23, %v6731_v22 }
 0x1fc   :  { %v4282_v26 = vadd.f32 %v6733_v25, %v4241_v18  ;;  %v6750_v27 = vpop.f32.mrb[32].mxu0 }
 0x1fd   :  { %v6751_v28 = vpop.f32.mrb[33].mxu0 }
 0x1fe   :  { %v6752_v29 = vadd.f32 %v6751_v28, %v6750_v27  ;;  %v6753_v30 = vpop.f32.mrb[34].mxu0 }
 0x1ff   :  { %v6754_v31 = vpop.f32.mrb[35].mxu0 }
 0x200   :  { %v4320_v32 = vadd.f32 %v6752_v29, %v4279_v24  ;;  %v6755_v33 = vadd.f32 %v6754_v31, %v6753_v30  ;;  %v9224_v30 = vld [vmem:[%s9407_s6] ss:$0 sm:$0xff] }
 0x202   :  { %v4323_v34 = vadd.f32 %v6755_v33, %v4282_v26 }
 0x216   :  { %v6772_v35 = vpop.f32.mrb[36].mxu1 }
 0x217   :  { %v6773_v36 = vpop.f32.mrb[37].mxu1 }
 0x218   :  { %v6774_v37 = vadd.f32 %v6773_v36, %v6772_v35  ;;  %v6775_v38 = vpop.f32.mrb[38].mxu1 }
 0x219   :  { %v6776_v39 = vpop.f32.mrb[39].mxu1 }
 0x21a   :  { %v4361_v40 = vadd.f32 %v6774_v37, %v4320_v32  ;;  %v6777_v41 = vadd.f32 %v6776_v39, %v6775_v38 }
 0x21c   :  { %v4364_v44 = vadd.f32 %v6777_v41, %v4323_v34  ;;  %v6794_v47 = vpop.f32.mrb[36].mxu0 }
 0x21d   :  { %v6795_v48 = vpop.f32.mrb[37].mxu0 }
 0x21e   :  { %v6796_v49 = vadd.f32 %v6795_v48, %v6794_v47  ;;  %v6797_v50 = vpop.f32.mrb[38].mxu0 }
 0x21f   :  { %v6798_v51 = vpop.f32.mrb[39].mxu0 }
 0x220   :  { %v4402_v52 = vadd.f32 %v6796_v49, %v4361_v40  ;;  %v6799_v53 = vadd.f32 %v6798_v51, %v6797_v50 }
 0x222   :  { %v4405_v54 = vadd.f32 %v6799_v53, %v4364_v44  ;;  %v6337_v44 = vld [vmem:[%s9404_s3] ss:$0 sm:$0xff]  ;;  %s7722_s3 = smov 96  }
 0x236   :  { %v6816_v55 = vpop.f32.mrb[40].mxu1 }
 0x237   :  { %v6817_v56 = vpop.f32.mrb[41].mxu1 }
 0x238   :  { %v6818_v57 = vadd.f32 %v6817_v56, %v6816_v55  ;;  %v6819_v58 = vpop.f32.mrb[42].mxu1 }
 0x239   :  { %v6820_v59 = vpop.f32.mrb[43].mxu1 }
 0x23a   :  { %v4443_v1 = vadd.f32 %v6818_v57, %v4402_v52  ;;  %v6821_v60 = vadd.f32 %v6820_v59, %v6819_v58 }
 0x23c   :  { %v4446_v61 = vadd.f32 %v6821_v60, %v4405_v54  ;;  %v6838_v62 = vpop.f32.mrb[40].mxu0 }
 0x23d   :  { %v6839_v63 = vpop.f32.mrb[41].mxu0 }
 0x23e   :  { %v6840_v0 = vadd.f32 %v6839_v63, %v6838_v62  ;;  %v6841_v2 = vpop.f32.mrb[42].mxu0 }
 0x23f   :  { %v6842_v3 = vpop.f32.mrb[43].mxu0 }
 0x240   :  { %v4484_v4 = vadd.f32 %v6840_v0, %v4443_v1  ;;  %v6843_v5 = vadd.f32 %v6842_v3, %v6841_v2 }
 0x242   :  { %v4487_v6 = vadd.f32 %v6843_v5, %v4446_v61 }
 0x256   :  { %v6860_v7 = vpop.f32.mrb[44].mxu1 }
 0x257   :  { %v6861_v8 = vpop.f32.mrb[45].mxu1 }
 0x258   :  { %v6862_v9 = vadd.f32 %v6861_v8, %v6860_v7  ;;  %v6863_v10 = vpop.f32.mrb[46].mxu1 }
 0x259   :  { %v6864_v11 = vpop.f32.mrb[47].mxu1 }
 0x25a   :  { %v4525_v12 = vadd.f32 %v6862_v9, %v4484_v4  ;;  %v6865_v13 = vadd.f32 %v6864_v11, %v6863_v10 }
 0x25c   :  { %v4528_v14 = vadd.f32 %v6865_v13, %v4487_v6 }
 0x25d   :  { %v6882_v15 = vpop.f32.mrb[44].mxu0 }
 0x25e   :  { %v6883_v16 = vpop.f32.mrb[45].mxu0 }
 0x25f   :  { %v6884_v17 = vadd.f32 %v6883_v16, %v6882_v15  ;;  %v6885_v18 = vpop.f32.mrb[46].mxu0 }
 0x260   :  { %v6886_v19 = vpop.f32.mrb[47].mxu0 }
 0x261   :  { %v4566_v20 = vadd.f32 %v6884_v17, %v4525_v12  ;;  %v6887_v21 = vadd.f32 %v6886_v19, %v6885_v18 }
 0x263   :  { %v4569_v22 = vadd.f32 %v6887_v21, %v4528_v14 }
 0x276   :  { %v6904_v23 = vpop.f32.mrb[48].mxu1 }
 0x277   :  { %v6905_v24 = vpop.f32.mrb[49].mxu1 }
 0x278   :  { %v6906_v25 = vadd.f32 %v6905_v24, %v6904_v23  ;;  %v6907_v26 = vpop.f32.mrb[50].mxu1 }
 0x279   :  { %v6908_v27 = vpop.f32.mrb[51].mxu1 }
 0x27a   :  { %v6909_v28 = vadd.f32 %v6908_v27, %v6907_v26  ;;  %v4607_v29 = vadd.f32 %v6906_v25, %v4566_v20 }
 0x27c   :  { %v4610_v31 = vadd.f32 %v6909_v28, %v4569_v22 }
 0x27e   :  { %v4748_v32 = vpop.f32.mrb[52].mxu1 }
 0x27f   :  { %v4749_v33 = vadd.f32 %v9224_v30, %v4748_v32  ;;  %v6965_v34 = vpop.f32.mrb[53].mxu1 }
 0x281   :  { %v4753_v35 = vrot.slane %v4749_v33, 1 }
 0x283   :  { %4772 = vrot.lane.b32.xlu0 %v4753_v35, %s7721_s10 }
 0x286   :  { %v4647_v36 = vpop.f32.mrb[48].mxu0 }
 0x287   :  { %v4648_v37 = vadd.f32 %v4647_v36, %v4607_v29  ;;  %v4649_v38 = vpop.f32.mrb[49].mxu0  ;;  %4770 = vrot.lane.b32.xlu0 %v4749_v33, %s7721_s10 }
 0x288   :  { %v4650_v39 = vpop.f32.mrb[50].mxu0 }
 0x289   :  { %v4651_v40 = vadd.f32 %v4650_v39, %v4610_v31  ;;  %v4652_v41 = vpop.f32.mrb[51].mxu0  ;;  %v9234_v48 = vadd.f32 %v6337_v44, %v4648_v37 }
 0x28b   :  { %v9232_v47 = vadd.f32 %v6337_v44, %v4651_v40  ;;  %v4756_v51 = vadd.f32 %v4749_v33, %v9234_v48 }
 0x28d   :  { %v4757_v49 = vadd.f32 %v4753_v35, %v9232_v47  ;;  %v6339_v52 = vmul.f32 -1.442695, %v4756_v51 }
 0x28f   :  { %v6340_v50 = vmul.f32 -1.442695, %v4757_v49 }
 0x291   :  { %7597 = vpow2.f32 %v6340_v50 }
 0x292   :  { %7599 = vpow2.f32 %v6339_v52 }
 0x29b   :  { %v7598_v53 = vpop.eup %7597 }
 0x29c   :  { %v4765_v54 = vadd.f32 1.0, %v7598_v53  ;;  %v7600_v55 = vpop.eup %7599 }
 0x29d   :  { %v4764_v56 = vadd.f32 1.0, %v7600_v55 }
 0x29e   :  { %7601 = vrcp.f32 %v4765_v54 }
 0x29f   :  { %7603 = vrcp.f32 %v4764_v56 }
 0x2a8   :  { %v7602_v57 = vpop.eup %7601 }
 0x2a9   :  { %v7604_v1 = vpop.eup %7603  ;;  %v4791_v5 = vsub.f32 1.0, %v7602_v57  ;;  %v4803_v7 = vmul.f32 0.0, %v7602_v57 }
 0x2aa   :  { %v4790_v10 = vsub.f32 1.0, %v7604_v1  ;;  %v4802_v12 = vmul.f32 0.0, %v7604_v1 }
 0x2f5   :  { %v4773_v58 = vpop.permute.xlu0 %4772 }
 0x2f6   :  { %v4777_v59 = vmul.f32 %v7602_v57, %v4773_v58 }
 0x2f8   :  { %4782 = vrot.lane.b32.xlu1 %v4777_v59, %s7721_s10 }
 0x2f9   :  { %v4771_v60 = vpop.permute.xlu0 %4770 }
 0x2fa   :  { %v4776_v61 = vmul.f32 %v7604_v1, %v4771_v60 }
 0x2fc   :  { %4780 = vrot.lane.b32.xlu1 %v4776_v61, %s7721_s10 }
 0x36a   :  { %v4783_v62 = vpop.permute.xlu1 %4782 }
 0x36b   :  { %v4787_v63 = vadd.f32 %v4783_v62, %v9232_v47 }
 0x36d   :  { %7605 = vtanh.f32 %v4787_v63 }
 0x36e   :  { %v4781_v0 = vpop.permute.xlu1 %4780 }
 0x36f   :  { %v4786_v2 = vadd.f32 %v4781_v0, %v9234_v48 }
 0x371   :  { %7607 = vtanh.f32 %v4786_v2 }
 0x377   :  { %v7606_v3 = vpop.eup %7605 }
 0x378   :  { %4796 = vrot.lane.b32.xlu0 %v7606_v3, %s7722_s3 }
 0x37b   :  { %v7608_v4 = vpop.eup %7607 }
 0x37c   :  { %4794 = vrot.lane.b32.xlu1 %v7608_v4, %s7722_s3 }
 0x3ea   :  { %v4797_v6 = vpop.permute.xlu0 %4796 }
 0x3eb   :  { %v4801_v8 = vmul.f32 %v4797_v6, %v4791_v5 }
 0x3ed   :  { %v9244_v9 = vadd.f32 %v4803_v7, %v4801_v8 }
 0x3ee   :  { %v4795_v11 = vpop.permute.xlu1 %4794 }
 0x3ef   :  { %v4800_v13 = vmul.f32 %v4795_v11, %v4790_v10  ;;  %v4808_v14 = vrot.slane %v9244_v9, 7 }
 0x3f1   :  { %v4804_v15 = vadd.f32 %v4802_v12, %v4800_v13 }
 0x3f3   :  { %v4810_v16 = vsel %vm4809_vm3, %v4808_v14, %v4804_v15  ;;  %v4935_v50 = vrot.slane %v4804_v15, 7 }
 0x3f4   :  { %4811 = vrot.lane.b32.xlu0 %v4810_v16, %s7722_s3 }
 0x466   :  { %v4812_v17 = vpop.permute.xlu0 %4811 }
 0x467   :  { %6975 = vmatmul.mubr.msk.f32.vlgmr.msra.gmra.mrb[54].mxu1 %vm4678_vm4, %v4812_v17 }
 0x468   :  { %7074 = vmatpush3.bf16.msra.mxu1 %v9177_v43  ;;  %6996 = vmatprep.mubr.msk.f32.mxu1 %vm7719_vm2, %v7720_v46 }
 0x469   :  { %7075 = vmatprep.subr.bf16.mxu1 %v7718_v42 }
 0x46c   :  { %7077 = vmatpush3.bf16.msra.mxu1 %v9189_v45 }
 0x46d   :  { %7084 = vmatprep.subr.bf16.mxu1 %v7718_v42 }
 0x53a   :  { %v4881_v18 = vpop.f32.mrb[54].mxu1 }
 0x53b   :  { %v4882_v19 = vadd.f32 %v9224_v30, %v4881_v18  ;;  %v6976_v20 = vpop.f32.mrb[55].mxu1 }
 0x53d   :  { %4905 = vrot.lane.b32.xlu0 %v4882_v19, %s7721_s10  ;;  %v4886_v21 = vrot.slane %v4882_v19, 7  ;;  %v4890_v22 = vadd.f32 %v4882_v19, %v9232_v47 }
 0x53f   :  { %4903 = vrot.lane.b32.xlu1 %v4886_v21, %s7721_s10  ;;  %v4889_v23 = vadd.f32 %v4886_v21, %v9234_v48  ;;  %v6343_v24 = vmul.f32 -1.442695, %v4890_v22 }
 0x541   :  { %v6342_v25 = vmul.f32 -1.442695, %v4889_v23  ;;  %7609 = vpow2.f32 %v6343_v24 }
 0x543   :  { %7611 = vpow2.f32 %v6342_v25 }
 0x54b   :  { %v7610_v26 = vpop.eup %7609 }
 0x54c   :  { %v4898_v28 = vadd.f32 1.0, %v7610_v26 }
 0x54d   :  { %v7612_v27 = vpop.eup %7611 }
 0x54e   :  { %v4897_v29 = vadd.f32 1.0, %v7612_v27  ;;  %7613 = vrcp.f32 %v4898_v28 }
 0x550   :  { %7615 = vrcp.f32 %v4897_v29 }
 0x558   :  { %v7614_v31 = vpop.eup %7613 }
 0x559   :  { %v4924_v51 = vsub.f32 1.0, %v7614_v31  ;;  %v4939_v57 = vmul.f32 %v7614_v31, %v4808_v14 }
 0x55a   :  { %v7616_v34 = vpop.eup %7615 }
 0x55b   :  { %v4923_v52 = vsub.f32 1.0, %v7616_v34  ;;  %v4938_v55 = vmul.f32 %v7616_v34, %v4935_v50 }
 0x5af   :  { %v4906_v32 = vpop.permute.xlu0 %4905 }
 0x5b0   :  { %v4910_v33 = vmul.f32 %v7614_v31, %v4906_v32 }
 0x5b1   :  { %v4904_v35 = vpop.permute.xlu1 %4903 }
 0x5b2   :  { %v4909_v36 = vmul.f32 %v7616_v34, %v4904_v35  ;;  %4915 = vrot.lane.b32.xlu0 %v4910_v33, %s7721_s10 }
 0x5b4   :  { %4913 = vrot.lane.b32.xlu1 %v4909_v36, %s7721_s10 }
 0x624   :  { %v4916_v37 = vpop.permute.xlu0 %4915 }
 0x625   :  { %v4920_v38 = vadd.f32 %v4916_v37, %v9232_v47 }
 0x626   :  { %v4914_v39 = vpop.permute.xlu1 %4913 }
 0x627   :  { %7617 = vtanh.f32 %v4920_v38  ;;  %v4919_v40 = vadd.f32 %v4914_v39, %v9234_v48 }
 0x629   :  { %7619 = vtanh.f32 %v4919_v40 }
 0x631   :  { %v7618_v41 = vpop.eup %7617 }
 0x632   :  { %4929 = vrot.lane.b32.xlu0 %v7618_v41, %s7722_s3 }
 0x633   :  { %v7620_v44 = vpop.eup %7619 }
 0x634   :  { %4927 = vrot.lane.b32.xlu1 %v7620_v44, %s7722_s3 }
 0x6a4   :  { %v4930_v49 = vpop.permute.xlu0 %4929 }
 0x6a5   :  { %v4934_v54 = vmul.f32 %v4930_v49, %v4924_v51 }
 0x6a6   :  { %v4928_v53 = vpop.permute.xlu1 %4927 }
 0x6a7   :  { %v4933_v56 = vmul.f32 %v4928_v53, %v4923_v52  ;;  %v4941_v59 = vadd.f32 %v4939_v57, %v4934_v54 }
 0x6a9   :  { %v4940_v58 = vadd.f32 %v4938_v55, %v4933_v56  ;;  %v5072_v24 = vrot.slane %v4941_v59, 7 }
 0x6ab   :  { %v4944_v1 = vrot.slane %v4940_v58, 1  ;;  %v5071_v26 = vrot.slane %v4940_v58, 7 }
 0x6ad   :  { %v4945_v60 = vsel %vm4809_vm3, %v4941_v59, %v4944_v1 }
 0x6ae   :  { %4946 = vrot.lane.b32.xlu1 %v4945_v60, %s7722_s3 }
 0x720   :  { %v4947_v61 = vpop.permute.xlu1 %4946 }
 0x721   :  { %6986 = vmatmul.mubr.msk.f32.vlgmr.msra.gmra.mrb[52].mxu0 %vm4678_vm4, %v4947_v61 }
 0x722   :  { %7080 = vmatpush3.bf16.msra.mxu0 %v9177_v43  ;;  %7007 = vmatprep.mubr.msk.f32.mxu0 %vm7719_vm2, %v7720_v46 }
 0x723   :  { %7081 = vmatprep.subr.bf16.mxu0 %v7718_v42 }
 0x726   :  { %7083 = vmatpush3.bf16.msra.mxu0 %v9189_v45 }
 0x727   :  { %7090 = vmatprep.subr.bf16.mxu0 %v7718_v42 }
 0x7f4   :  { %v5016_v62 = vpop.f32.mrb[52].mxu0 }
 0x7f5   :  { %v5017_v63 = vadd.f32 %v9224_v30, %v5016_v62  ;;  %v6987_v0 = vpop.f32.mrb[53].mxu0 }
 0x7f7   :  { %v5021_v2 = vrot.slane %v5017_v63, 6  ;;  %v5022_v3 = vrot.slane %v5017_v63, 7 }
 0x7f9   :  { %5041 = vrot.lane.b32.xlu1 %v5022_v3, %s7721_s10  ;;  %5039 = vrot.lane.b32.xlu0 %v5021_v2, %s7721_s10  ;;  %v5025_v4 = vadd.f32 %v5021_v2, %v9234_v48  ;;  %v5026_v5 = vadd.f32 %v5022_v3, %v9232_v47 }
 0x7fb   :  { %v6345_v6 = vmul.f32 -1.442695, %v5025_v4  ;;  %v6346_v7 = vmul.f32 -1.442695, %v5026_v5 }
 0x7fd   :  { %7621 = vpow2.f32 %v6345_v6 }
 0x7fe   :  { %7623 = vpow2.f32 %v6346_v7 }
 0x807   :  { %v7622_v8 = vpop.eup %7621 }
 0x808   :  { %v7624_v9 = vpop.eup %7623  ;;  %v5033_v10 = vadd.f32 1.0, %v7622_v8 }
 0x809   :  { %v5034_v11 = vadd.f32 1.0, %v7624_v9 }
 0x80a   :  { %7625 = vrcp.f32 %v5033_v10 }
 0x80b   :  { %7627 = vrcp.f32 %v5034_v11 }
 0x814   :  { %v7626_v12 = vpop.eup %7625 }
 0x815   :  { %v7628_v13 = vpop.eup %7627  ;;  %v5059_v28 = vsub.f32 1.0, %v7626_v12  ;;  %v5075_v33 = vmul.f32 %v7626_v12, %v5071_v26 }
 0x816   :  { %v5060_v25 = vsub.f32 1.0, %v7628_v13  ;;  %v5076_v29 = vmul.f32 %v7628_v13, %v5072_v24 }
 0x86b   :  { %v5042_v14 = vpop.permute.xlu1 %5041  ;;  %v5040_v15 = vpop.permute.xlu0 %5039 }
 0x86c   :  { %v5046_v16 = vmul.f32 %v7628_v13, %v5042_v14  ;;  %v5045_v17 = vmul.f32 %v7626_v12, %v5040_v15 }
 0x86e   :  { %5051 = vrot.lane.b32.xlu1 %v5046_v16, %s7721_s10  ;;  %5049 = vrot.lane.b32.xlu0 %v5045_v17, %s7721_s10 }
 0x8e0   :  { %v5052_v18 = vpop.permute.xlu1 %5051  ;;  %v5050_v19 = vpop.permute.xlu0 %5049 }
 0x8e1   :  { %v5056_v20 = vadd.f32 %v5052_v18, %v9232_v47  ;;  %v5055_v21 = vadd.f32 %v5050_v19, %v9234_v48 }
 0x8e3   :  { %7629 = vtanh.f32 %v5056_v20 }
 0x8e4   :  { %7631 = vtanh.f32 %v5055_v21 }
 0x8ed   :  { %v7630_v22 = vpop.eup %7629 }
 0x8ee   :  { %v7632_v23 = vpop.eup %7631  ;;  %5065 = vrot.lane.b32.xlu1 %v7630_v22, %s7722_s3 }
 0x8ef   :  { %5063 = vrot.lane.b32.xlu0 %v7632_v23, %s7722_s3 }
 0x960   :  { %v5066_v27 = vpop.permute.xlu1 %5065 }
 0x961   :  { %v5070_v31 = vmul.f32 %v5066_v27, %v5060_v25  ;;  %v5064_v32 = vpop.permute.xlu0 %5063 }
 0x962   :  { %v5069_v34 = vmul.f32 %v5064_v32, %v5059_v28 }
 0x963   :  { %v5078_v35 = vadd.f32 %v5076_v29, %v5070_v31 }
 0x964   :  { %v5077_v36 = vadd.f32 %v5075_v33, %v5069_v34 }
 0x965   :  { %v5082_v37 = vrot.slane %v5078_v35, 1  ;;  %v5210_v8 = vrot.slane %v5078_v35, 7 }
 0x966   :  { %v5081_v38 = vrot.slane %v5077_v36, 2  ;;  %v5209_v10 = vrot.slane %v5077_v36, 7 }
 0x968   :  { %v5083_v39 = vsel %vm4809_vm3, %v5082_v37, %v5081_v38 }
 0x969   :  { %5084 = vrot.lane.b32.xlu0 %v5083_v39, %s7722_s3 }
 0x9db   :  { %v5085_v40 = vpop.permute.xlu0 %5084 }
 0x9dc   :  { %6997 = vmatmul.mubr.msk.f32.vlgmr.msra.gmra.mrb[56].mxu1 %vm4678_vm4, %v5085_v40 }
 0x9dd   :  { %7086 = vmatpush3.bf16.msra.mxu1 %v9177_v43  ;;  %7018 = vmatprep.mubr.msk.f32.mxu1 %vm7719_vm2, %v7720_v46 }
 0x9de   :  { %7087 = vmatprep.subr.bf16.mxu1 %v7718_v42 }
 0x9e1   :  { %7089 = vmatpush3.bf16.msra.mxu1 %v9189_v45 }
 0x9e2   :  { %7096 = vmatprep.subr.bf16.mxu1 %v7718_v42 }
 0xaaf   :  { %v5154_v41 = vpop.f32.mrb[56].mxu1 }
 0xab0   :  { %v5155_v44 = vadd.f32 %v9224_v30, %v5154_v41  ;;  %v6998_v49 = vpop.f32.mrb[57].mxu1 }
 0xab2   :  { %v5159_v50 = vrot.slane %v5155_v44, 5  ;;  %v5160_v51 = vrot.slane %v5155_v44, 6 }
 0xab4   :  { %5179 = vrot.lane.b32.xlu0 %v5160_v51, %s7721_s10  ;;  %5177 = vrot.lane.b32.xlu1 %v5159_v50, %s7721_s10  ;;  %v5163_v52 = vadd.f32 %v5159_v50, %v9234_v48  ;;  %v5164_v53 = vadd.f32 %v5160_v51, %v9232_v47 }
 0xab6   :  { %v6348_v54 = vmul.f32 -1.442695, %v5163_v52  ;;  %v6349_v55 = vmul.f32 -1.442695, %v5164_v53 }
 0xab8   :  { %7633 = vpow2.f32 %v6348_v54 }
 0xab9   :  { %7635 = vpow2.f32 %v6349_v55 }
 0xac2   :  { %v7634_v56 = vpop.eup %7633 }
 0xac3   :  { %v7636_v57 = vpop.eup %7635  ;;  %v5171_v58 = vadd.f32 1.0, %v7634_v56 }
 0xac4   :  { %v5172_v59 = vadd.f32 1.0, %v7636_v57 }
 0xac5   :  { %7637 = vrcp.f32 %v5171_v58 }
 0xac6   :  { %7639 = vrcp.f32 %v5172_v59 }
 0xacf   :  { %v7638_v1 = vpop.eup %7637 }
 0xad0   :  { %v7640_v60 = vpop.eup %7639  ;;  %v5197_v12 = vsub.f32 1.0, %v7638_v1  ;;  %v5213_v16 = vmul.f32 %v7638_v1, %v5209_v10 }
 0xad1   :  { %v5198_v9 = vsub.f32 1.0, %v7640_v60  ;;  %v5214_v13 = vmul.f32 %v7640_v60, %v5210_v8 }
 0xb26   :  { %v5180_v61 = vpop.permute.xlu0 %5179  ;;  %v5178_v62 = vpop.permute.xlu1 %5177 }
 0xb27   :  { %v5184_v63 = vmul.f32 %v7640_v60, %v5180_v61  ;;  %v5183_v0 = vmul.f32 %v7638_v1, %v5178_v62 }
 0xb29   :  { %5189 = vrot.lane.b32.xlu0 %v5184_v63, %s7721_s10  ;;  %5187 = vrot.lane.b32.xlu1 %v5183_v0, %s7721_s10 }
 0xb9b   :  { %v5190_v2 = vpop.permute.xlu0 %5189  ;;  %v5188_v3 = vpop.permute.xlu1 %5187 }
 0xb9c   :  { %v5194_v4 = vadd.f32 %v5190_v2, %v9232_v47  ;;  %v5193_v5 = vadd.f32 %v5188_v3, %v9234_v48 }
 0xb9e   :  { %7641 = vtanh.f32 %v5194_v4 }
 0xb9f   :  { %7643 = vtanh.f32 %v5193_v5 }
 0xba8   :  { %v7642_v6 = vpop.eup %7641 }
 0xba9   :  { %v7644_v7 = vpop.eup %7643  ;;  %5203 = vrot.lane.b32.xlu0 %v7642_v6, %s7722_s3 }
 0xbaa   :  { %5201 = vrot.lane.b32.xlu1 %v7644_v7, %s7722_s3 }
 0xc1b   :  { %v5204_v11 = vpop.permute.xlu0 %5203 }
 0xc1c   :  { %v5208_v14 = vmul.f32 %v5204_v11, %v5198_v9  ;;  %v5202_v15 = vpop.permute.xlu1 %5201 }
 0xc1d   :  { %v5207_v17 = vmul.f32 %v5202_v15, %v5197_v12 }
 0xc1e   :  { %v5216_v18 = vadd.f32 %v5214_v13, %v5208_v14 }
 0xc1f   :  { %v5215_v19 = vadd.f32 %v5213_v16, %v5207_v17 }
 0xc20   :  { %v5220_v20 = vrot.slane %v5216_v18, 2  ;;  %v5348_v56 = vrot.slane %v5216_v18, 7 }
 0xc21   :  { %v5219_v21 = vrot.slane %v5215_v19, 3  ;;  %v5347_v58 = vrot.slane %v5215_v19, 7 }
 0xc23   :  { %v5221_v22 = vsel %vm4809_vm3, %v5220_v20, %v5219_v21 }
 0xc24   :  { %5222 = vrot.lane.b32.xlu1 %v5221_v22, %s7722_s3 }
 0xc96   :  { %v5223_v23 = vpop.permute.xlu1 %5222 }
 0xc97   :  { %7008 = vmatmul.mubr.msk.f32.vlgmr.msra.gmra.mrb[54].mxu0 %vm4678_vm4, %v5223_v23 }
 0xc98   :  { %7092 = vmatpush3.bf16.msra.mxu0 %v9177_v43  ;;  %7029 = vmatprep.mubr.msk.f32.mxu0 %vm7719_vm2, %v7720_v46 }
 0xc99   :  { %7093 = vmatprep.subr.bf16.mxu0 %v7718_v42 }
 0xc9c   :  { %7095 = vmatpush3.bf16.msra.mxu0 %v9189_v45 }
 0xc9d   :  { %7102 = vmatprep.subr.bf16.mxu0 %v7718_v42 }
 0xd6a   :  { %v5292_v24 = vpop.f32.mrb[54].mxu0 }
 0xd6b   :  { %v5293_v25 = vadd.f32 %v9224_v30, %v5292_v24  ;;  %v7009_v26 = vpop.f32.mrb[55].mxu0 }
 0xd6d   :  { %v5297_v27 = vrot.slane %v5293_v25, 4  ;;  %v5298_v28 = vrot.slane %v5293_v25, 5 }
 0xd6f   :  { %5317 = vrot.lane.b32.xlu1 %v5298_v28, %s7721_s10  ;;  %5315 = vrot.lane.b32.xlu0 %v5297_v27, %s7721_s10  ;;  %v5301_v29 = vadd.f32 %v5297_v27, %v9234_v48  ;;  %v5302_v31 = vadd.f32 %v5298_v28, %v9232_v47 }
 0xd71   :  { %v6351_v32 = vmul.f32 -1.442695, %v5301_v29  ;;  %v6352_v33 = vmul.f32 -1.442695, %v5302_v31 }
 0xd73   :  { %7645 = vpow2.f32 %v6351_v32 }
 0xd74   :  { %7647 = vpow2.f32 %v6352_v33 }
 0xd7d   :  { %v7646_v34 = vpop.eup %7645 }
 0xd7e   :  { %v7648_v35 = vpop.eup %7647  ;;  %v5309_v36 = vadd.f32 1.0, %v7646_v34 }
 0xd7f   :  { %v5310_v37 = vadd.f32 1.0, %v7648_v35 }
 0xd80   :  { %7649 = vrcp.f32 %v5309_v36 }
 0xd81   :  { %7651 = vrcp.f32 %v5310_v37 }
 0xd8a   :  { %v7650_v38 = vpop.eup %7649 }
 0xd8b   :  { %v7652_v39 = vpop.eup %7651  ;;  %v5335_v1 = vsub.f32 1.0, %v7650_v38  ;;  %v5351_v63 = vmul.f32 %v7650_v38, %v5347_v58 }
 0xd8c   :  { %v5336_v57 = vsub.f32 1.0, %v7652_v39  ;;  %v5352_v60 = vmul.f32 %v7652_v39, %v5348_v56 }
 0xde1   :  { %v5318_v40 = vpop.permute.xlu1 %5317  ;;  %v5316_v41 = vpop.permute.xlu0 %5315 }
 0xde2   :  { %v5322_v44 = vmul.f32 %v7652_v39, %v5318_v40  ;;  %v5321_v49 = vmul.f32 %v7650_v38, %v5316_v41 }
 0xde4   :  { %5327 = vrot.lane.b32.xlu1 %v5322_v44, %s7721_s10  ;;  %5325 = vrot.lane.b32.xlu0 %v5321_v49, %s7721_s10 }
 0xe56   :  { %v5328_v50 = vpop.permute.xlu1 %5327  ;;  %v5326_v51 = vpop.permute.xlu0 %5325 }
 0xe57   :  { %v5332_v52 = vadd.f32 %v5328_v50, %v9232_v47  ;;  %v5331_v53 = vadd.f32 %v5326_v51, %v9234_v48 }
 0xe59   :  { %7653 = vtanh.f32 %v5332_v52 }
 0xe5a   :  { %7655 = vtanh.f32 %v5331_v53 }
 0xe63   :  { %v7654_v54 = vpop.eup %7653 }
 0xe64   :  { %v7656_v55 = vpop.eup %7655  ;;  %5341 = vrot.lane.b32.xlu1 %v7654_v54, %s7722_s3 }
 0xe65   :  { %5339 = vrot.lane.b32.xlu0 %v7656_v55, %s7722_s3 }
 0xed6   :  { %v5342_v59 = vpop.permute.xlu1 %5341 }
 0xed7   :  { %v5346_v61 = vmul.f32 %v5342_v59, %v5336_v57  ;;  %v5340_v62 = vpop.permute.xlu0 %5339 }
 0xed8   :  { %v5345_v0 = vmul.f32 %v5340_v62, %v5335_v1 }
 0xed9   :  { %v5354_v2 = vadd.f32 %v5352_v60, %v5346_v61 }
 0xeda   :  { %v5353_v3 = vadd.f32 %v5351_v63, %v5345_v0 }
 0xedb   :  { %v5358_v4 = vrot.slane %v5354_v2, 3  ;;  %v5486_v32 = vrot.slane %v5354_v2, 7 }
 0xedc   :  { %v5357_v5 = vrot.slane %v5353_v3, 4  ;;  %v5485_v34 = vrot.slane %v5353_v3, 7 }
 0xede   :  { %v5359_v6 = vsel %vm4809_vm3, %v5358_v4, %v5357_v5 }
 0xedf   :  { %5360 = vrot.lane.b32.xlu0 %v5359_v6, %s7722_s3 }
 0xf51   :  { %v5361_v7 = vpop.permute.xlu0 %5360 }
 0xf52   :  { %7019 = vmatmul.mubr.msk.f32.vlgmr.msra.gmra.mrb[58].mxu1 %vm4678_vm4, %v5361_v7 }
 0xf53   :  { %7098 = vmatpush3.bf16.msra.mxu1 %v9177_v43  ;;  %7040 = vmatprep.mubr.msk.f32.mxu1 %vm7719_vm2, %v7720_v46 }
 0xf54   :  { %7099 = vmatprep.subr.bf16.mxu1 %v7718_v42 }
 0xf57   :  { %7101 = vmatpush3.bf16.msra.mxu1 %v9189_v45 }
0x1025   :  { %v5430_v8 = vpop.f32.mrb[58].mxu1 }
0x1026   :  { %v5431_v9 = vadd.f32 %v9224_v30, %v5430_v8  ;;  %v7020_v10 = vpop.f32.mrb[59].mxu1 }
0x1028   :  { %v5435_v11 = vrot.slane %v5431_v9, 3  ;;  %v5436_v12 = vrot.slane %v5431_v9, 4 }
0x102a   :  { %5455 = vrot.lane.b32.xlu0 %v5436_v12, %s7721_s10  ;;  %5453 = vrot.lane.b32.xlu1 %v5435_v11, %s7721_s10  ;;  %v5439_v13 = vadd.f32 %v5435_v11, %v9234_v48  ;;  %v5440_v43 = vadd.f32 %v5436_v12, %v9232_v47 }
0x102c   :  { %v6354_v14 = vmul.f32 -1.442695, %v5439_v13  ;;  %v6355_v15 = vmul.f32 -1.442695, %v5440_v43 }
0x102e   :  { %7657 = vpow2.f32 %v6354_v14 }
0x102f   :  { %7659 = vpow2.f32 %v6355_v15 }
0x1038   :  { %v7658_v16 = vpop.eup %7657 }
0x1039   :  { %v7660_v45 = vpop.eup %7659  ;;  %v5447_v17 = vadd.f32 1.0, %v7658_v16 }
0x103a   :  { %v5448_v18 = vadd.f32 1.0, %v7660_v45 }
0x103b   :  { %7661 = vrcp.f32 %v5447_v17 }
0x103c   :  { %7663 = vrcp.f32 %v5448_v18 }
0x1045   :  { %v7662_v19 = vpop.eup %7661 }
0x1046   :  { %v7664_v20 = vpop.eup %7663  ;;  %v5473_v36 = vsub.f32 1.0, %v7662_v19  ;;  %v5489_v40 = vmul.f32 %v7662_v19, %v5485_v34 }
0x1047   :  { %v5474_v33 = vsub.f32 1.0, %v7664_v20  ;;  %v5490_v37 = vmul.f32 %v7664_v20, %v5486_v32 }
0x109c   :  { %v5456_v21 = vpop.permute.xlu0 %5455  ;;  %v5454_v22 = vpop.permute.xlu1 %5453 }
0x109d   :  { %v5460_v23 = vmul.f32 %v7664_v20, %v5456_v21  ;;  %v5459_v24 = vmul.f32 %v7662_v19, %v5454_v22 }
0x109f   :  { %5465 = vrot.lane.b32.xlu0 %v5460_v23, %s7721_s10  ;;  %5463 = vrot.lane.b32.xlu1 %v5459_v24, %s7721_s10 }
0x1111   :  { %v5466_v25 = vpop.permute.xlu0 %5465  ;;  %v5464_v26 = vpop.permute.xlu1 %5463 }
0x1112   :  { %v5470_v27 = vadd.f32 %v5466_v25, %v9232_v47  ;;  %v5469_v28 = vadd.f32 %v5464_v26, %v9234_v48 }
0x1114   :  { %7665 = vtanh.f32 %v5470_v27 }
0x1115   :  { %7667 = vtanh.f32 %v5469_v28 }
0x111e   :  { %v7666_v29 = vpop.eup %7665 }
0x111f   :  { %v7668_v31 = vpop.eup %7667  ;;  %5479 = vrot.lane.b32.xlu0 %v7666_v29, %s7722_s3 }
0x1120   :  { %5477 = vrot.lane.b32.xlu1 %v7668_v31, %s7722_s3 }
0x1191   :  { %v5480_v35 = vpop.permute.xlu0 %5479 }
0x1192   :  { %v5484_v38 = vmul.f32 %v5480_v35, %v5474_v33  ;;  %v5478_v39 = vpop.permute.xlu1 %5477 }
0x1193   :  { %v5483_v41 = vmul.f32 %v5478_v39, %v5473_v36 }
0x1194   :  { %v5492_v44 = vadd.f32 %v5490_v37, %v5484_v38 }
0x1195   :  { %v5491_v49 = vadd.f32 %v5489_v40, %v5483_v41 }
0x1196   :  { %v5496_v50 = vrot.slane %v5492_v44, 4  ;;  %v5624_v43 = vrot.slane %v5492_v44, 7 }
0x1197   :  { %v5495_v51 = vrot.slane %v5491_v49, 5  ;;  %v5623_v15 = vrot.slane %v5491_v49, 7 }
0x1199   :  { %v5497_v52 = vsel %vm4809_vm3, %v5496_v50, %v5495_v51 }
0x119a   :  { %5498 = vrot.lane.b32.xlu1 %v5497_v52, %s7722_s3 }
0x120c   :  { %v5499_v53 = vpop.permute.xlu1 %5498 }
0x120d   :  { %7030 = vmatmul.mubr.msk.f32.vlgmr.msra.gmra.mrb[56].mxu0 %vm4678_vm4, %v5499_v53 }
0x120e   :  { %7051 = vmatprep.mubr.msk.f32.mxu0 %vm7719_vm2, %v7720_v46 }
0x12e0   :  { %v5568_v54 = vpop.f32.mrb[56].mxu0 }
0x12e1   :  { %v5569_v55 = vadd.f32 %v9224_v30, %v5568_v54  ;;  %v7031_v56 = vpop.f32.mrb[57].mxu0 }
0x12e3   :  { %v5573_v57 = vrot.slane %v5569_v55, 2  ;;  %v5574_v58 = vrot.slane %v5569_v55, 3 }
0x12e5   :  { %5593 = vrot.lane.b32.xlu1 %v5574_v58, %s7721_s10  ;;  %5591 = vrot.lane.b32.xlu0 %v5573_v57, %s7721_s10  ;;  %v5577_v59 = vadd.f32 %v5573_v57, %v9234_v48  ;;  %v5578_v1 = vadd.f32 %v5574_v58, %v9232_v47  ;;  %v6373_v57 = vld [vmem:[%s9408_s7] sm:$0xff]   ;;  %v6381_v58 = vld [vmem:[%s9408_s7 + $0x8] sm:$0xff]  }
0x12e6   :  { %7104 = vmatpush3.bf16.msra.mxu0 %v6373_v57 }
0x12e7   :  { %v6357_v60 = vmul.f32 -1.442695, %v5577_v59  ;;  %v6358_v61 = vmul.f32 -1.442695, %v5578_v1  ;;  %7105 = vmatprep.subr.bf16.mxu0 %v7718_v42 }
0x12e9   :  { %7669 = vpow2.f32 %v6357_v60 }
0x12ea   :  { %7671 = vpow2.f32 %v6358_v61  ;;  %7107 = vmatpush3.bf16.msra.mxu0 %v6381_v58 }
0x12f3   :  { %v7670_v62 = vpop.eup %7669 }
0x12f4   :  { %v7672_v46 = vpop.eup %7671  ;;  %v5585_v63 = vadd.f32 1.0, %v7670_v62 }
0x12f5   :  { %v5586_v0 = vadd.f32 1.0, %v7672_v46 }
0x12f6   :  { %7673 = vrcp.f32 %v5585_v63 }
0x12f7   :  { %7675 = vrcp.f32 %v5586_v0 }
0x1300   :  { %v7674_v2 = vpop.eup %7673 }
0x1301   :  { %v7676_v3 = vpop.eup %7675  ;;  %v5611_v45 = vsub.f32 1.0, %v7674_v2  ;;  %v5627_v20 = vmul.f32 %v7674_v2, %v5623_v15 }
0x1302   :  { %v5612_v14 = vsub.f32 1.0, %v7676_v3  ;;  %v5628_v17 = vmul.f32 %v7676_v3, %v5624_v43 }
0x1357   :  { %v5594_v4 = vpop.permute.xlu1 %5593  ;;  %v5592_v5 = vpop.permute.xlu0 %5591 }
0x1358   :  { %v5598_v6 = vmul.f32 %v7676_v3, %v5594_v4  ;;  %v5597_v7 = vmul.f32 %v7674_v2, %v5592_v5 }
0x135a   :  { %5603 = vrot.lane.b32.xlu1 %v5598_v6, %s7721_s10  ;;  %5601 = vrot.lane.b32.xlu0 %v5597_v7, %s7721_s10 }
0x13cc   :  { %v5604_v8 = vpop.permute.xlu1 %5603  ;;  %v5602_v9 = vpop.permute.xlu0 %5601 }
0x13cd   :  { %v5608_v10 = vadd.f32 %v5604_v8, %v9232_v47  ;;  %v5607_v11 = vadd.f32 %v5602_v9, %v9234_v48  ;;  %v6362_v9 = vld [vmem:[%s9409_s8] ss:$0 sm:$0xff] }
0x13cf   :  { %7677 = vtanh.f32 %v5608_v10 }
0x13d0   :  { %7679 = vtanh.f32 %v5607_v11 }
0x13d9   :  { %v7678_v12 = vpop.eup %7677 }
0x13da   :  { %v7680_v13 = vpop.eup %7679  ;;  %5617 = vrot.lane.b32.xlu1 %v7678_v12, %s7722_s3 }
0x13db   :  { %5615 = vrot.lane.b32.xlu0 %v7680_v13, %s7722_s3 }
0x144c   :  { %v5618_v16 = vpop.permute.xlu1 %5617 }
0x144d   :  { %v5622_v18 = vmul.f32 %v5618_v16, %v5612_v14  ;;  %v5616_v19 = vpop.permute.xlu0 %5615 }
0x144e   :  { %v5621_v21 = vmul.f32 %v5616_v19, %v5611_v45 }
0x144f   :  { %v5630_v22 = vadd.f32 %v5628_v17, %v5622_v18 }
0x1450   :  { %v5629_v23 = vadd.f32 %v5627_v20, %v5621_v21 }
0x1451   :  { %v5634_v24 = vrot.slane %v5630_v22, 5 }
0x1452   :  { %v5633_v25 = vrot.slane %v5629_v23, 6  ;;  %v5761_v60 = vrot.slane %v5629_v23, 7 }
0x1454   :  { %v5635_v26 = vsel %vm4809_vm3, %v5634_v24, %v5633_v25 }
0x1455   :  { %5636 = vrot.lane.b32.xlu0 %v5635_v26, %s7722_s3 }
0x14c7   :  { %v5637_v27 = vpop.permute.xlu0 %5636 }
0x14c8   :  { %7041 = vmatmul.mubr.msk.f32.vlgmr.msra.gmra.mrb[60].mxu1 %vm4678_vm4, %v5637_v27 }
0x159b   :  { %v5706_v28 = vpop.f32.mrb[60].mxu1 }
0x159c   :  { %v5707_v29 = vadd.f32 %v9224_v30, %v5706_v28  ;;  %v7042_v31 = vpop.f32.mrb[61].mxu1 }
0x159e   :  { %v5711_v32 = vrot.slane %v5707_v29, 1  ;;  %v5712_v33 = vrot.slane %v5707_v29, 2 }
0x15a0   :  { %5731 = vrot.lane.b32.xlu0 %v5712_v33, %s7721_s10  ;;  %5729 = vrot.lane.b32.xlu1 %v5711_v32, %s7721_s10  ;;  %v5715_v34 = vadd.f32 %v5711_v32, %v9234_v48  ;;  %v5716_v35 = vadd.f32 %v5712_v33, %v9232_v47 }
0x15a2   :  { %v6360_v36 = vmul.f32 -1.442695, %v5715_v34  ;;  %v6361_v37 = vmul.f32 -1.442695, %v5716_v35 }
0x15a4   :  { %7681 = vpow2.f32 %v6360_v36 }
0x15a5   :  { %7683 = vpow2.f32 %v6361_v37 }
0x15ae   :  { %v7682_v38 = vpop.eup %7681 }
0x15af   :  { %v7684_v39 = vpop.eup %7683  ;;  %v5723_v40 = vadd.f32 1.0, %v7682_v38 }
0x15b0   :  { %v5724_v41 = vadd.f32 1.0, %v7684_v39 }
0x15b1   :  { %7685 = vrcp.f32 %v5723_v40 }
0x15b2   :  { %7687 = vrcp.f32 %v5724_v41 }
0x15bb   :  { %v7686_v30 = vpop.eup %7685 }
0x15bc   :  { %v7688_v44 = vpop.eup %7687  ;;  %v5749_v62 = vsub.f32 1.0, %v7686_v30  ;;  %v5765_v42 = vmul.f32 %v7686_v30, %v5761_v60 }
0x1612   :  { %v5732_v49 = vpop.permute.xlu0 %5731  ;;  %v5730_v50 = vpop.permute.xlu1 %5729 }
0x1613   :  { %v5736_v51 = vmul.f32 %v7688_v44, %v5732_v49  ;;  %v5735_v52 = vmul.f32 %v7686_v30, %v5730_v50 }
0x1615   :  { %5741 = vrot.lane.b32.xlu0 %v5736_v51, %s7721_s10  ;;  %5739 = vrot.lane.b32.xlu1 %v5735_v52, %s7721_s10 }
0x1687   :  { %v5742_v53 = vpop.permute.xlu0 %5741  ;;  %v5740_v54 = vpop.permute.xlu1 %5739 }
0x1688   :  { %v5746_v55 = vadd.f32 %v5742_v53, %v9232_v47  ;;  %v5745_v56 = vadd.f32 %v5740_v54, %v9234_v48  ;;  %v5762_v47 = vrot.slane %v5630_v22, 7  ;;  %v5750_v48 = vsub.f32 1.0, %v7688_v44 }
0x168a   :  { %7689 = vtanh.f32 %v5746_v55  ;;  %v5766_v46 = vmul.f32 %v7688_v44, %v5762_v47 }
0x168b   :  { %7691 = vtanh.f32 %v5745_v56 }
0x1694   :  { %v7690_v59 = vpop.eup %7689 }
0x1695   :  { %v7692_v1 = vpop.eup %7691  ;;  %5755 = vrot.lane.b32.xlu0 %v7690_v59, %s7722_s3 }
0x1696   :  { %5753 = vrot.lane.b32.xlu1 %v7692_v1, %s7722_s3 }
0x1707   :  { %v5756_v61 = vpop.permute.xlu0 %5755 }
0x1708   :  { %v5760_v63 = vmul.f32 %v5756_v61, %v5750_v48  ;;  %v5754_v0 = vpop.permute.xlu1 %5753 }
0x1709   :  { %v5759_v2 = vmul.f32 %v5754_v0, %v5749_v62 }
0x170a   :  { %v5768_v3 = vadd.f32 %v5766_v46, %v5760_v63 }
0x170b   :  { %v5767_v4 = vadd.f32 %v5765_v42, %v5759_v2 }
0x170c   :  { %v5787_v5 = vrot.slane %v5768_v3, 6 }
0x170d   :  { %v5786_v6 = vrot.slane %v5767_v4, 7 }
0x170f   :  { %v5788_v7 = vsel %vm4809_vm3, %v5787_v5, %v5786_v6 }
0x1710   :  { %5789 = vrot.lane.b32.xlu1 %v5788_v7, %s7722_s3 }
0x1782   :  { %v5790_v8 = vpop.permute.xlu1 %5789 }
0x1783   :  { %7052 = vmatmul.mubr.msk.f32.vlgmr.msra.gmra.mrb[58].mxu0 %vm4678_vm4, %v5790_v8 }
0x1856   :  { %v5859_v10 = vpop.f32.mrb[58].mxu0 }
0x1857   :  { %v5860_v11 = vadd.f32 %v6362_v9, %v5859_v10  ;;  %v7053_v12 = vpop.f32.mrb[59].mxu0 }
0x1859   :  { %5864 = vst.msk [vmem:[#allocation2] sm:$0x3] %vm5863_vm5, %v5860_v11 }
0x185a   :  { %7704 = shalt.err (!%p7701_p4)
}
0x185b   :  { %s7705_s1 = scalar_lea.hbm %s9410_s9, 32 }
0x185c   :  { %p7706_p5 = scmp.ne.s32.totalorder %s9410_s9, %s7705_s1  ;;  %p7709_p6 = scmp.lt.u32.totalorder %s7705_s1, %s9410_s9 }
0x185e   :  { %p7711_p7 = pnand %p7709_p6, %p7706_p5 }
0x1860   :  { %7714 = shalt.err (!%p7711_p7)
}
0x1861   :  { %5874 = dma.vmem_to_hbm [thread:$0]  %s5872_s17, 32, %s9410_s9, [#allocation3]  }
0x1862   :  { %7715 = dma.done.wait [#allocation3], 32  }
0x1863   :  { %7716 = vsyncadd [#allocation3], 4294967264 }
0x1864   :  { %5878 = vsyncpa [#allocation3], 1 }

</bundles_post_ra>
